<compile_context>
chip_gen: v5e
topology: v5e:2x2
jax: 0.10.0
libtpu: 0.0.40
codegen_flags: <defaults>
</compile_context>

<pallas_src>
import functools

import jax
import jax.numpy as jnp
from jax import lax
from jax.experimental import pallas as pl
from jax.experimental.pallas import tpu as pltpu

EPS = 1e-5                       # nn.BatchNorm2d default
TM_MAX = 1024                    # rows per kernel-1 tile
VMEM_LIMIT = 48 * 1024 * 1024    # safe on v5e/v6e (128 MiB) and v7x (64 MiB)


def _round_up(x, m):
    return ((x + m - 1) // m) * m


def _pick_tm(m, tmax=TM_MAX):
    """Prefer an exact divisor of m (no padding / masking); otherwise pad."""
    upper = min(tmax, m)
    upper -= upper % 8
    for cand in range(upper, 7, -8):
        if m % cand == 0:
            return cand, False
    return min(tmax, _round_up(m, 8)), True


def _pick_th(h, w, min_positions=2048):
    """TH must divide H and be a multiple of 8 (or equal H) so the output
    BlockSpec stays (8,128)-legal; pick the smallest tile with a decent number
    of spatial positions, else fall back to the full height."""
    cands = sorted({t for t in range(8, h + 1, 8) if h % t == 0} | {h})
    for t in cands:
        if t * w >= min_positions:
            return t
    return h


# ---------------------------------------------------------------------------
# Kernel 1:  h = relu(x * scale + bias) @ W1      (fused BN1 + ReLU + 1x1 conv)
# Also emits per-tile partial sums / sums-of-squares of h (fused BN2 stats).
# x2d: (M_pad, Cin) f32, scale/bias: (1, Cin) f32, W1: (Cin, C4) bf16
#   -> h: (M_pad, C4) bf16, stats: (nb, 8, C4) f32 (row 0 = sum, row 1 = sumsq)
# ---------------------------------------------------------------------------
def _bn_relu_pw_kernel(x_ref, scale_ref, bias_ref, w_ref, h_ref, stats_ref, *,
                       tm, m_valid, need_mask):
    # BN1 + ReLU in f32 on the VPU.
    a = jnp.maximum(x_ref[...] * scale_ref[...] + bias_ref[...], 0.0)

    # 1x1 conv.  f32 operands at the dot: the sandbox's interpret/CPU dot does
    # not implement bf16 x bf16 -> f32.  On TPU hardware, cast `a` to bf16 and
    # feed the bf16 weights straight to the MXU instead.
    h = jnp.dot(a, w_ref[...].astype(jnp.float32),
                preferred_element_type=jnp.float32)           # (tm, C4) f32

    # h stored bf16: dominant intermediate (written here, re-read by kernel 2).
    h_ref[...] = h.astype(h_ref.dtype)

    # BN2 partial statistics from the *pre-cast* f32 accumulator.
    stats_ref[...] = jnp.zeros_like(stats_ref)

    def write_stats(hv):
        stats_ref[0, 0:1, :] = jnp.sum(hv, axis=0, keepdims=True)
        stats_ref[0, 1:2, :] = jnp.sum(hv * hv, axis=0, keepdims=True)

    if need_mask:
        i = pl.program_id(0)
        last = pl.num_programs(0) - 1

        @pl.when(i < last)
        def _():
            write_stats(h)

        @pl.when(i == last)
        def _():
            # Only the final tile holds zero-padded rows; only the statistics
            # need masking (padded h rows are sliced off in the wrapper).
            row = i * tm + lax.broadcasted_iota(jnp.int32, (tm, 1), 0)
            write_stats(h * (row < m_valid).astype(h.dtype))
    else:
        write_stats(h)


def bn_relu_pointwise_conv(x2d, scale, bias, w1_bf16, *, m_valid, tm):
    m_pad, cin = x2d.shape
    c4 = w1_bf16.shape[1]
    nb = m_pad // tm
    kernel = functools.partial(_bn_relu_pw_kernel, tm=tm, m_valid=m_valid,
                               need_mask=(m_pad != m_valid))
    return pl.pallas_call(
        kernel,
        out_shape=(jax.ShapeDtypeStruct((m_pad, c4), jnp.bfloat16),
                   jax.ShapeDtypeStruct((nb, 8, c4), jnp.float32)),
        grid_spec=pltpu.PrefetchScalarGridSpec(
            num_scalar_prefetch=0,
            grid=(nb,),
            in_specs=[
                pl.BlockSpec((tm, cin), lambda i: (i, 0)),
                pl.BlockSpec((1, cin), lambda i: (0, 0)),
                pl.BlockSpec((1, cin), lambda i: (0, 0)),
                pl.BlockSpec((cin, c4), lambda i: (0, 0)),
            ],
            out_specs=[
                pl.BlockSpec((tm, c4), lambda i: (i, 0)),
                pl.BlockSpec((1, 8, c4), lambda i: (i, 0, 0)),
            ],
        ),
        compiler_params=pltpu.CompilerParams(
            dimension_semantics=("parallel",),
            vmem_limit_bytes=VMEM_LIMIT),
    )(x2d, scale, bias, w1_bf16)


# ---------------------------------------------------------------------------
# Kernel 2:  out = conv3x3( relu(h * scale + bias) ), padding=1, H-tiled.
# h: (N, H, W, C4) bf16, W2r: (3, C4, 3*G) f32  ->  out: (N, G, H, W) f32
# Per tile: build a bf16 padded-activation scratch (TH+2, Wp, C4) with a 1-row
# halo from the neighbouring tile (zeros at the true border), then do three
# row-shifted matmuls against (C4, 3G) weight slabs and combine with G-wide
# shifted adds.  No im2col buffer is ever materialised.
# ---------------------------------------------------------------------------
def _bn_relu_conv3_kernel(h_ref, top_ref, bot_ref, scale_ref, bias_ref, w_ref,
                          o_ref, pad_ref):
    _, TH, W, C = h_ref.shape
    Wp = pad_ref.shape[1]                      # round_up(W + 2, 8)
    G3 = w_ref.shape[-1]
    G = G3 // 3
    t = pl.program_id(1)
    nt = pl.num_programs(1)

    scale = scale_ref[...]                     # (1, C) f32
    bias = bias_ref[...]

    def bn_relu(v_bf16):                       # (..., W, C) bf16 -> bf16
        v = v_bf16.astype(jnp.float32)
        return jnp.maximum(v * scale + bias, 0.0).astype(jnp.bfloat16)

    # ---- padded activation tile (bf16 scratch) ------------------------------
    # Left / right zero columns (re-zeroed every step: cheap and megacore-safe).
    pad_ref[:, 0:1, :] = jnp.zeros((TH + 2, 1, C), jnp.bfloat16)
    pad_ref[:, W + 1:Wp, :] = jnp.zeros((TH + 2, Wp - W - 1, C), jnp.bfloat16)

    # Interior: BN2 + ReLU of this tile's rows.
    pad_ref[1:TH + 1, 1:W + 1, :] = bn_relu(h_ref[0])

    # Halo rows: neighbour rows through BN2+ReLU, zeroed at the true border.
    top = bn_relu(top_ref[0]) * (t > 0).astype(jnp.bfloat16)
    pad_ref[0:1, 1:W + 1, :] = top
    bot = bn_relu(bot_ref[0]) * (t < nt - 1).astype(jnp.bfloat16)
    pad_ref[TH + 1:TH + 2, 1:W + 1, :] = bot

    # ---- 3x3 conv: 3 row-shifted matmuls + G-wide shifted adds --------------
    acc = jnp.zeros((TH, W, G), jnp.float32)
    for dy in range(3):
        slab = pad_ref[dy:dy + TH, :, :].reshape(TH * Wp, C)
        # f32 at the dot (sandbox requirement); on TPU hardware feed the bf16
        # slab straight to the MXU (bf16 x bf16 -> f32 accumulation).
        z = jnp.dot(slab.astype(jnp.float32), w_ref[dy],
                    preferred_element_type=jnp.float32)       # (TH*Wp, 3G)
        z = z.reshape(TH, Wp, G3)
        for dx in range(3):
            acc = acc + z[:, dx:dx + W, dx * G:(dx + 1) * G]

    # Channel-major store: (G, TH, W) tile of the (N, G, H, W) output, so the
    # wrapper needs no NHWC->NCHW transpose for the new channels.
    o_ref[0] = jnp.transpose(acc.reshape(TH * W, G)).reshape(
        G, TH, W).astype(o_ref.dtype)


def bn_relu_conv3x3(h, scale, bias, w2r, *, th):
    N, H, W, C = h.shape
    G = w2r.shape[-1] // 3
    nt = H // th
    wp = _round_up(W + 2, 8)
    return pl.pallas_call(
        _bn_relu_conv3_kernel,
        out_shape=jax.ShapeDtypeStruct((N, G, H, W), jnp.float32),
        grid_spec=pltpu.PrefetchScalarGridSpec(
            num_scalar_prefetch=0,
            grid=(N, nt),
            in_specs=[
                # current band of rows
                pl.BlockSpec((1, th, W, C), lambda n, t: (n, t, 0, 0)),
                # 1-row halo above (clamped; zeroed in-kernel at the border)
                pl.BlockSpec((1, 1, W, C),
                             lambda n, t: (n, jnp.maximum(t * th - 1, 0), 0, 0)),
                # 1-row halo below (clamped; zeroed in-kernel at the border)
                pl.BlockSpec((1, 1, W, C),
                             lambda n, t: (n, jnp.minimum((t + 1) * th, H - 1),
                                           0, 0)),
                pl.BlockSpec((1, C), lambda n, t: (0, 0)),
                pl.BlockSpec((1, C), lambda n, t: (0, 0)),
                pl.BlockSpec((3, C, 3 * G), lambda n, t: (0, 0, 0)),
            ],
            out_specs=pl.BlockSpec((1, G, th, W), lambda n, t: (n, 0, t, 0)),
            scratch_shapes=[
                pltpu.VMEM((th + 2, wp, C), jnp.bfloat16),   # padded activation
            ],
        ),
        compiler_params=pltpu.CompilerParams(
            dimension_semantics=("parallel", "parallel"),
            vmem_limit_bytes=VMEM_LIMIT),
    )(h, h, h, scale, bias, w2r)


# ---------------------------------------------------------------------------
# Full Bottleneck forward (NCHW in / NCHW out, matching the PyTorch module)
# ---------------------------------------------------------------------------
@jax.jit
def bottleneck_forward(x_nchw, g1, b1, w1, g2, b2, w2):
    N, Cin, H, W = x_nchw.shape
    C4 = w1.shape[0]
    G = w2.shape[0]
    M = N * H * W

    # ---- BN1 batch statistics: one fused sum / sum-of-squares pass over x
    s1 = jnp.sum(x_nchw, axis=(0, 2, 3))
    q1 = jnp.sum(x_nchw * x_nchw, axis=(0, 2, 3))
    mean1 = s1 / M
    var1 = jnp.maximum(q1 / M - mean1 * mean1, 0.0)     # biased, like PyTorch
    scale1 = g1 * lax.rsqrt(var1 + EPS)
    bias1 = b1 - mean1 * scale1

    # ---- layout for kernel 1: (M, Cin), rows = N*H*W spatial positions
    # TODO(synk): fold this relayout into kernel 1 (NCHW-oriented matmul).
    x2d = jnp.transpose(x_nchw, (0, 2, 3, 1)).reshape(M, Cin)

    tm, padded = _pick_tm(M)
    nb = pl.cdiv(M, tm)
    m_pad = nb * tm
    if padded and m_pad != M:
        x2d = jnp.pad(x2d, ((0, m_pad - M), (0, 0)))

    # ---- Kernel 1: BN1 + ReLU + 1x1 conv (bf16 h + fused BN2 partial stats)
    w1_mat = jnp.transpose(w1[:, :, 0, 0]).astype(jnp.bfloat16)     # (Cin, C4)
    h2d, stats = bn_relu_pointwise_conv(
        x2d,
        scale1.reshape(1, Cin).astype(jnp.float32),
        bias1.reshape(1, Cin).astype(jnp.float32),
        w1_mat, m_valid=M, tm=tm)

    # ---- BN2 batch statistics: tile-wise (Chan) combination of partial sums
    counts = jnp.full((nb,), float(tm), jnp.float32).at[nb - 1].set(
        float(M - (nb - 1) * tm))
    s_k = stats[:, 0, :]                                  # (nb, C4) sums
    q_k = stats[:, 1, :]                                  # (nb, C4) sums of sq
    m_k = s_k / counts[:, None]
    m2_k = jnp.maximum(q_k - s_k * m_k, 0.0)              # per-tile centered SS
    mean2 = jnp.sum(s_k, axis=0) / M
    var2 = (jnp.sum(m2_k, axis=0)
            + jnp.sum(counts[:, None] * (m_k - mean2) ** 2, axis=0)) / M
    var2 = jnp.maximum(var2, 0.0)
    scale2 = g2 * lax.rsqrt(var2 + EPS)
    bias2 = b2 - mean2 * scale2

    # ---- Kernel 2: BN2 + ReLU + 3x3 conv (pad=1), H-tiled with a 1-row halo
    h = h2d[:M].reshape(N, H, W, C4)        # no-op slice when M tiles exactly
    th = _pick_th(H, W)
    # W2 regrouped as (dy, C4, dx*G + g) so each dy band is one (C4, 3G) matmul.
    w2r = jnp.transpose(w2, (2, 1, 3, 0)).reshape(3, C4, 3 * G).astype(
        jnp.float32)
    out_nchw = bn_relu_conv3x3(
        h, scale2.reshape(1, C4).astype(jnp.float32),
        bias2.reshape(1, C4).astype(jnp.float32), w2r, th=th)

    # ---- channel concat (glue)
    return jnp.concatenate([x_nchw, out_nchw], axis=1)


# ---------------------------------------------------------------------------
# Pure-JAX reference (f32, lax.conv) for a correctness check.
# ---------------------------------------------------------------------------
def reference_forward(x, g1, b1, w1, g2, b2, w2):
    m1 = x.mean(axis=(0, 2, 3))
    v1 = x.var(axis=(0, 2, 3))
    xn = (x - m1[None, :, None, None]) / jnp.sqrt(v1[None, :, None, None] + EPS)
    a = jnp.maximum(xn * g1[None, :, None, None] + b1[None, :, None, None], 0.0)
    h = lax.conv_general_dilated(a, w1, (1, 1), "VALID",
                                 dimension_numbers=("NCHW", "OIHW", "NCHW"))
    m2 = h.mean(axis=(0, 2, 3))
    v2 = h.var(axis=(0, 2, 3))
    hn = (h - m2[None, :, None, None]) / jnp.sqrt(v2[None, :, None, None] + EPS)
    a2 = jnp.maximum(hn * g2[None, :, None, None] + b2[None, :, None, None], 0.0)
    out = lax.conv_general_dilated(a2, w2, (1, 1), ((1, 1), (1, 1)),
                                   dimension_numbers=("NCHW", "OIHW", "NCHW"))
    return jnp.concatenate([x, out], axis=1)


if __name__ == "__main__":
    # Small deterministic config: Bottleneck(in_c=4, growthRate=4)
    N, Cin, H, W = 2, 4, 16, 16
    growth = 4
    C4 = 4 * growth     # 16
    G = growth          # 4

    key = jax.random.PRNGKey(0)
    kx, k1, k2, kg1, kb1, kg2, kb2 = jax.random.split(key, 7)

    x = jax.random.normal(kx, (N, Cin, H, W), dtype=jnp.float32)
    w1 = jax.random.normal(k1, (C4, Cin, 1, 1), dtype=jnp.float32) * 0.2
    w2 = jax.random.normal(k2, (G, C4, 3, 3), dtype=jnp.float32) * 0.1
    g1 = 1.0 + 0.1 * jax.random.normal(kg1, (Cin,), dtype=jnp.float32)
    b1 = 0.1 * jax.random.normal(kb1, (Cin,), dtype=jnp.float32)
    g2 = 1.0 + 0.1 * jax.random.normal(kg2, (C4,), dtype=jnp.float32)
    b2 = 0.1 * jax.random.normal(kb2, (C4,), dtype=jnp.float32)

    y = jax.block_until_ready(bottleneck_forward(x, g1, b1, w1, g2, b2, w2))
    y_ref = jax.block_until_ready(reference_forward(x, g1, b1, w1, g2, b2, w2))

    assert y.shape == (N, Cin + G, H, W), y.shape
    # Passthrough channels are copied bit-exactly.
    assert bool(jnp.array_equal(y[:, :Cin], x))
    # New channels: h/w1 stored in bf16 -> loosened tolerance.
    max_err = float(jnp.max(jnp.abs(y[:, Cin:] - y_ref[:, Cin:])))
    assert jnp.allclose(y[:, Cin:], y_ref[:, Cin:], rtol=5e-2, atol=5e-2), max_err

    print("KERNEL_OK")
</pallas_src>

<mosaic_0001>
module attributes {stable_mosaic.version = 11 : i64} {
  func.func @_bn_relu_conv3_kernel(%arg0: i32, %arg1: i32, %arg2: memref<1x16x16x16xbf16, #tpu.memory_space<vmem>>, %arg3: memref<1x1x16x16xbf16, #tpu.memory_space<vmem>>, %arg4: memref<1x1x16x16xbf16, #tpu.memory_space<vmem>>, %arg5: memref<1x16xf32, #tpu.memory_space<vmem>>, %arg6: memref<1x16xf32, #tpu.memory_space<vmem>>, %arg7: memref<3x16x12xf32, #tpu.memory_space<vmem>>, %arg8: memref<1x4x16x16xf32, #tpu.memory_space<vmem>>, %arg9: memref<18x24x16xbf16, #tpu.memory_space<vmem>>) attributes {dimension_semantics = [#tpu.dimension_semantics<parallel>, #tpu.dimension_semantics<parallel>], iteration_bounds = array<i64: 2, 1>, scalar_prefetch = 0 : i64, scratch_operands = 1 : i64, tpu.core_type = #tpu.core_type<tc>, window_params = [{transform_indices = @transform_0, window_bounds = array<i64: 1, 16, 16, 16>}, {transform_indices = @transform_1, window_bounds = array<i64: 1, 1, 16, 16>}, {transform_indices = @transform_2, window_bounds = array<i64: 1, 1, 16, 16>}, {pipeline_mode = #tpu.pipeline_mode<synchronous>, transform_indices = @transform_3, window_bounds = array<i64: 1, 16>}, {pipeline_mode = #tpu.pipeline_mode<synchronous>, transform_indices = @transform_4, window_bounds = array<i64: 1, 16>}, {pipeline_mode = #tpu.pipeline_mode<synchronous>, transform_indices = @transform_5, window_bounds = array<i64: 3, 16, 12>}, {transform_indices = @transform_6, window_bounds = array<i64: 1, 4, 16, 16>}]} {
    %c0 = arith.constant 0 : index
    %c0_0 = arith.constant 0 : index
    %0 = vector.load %arg5[%c0, %c0_0] : memref<1x16xf32, #tpu.memory_space<vmem>>, vector<1x16xf32>
    %c0_1 = arith.constant 0 : index
    %c0_2 = arith.constant 0 : index
    %1 = vector.load %arg6[%c0_1, %c0_2] : memref<1x16xf32, #tpu.memory_space<vmem>>, vector<1x16xf32>
    %cst = arith.constant 0.000000e+00 : bf16
    %2 = vector.broadcast %cst : bf16 to vector<18x1x16xbf16>
    %c0_3 = arith.constant 0 : index
    %c0_4 = arith.constant 0 : index
    %c0_5 = arith.constant 0 : index
    %3 = vector.load %arg9[%c0_3, %c0_4, %c0_5] : memref<18x24x16xbf16, #tpu.memory_space<vmem>>, vector<18x1x16xbf16>
    tpu.vector_store %arg9[%c0_3, %c0_4, %c0_5], %2 {strides = array<i32>} : memref<18x24x16xbf16, #tpu.memory_space<vmem>>, vector<18x1x16xbf16>,
    %cst_6 = arith.constant 0.000000e+00 : bf16
    %4 = vector.broadcast %cst_6 : bf16 to vector<18x7x16xbf16>
    %c0_7 = arith.constant 0 : index
    %c17 = arith.constant 17 : index
    %c0_8 = arith.constant 0 : index
    %5 = vector.load %arg9[%c0_7, %c17, %c0_8] : memref<18x24x16xbf16, #tpu.memory_space<vmem>>, vector<18x7x16xbf16>
    tpu.vector_store %arg9[%c0_7, %c17, %c0_8], %4 {strides = array<i32>} : memref<18x24x16xbf16, #tpu.memory_space<vmem>>, vector<18x7x16xbf16>,
    %c0_9 = arith.constant 0 : index
    %c0_10 = arith.constant 0 : index
    %c0_11 = arith.constant 0 : index
    %c0_12 = arith.constant 0 : index
    %6 = vector.load %arg2[%c0_9, %c0_10, %c0_11, %c0_12] : memref<1x16x16x16xbf16, #tpu.memory_space<vmem>>, vector<1x16x16x16xbf16>
    %7 = vector.shape_cast %6 : vector<1x16x16x16xbf16> to vector<16x16x16xbf16>
    %8 = arith.extf %7 : vector<16x16x16xbf16> to vector<16x16x16xf32>
    %9 = vector.shape_cast %0 : vector<1x16xf32> to vector<1x1x16xf32>
    %10 = vector.broadcast %9 : vector<1x1x16xf32> to vector<16x16x16xf32>
    %11 = arith.mulf %8, %10 : vector<16x16x16xf32>
    %12 = vector.shape_cast %1 : vector<1x16xf32> to vector<1x1x16xf32>
    %13 = vector.broadcast %12 : vector<1x1x16xf32> to vector<16x16x16xf32>
    %14 = arith.addf %11, %13 : vector<16x16x16xf32>
    %cst_13 = arith.constant 0.000000e+00 : f32
    %15 = vector.broadcast %cst_13 : f32 to vector<16x16x16xf32>
    %16 = arith.maximumf %14, %15 : vector<16x16x16xf32>
    %17 = arith.truncf %16 : vector<16x16x16xf32> to vector<16x16x16xbf16>
    %c1 = arith.constant 1 : index
    %c1_14 = arith.constant 1 : index
    %c0_15 = arith.constant 0 : index
    %18 = vector.load %arg9[%c1, %c1_14, %c0_15] : memref<18x24x16xbf16, #tpu.memory_space<vmem>>, vector<16x16x16xbf16>
    tpu.vector_store %arg9[%c1, %c1_14, %c0_15], %17 {strides = array<i32>} : memref<18x24x16xbf16, #tpu.memory_space<vmem>>, vector<16x16x16xbf16>,
    %c0_16 = arith.constant 0 : index
    %c0_17 = arith.constant 0 : index
    %c0_18 = arith.constant 0 : index
    %c0_19 = arith.constant 0 : index
    %19 = vector.load %arg3[%c0_16, %c0_17, %c0_18, %c0_19] : memref<1x1x16x16xbf16, #tpu.memory_space<vmem>>, vector<1x1x16x16xbf16>
    %20 = vector.shape_cast %19 : vector<1x1x16x16xbf16> to vector<1x16x16xbf16>
    %21 = arith.extf %20 : vector<1x16x16xbf16> to vector<1x16x16xf32>
    %22 = vector.shape_cast %0 : vector<1x16xf32> to vector<1x1x16xf32>
    %23 = vector.broadcast %22 : vector<1x1x16xf32> to vector<1x16x16xf32>
    %24 = arith.mulf %21, %23 : vector<1x16x16xf32>
    %25 = vector.shape_cast %1 : vector<1x16xf32> to vector<1x1x16xf32>
    %26 = vector.broadcast %25 : vector<1x1x16xf32> to vector<1x16x16xf32>
    %27 = arith.addf %24, %26 : vector<1x16x16xf32>
    %cst_20 = arith.constant 0.000000e+00 : f32
    %28 = vector.broadcast %cst_20 : f32 to vector<1x16x16xf32>
    %29 = arith.maximumf %27, %28 : vector<1x16x16xf32>
    %30 = arith.truncf %29 : vector<1x16x16xf32> to vector<1x16x16xbf16>
    %c0_i32 = arith.constant 0 : i32
    %31 = arith.cmpi sgt, %arg1, %c0_i32 : i32
    %32 = arith.extui %31 : i1 to i32
    %33 = arith.sitofp %32 : i32 to f32
    %34 = arith.truncf %33 : f32 to bf16
    %35 = vector.broadcast %34 : bf16 to vector<1x16x16xbf16>
    %36 = arith.mulf %30, %35 : vector<1x16x16xbf16>
    %c0_21 = arith.constant 0 : index
    %c1_22 = arith.constant 1 : index
    %c0_23 = arith.constant 0 : index
    %37 = vector.load %arg9[%c0_21, %c1_22, %c0_23] : memref<18x24x16xbf16, #tpu.memory_space<vmem>>, vector<1x16x16xbf16>
    tpu.vector_store %arg9[%c0_21, %c1_22, %c0_23], %36 {strides = array<i32>} : memref<18x24x16xbf16, #tpu.memory_space<vmem>>, vector<1x16x16xbf16>,
    %c0_24 = arith.constant 0 : index
    %c0_25 = arith.constant 0 : index
    %c0_26 = arith.constant 0 : index
    %c0_27 = arith.constant 0 : index
    %38 = vector.load %arg4[%c0_24, %c0_25, %c0_26, %c0_27] : memref<1x1x16x16xbf16, #tpu.memory_space<vmem>>, vector<1x1x16x16xbf16>
    %39 = vector.shape_cast %38 : vector<1x1x16x16xbf16> to vector<1x16x16xbf16>
    %40 = arith.extf %39 : vector<1x16x16xbf16> to vector<1x16x16xf32>
    %41 = vector.shape_cast %0 : vector<1x16xf32> to vector<1x1x16xf32>
    %42 = vector.broadcast %41 : vector<1x1x16xf32> to vector<1x16x16xf32>
    %43 = arith.mulf %40, %42 : vector<1x16x16xf32>
    %44 = vector.shape_cast %1 : vector<1x16xf32> to vector<1x1x16xf32>
    %45 = vector.broadcast %44 : vector<1x1x16xf32> to vector<1x16x16xf32>
    %46 = arith.addf %43, %45 : vector<1x16x16xf32>
    %cst_28 = arith.constant 0.000000e+00 : f32
    %47 = vector.broadcast %cst_28 : f32 to vector<1x16x16xf32>
    %48 = arith.maximumf %46, %47 : vector<1x16x16xf32>
    %49 = arith.truncf %48 : vector<1x16x16xf32> to vector<1x16x16xbf16>
    %c0_i32_29 = arith.constant 0 : i32
    %50 = arith.cmpi slt, %arg1, %c0_i32_29 : i32
    %51 = arith.extui %50 : i1 to i32
    %52 = arith.sitofp %51 : i32 to f32
    %53 = arith.truncf %52 : f32 to bf16
    %54 = vector.broadcast %53 : bf16 to vector<1x16x16xbf16>
    %55 = arith.mulf %49, %54 : vector<1x16x16xbf16>
    %c17_30 = arith.constant 17 : index
    %c1_31 = arith.constant 1 : index
    %c0_32 = arith.constant 0 : index
    %56 = vector.load %arg9[%c17_30, %c1_31, %c0_32] : memref<18x24x16xbf16, #tpu.memory_space<vmem>>, vector<1x16x16xbf16>
    tpu.vector_store %arg9[%c17_30, %c1_31, %c0_32], %55 {strides = array<i32>} : memref<18x24x16xbf16, #tpu.memory_space<vmem>>, vector<1x16x16xbf16>,
    %cst_33 = arith.constant 0.000000e+00 : f32
    %57 = vector.broadcast %cst_33 : f32 to vector<16x16x4xf32>
    %c0_34 = arith.constant 0 : index
    %c0_35 = arith.constant 0 : index
    %c0_36 = arith.constant 0 : index
    %58 = vector.load %arg9[%c0_34, %c0_35, %c0_36] : memref<18x24x16xbf16, #tpu.memory_space<vmem>>, vector<16x24x16xbf16>
    %59 = vector.shape_cast %58 : vector<16x24x16xbf16> to vector<384x16xbf16>
    %60 = arith.extf %59 : vector<384x16xbf16> to vector<384x16xf32>
    %c0_37 = arith.constant 0 : index
    %c0_38 = arith.constant 0 : index
    %c0_39 = arith.constant 0 : index
    %61 = vector.load %arg7[%c0_37, %c0_38, %c0_39] : memref<3x16x12xf32, #tpu.memory_space<vmem>>, vector<1x16x12xf32>
    %62 = vector.shape_cast %61 : vector<1x16x12xf32> to vector<16x12xf32>
    %cst_40 = arith.constant dense<0.000000e+00> : vector<384x12xf32>
    %63 = tpu.matmul %60, %62, %cst_40 {dimension_numbers = #tpu.dot_dimension_numbers<[1], [0], [0], [1], [0, 0, 1, 1], [], []>} : vector<384x16xf32>, vector<16x12xf32>, vector<384x12xf32> -> vector<384x12xf32>
    %64 = vector.shape_cast %63 : vector<384x12xf32> to vector<16x24x12xf32>
    %65 = vector.extract_strided_slice %64 {offsets = [0, 0, 0], sizes = [16, 16, 4], strides = [1, 1, 1]} : vector<16x24x12xf32> to vector<16x16x4xf32>
    %66 = arith.addf %57, %65 : vector<16x16x4xf32>
    %67 = vector.extract_strided_slice %64 {offsets = [0, 1, 4], sizes = [16, 16, 4], strides = [1, 1, 1]} : vector<16x24x12xf32> to vector<16x16x4xf32>
    %68 = arith.addf %66, %67 : vector<16x16x4xf32>
    %69 = vector.extract_strided_slice %64 {offsets = [0, 2, 8], sizes = [16, 16, 4], strides = [1, 1, 1]} : vector<16x24x12xf32> to vector<16x16x4xf32>
    %70 = arith.addf %68, %69 : vector<16x16x4xf32>
    %c1_41 = arith.constant 1 : index
    %c0_42 = arith.constant 0 : index
    %c0_43 = arith.constant 0 : index
    %71 = vector.load %arg9[%c1_41, %c0_42, %c0_43] : memref<18x24x16xbf16, #tpu.memory_space<vmem>>, vector<16x24x16xbf16>
    %72 = vector.shape_cast %71 : vector<16x24x16xbf16> to vector<384x16xbf16>
    %73 = arith.extf %72 : vector<384x16xbf16> to vector<384x16xf32>
    %c1_44 = arith.constant 1 : index
    %c0_45 = arith.constant 0 : index
    %c0_46 = arith.constant 0 : index
    %74 = vector.load %arg7[%c1_44, %c0_45, %c0_46] : memref<3x16x12xf32, #tpu.memory_space<vmem>>, vector<1x16x12xf32>
    %75 = vector.shape_cast %74 : vector<1x16x12xf32> to vector<16x12xf32>
    %cst_47 = arith.constant dense<0.000000e+00> : vector<384x12xf32>
    %76 = tpu.matmul %73, %75, %cst_47 {dimension_numbers = #tpu.dot_dimension_numbers<[1], [0], [0], [1], [0, 0, 1, 1], [], []>} : vector<384x16xf32>, vector<16x12xf32>, vector<384x12xf32> -> vector<384x12xf32>
    %77 = vector.shape_cast %76 : vector<384x12xf32> to vector<16x24x12xf32>
    %78 = vector.extract_strided_slice %77 {offsets = [0, 0, 0], sizes = [16, 16, 4], strides = [1, 1, 1]} : vector<16x24x12xf32> to vector<16x16x4xf32>
    %79 = arith.addf %70, %78 : vector<16x16x4xf32>
    %80 = vector.extract_strided_slice %77 {offsets = [0, 1, 4], sizes = [16, 16, 4], strides = [1, 1, 1]} : vector<16x24x12xf32> to vector<16x16x4xf32>
    %81 = arith.addf %79, %80 : vector<16x16x4xf32>
    %82 = vector.extract_strided_slice %77 {offsets = [0, 2, 8], sizes = [16, 16, 4], strides = [1, 1, 1]} : vector<16x24x12xf32> to vector<16x16x4xf32>
    %83 = arith.addf %81, %82 : vector<16x16x4xf32>
    %c2 = arith.constant 2 : index
    %c0_48 = arith.constant 0 : index
    %c0_49 = arith.constant 0 : index
    %84 = vector.load %arg9[%c2, %c0_48, %c0_49] : memref<18x24x16xbf16, #tpu.memory_space<vmem>>, vector<16x24x16xbf16>
    %85 = vector.shape_cast %84 : vector<16x24x16xbf16> to vector<384x16xbf16>
    %86 = arith.extf %85 : vector<384x16xbf16> to vector<384x16xf32>
    %c2_50 = arith.constant 2 : index
    %c0_51 = arith.constant 0 : index
    %c0_52 = arith.constant 0 : index
    %87 = vector.load %arg7[%c2_50, %c0_51, %c0_52] : memref<3x16x12xf32, #tpu.memory_space<vmem>>, vector<1x16x12xf32>
    %88 = vector.shape_cast %87 : vector<1x16x12xf32> to vector<16x12xf32>
    %cst_53 = arith.constant dense<0.000000e+00> : vector<384x12xf32>
    %89 = tpu.matmul %86, %88, %cst_53 {dimension_numbers = #tpu.dot_dimension_numbers<[1], [0], [0], [1], [0, 0, 1, 1], [], []>} : vector<384x16xf32>, vector<16x12xf32>, vector<384x12xf32> -> vector<384x12xf32>
    %90 = vector.shape_cast %89 : vector<384x12xf32> to vector<16x24x12xf32>
    %91 = vector.extract_strided_slice %90 {offsets = [0, 0, 0], sizes = [16, 16, 4], strides = [1, 1, 1]} : vector<16x24x12xf32> to vector<16x16x4xf32>
    %92 = arith.addf %83, %91 : vector<16x16x4xf32>
    %93 = vector.extract_strided_slice %90 {offsets = [0, 1, 4], sizes = [16, 16, 4], strides = [1, 1, 1]} : vector<16x24x12xf32> to vector<16x16x4xf32>
    %94 = arith.addf %92, %93 : vector<16x16x4xf32>
    %95 = vector.extract_strided_slice %90 {offsets = [0, 2, 8], sizes = [16, 16, 4], strides = [1, 1, 1]} : vector<16x24x12xf32> to vector<16x16x4xf32>
    %96 = arith.addf %94, %95 : vector<16x16x4xf32>
    %97 = vector.shape_cast %96 : vector<16x16x4xf32> to vector<256x4xf32>
    %98 = tpu.transpose %97, [1, 0] : vector<256x4xf32> -> vector<4x256xf32>
    %99 = vector.shape_cast %98 : vector<4x256xf32> to vector<4x16x16xf32>
    %c0_54 = arith.constant 0 : index
    %c0_55 = arith.constant 0 : index
    %c0_56 = arith.constant 0 : index
    %c0_57 = arith.constant 0 : index
    %100 = vector.load %arg8[%c0_54, %c0_55, %c0_56, %c0_57] : memref<1x4x16x16xf32, #tpu.memory_space<vmem>>, vector<1x4x16x16xf32>
    %101 = vector.shape_cast %100 : vector<1x4x16x16xf32> to vector<4x16x16xf32>
    %102 = vector.shape_cast %99 : vector<4x16x16xf32> to vector<1x4x16x16xf32>
    tpu.vector_store %arg8[%c0_54, %c0_55, %c0_56, %c0_57], %102 {strides = array<i32>} : memref<1x4x16x16xf32, #tpu.memory_space<vmem>>, vector<1x4x16x16xf32>,
    return
  }
  func.func @transform_0(%arg0: i32, %arg1: i32) -> (i32, i32, i32, i32) {
    %c0_i32 = arith.constant 0 : i32
    %c0_i32_0 = arith.constant 0 : i32
    %c0_i32_1 = arith.constant 0 : i32
    return %arg0, %arg1, %c0_i32, %c0_i32_0 : i32, i32, i32, i32
  }
  func.func @transform_1(%arg0: i32, %arg1: i32) -> (i32, i32, i32, i32) {
    %c16_i32 = arith.constant 16 : i32
    %0 = arith.muli %arg1, %c16_i32 : i32
    %c1_i32 = arith.constant 1 : i32
    %1 = arith.subi %0, %c1_i32 : i32
    %c0_i32 = arith.constant 0 : i32
    %2 = arith.maxsi %1, %c0_i32 : i32
    %c0_i32_0 = arith.constant 0 : i32
    %c0_i32_1 = arith.constant 0 : i32
    %c0_i32_2 = arith.constant 0 : i32
    return %arg0, %2, %c0_i32_0, %c0_i32_1 : i32, i32, i32, i32
  }
  func.func @transform_2(%arg0: i32, %arg1: i32) -> (i32, i32, i32, i32) {
    %c1_i32 = arith.constant 1 : i32
    %0 = arith.addi %arg1, %c1_i32 : i32
    %c16_i32 = arith.constant 16 : i32
    %1 = arith.muli %0, %c16_i32 : i32
    %c15_i32 = arith.constant 15 : i32
    %2 = arith.minsi %1, %c15_i32 : i32
    %c0_i32 = arith.constant 0 : i32
    %c0_i32_0 = arith.constant 0 : i32
    %c0_i32_1 = arith.constant 0 : i32
    return %arg0, %2, %c0_i32, %c0_i32_0 : i32, i32, i32, i32
  }
  func.func @transform_3(%arg0: i32, %arg1: i32) -> (i32, i32) {
    %c0_i32 = arith.constant 0 : i32
    %c0_i32_0 = arith.constant 0 : i32
    %c0_i32_1 = arith.constant 0 : i32
    return %c0_i32, %c0_i32_0 : i32, i32
  }
  func.func @transform_4(%arg0: i32, %arg1: i32) -> (i32, i32) {
    %c0_i32 = arith.constant 0 : i32
    %c0_i32_0 = arith.constant 0 : i32
    %c0_i32_1 = arith.constant 0 : i32
    return %c0_i32, %c0_i32_0 : i32, i32
  }
  func.func @transform_5(%arg0: i32, %arg1: i32) -> (i32, i32, i32) {
    %c0_i32 = arith.constant 0 : i32
    %c0_i32_0 = arith.constant 0 : i32
    %c0_i32_1 = arith.constant 0 : i32
    %c0_i32_2 = arith.constant 0 : i32
    return %c0_i32, %c0_i32_0, %c0_i32_1 : i32, i32, i32
  }
  func.func @transform_6(%arg0: i32, %arg1: i32) -> (i32, i32, i32, i32) {
    %c0_i32 = arith.constant 0 : i32
    %c0_i32_0 = arith.constant 0 : i32
    %c0_i32_1 = arith.constant 0 : i32
    return %arg0, %c0_i32, %arg1, %c0_i32_0 : i32, i32, i32, i32
  }
}

module attributes {stable_mosaic.version = 11 : i64} {
  func.func @_bn_relu_pw_kernel(%arg0: i32, %arg1: memref<512x4xf32, #tpu.memory_space<vmem>>, %arg2: memref<1x4xf32, #tpu.memory_space<vmem>>, %arg3: memref<1x4xf32, #tpu.memory_space<vmem>>, %arg4: memref<4x16xbf16, #tpu.memory_space<vmem>>, %arg5: memref<512x16xbf16, #tpu.memory_space<vmem>>, %arg6: memref<1x8x16xf32, #tpu.memory_space<vmem>>) attributes {dimension_semantics = [#tpu.dimension_semantics<parallel>], iteration_bounds = array<i64: 1>, scalar_prefetch = 0 : i64, scratch_operands = 0 : i64, tpu.core_type = #tpu.core_type<tc>, window_params = [{transform_indices = @transform_0, window_bounds = array<i64: 512, 4>}, {pipeline_mode = #tpu.pipeline_mode<synchronous>, transform_indices = @transform_1, window_bounds = array<i64: 1, 4>}, {pipeline_mode = #tpu.pipeline_mode<synchronous>, transform_indices = @transform_2, window_bounds = array<i64: 1, 4>}, {pipeline_mode = #tpu.pipeline_mode<synchronous>, transform_indices = @transform_3, window_bounds = array<i64: 4, 16>}, {transform_indices = @transform_4, window_bounds = array<i64: 512, 16>}, {transform_indices = @transform_5, window_bounds = array<i64: 1, 8, 16>}]} {
    %c0 = arith.constant 0 : index
    %c0_0 = arith.constant 0 : index
    %0 = vector.load %arg1[%c0, %c0_0] : memref<512x4xf32, #tpu.memory_space<vmem>>, vector<512x4xf32>
    %c0_1 = arith.constant 0 : index
    %c0_2 = arith.constant 0 : index
    %1 = vector.load %arg2[%c0_1, %c0_2] : memref<1x4xf32, #tpu.memory_space<vmem>>, vector<1x4xf32>
    %2 = vector.broadcast %1 : vector<1x4xf32> to vector<512x4xf32>
    %3 = arith.mulf %0, %2 : vector<512x4xf32>
    %c0_3 = arith.constant 0 : index
    %c0_4 = arith.constant 0 : index
    %4 = vector.load %arg3[%c0_3, %c0_4] : memref<1x4xf32, #tpu.memory_space<vmem>>, vector<1x4xf32>
    %5 = vector.broadcast %4 : vector<1x4xf32> to vector<512x4xf32>
    %6 = arith.addf %3, %5 : vector<512x4xf32>
    %cst = arith.constant 0.000000e+00 : f32
    %7 = vector.broadcast %cst : f32 to vector<512x4xf32>
    %8 = arith.maximumf %6, %7 : vector<512x4xf32>
    %c0_5 = arith.constant 0 : index
    %c0_6 = arith.constant 0 : index
    %9 = vector.load %arg4[%c0_5, %c0_6] : memref<4x16xbf16, #tpu.memory_space<vmem>>, vector<4x16xbf16>
    %10 = arith.extf %9 : vector<4x16xbf16> to vector<4x16xf32>
    %cst_7 = arith.constant dense<0.000000e+00> : vector<512x16xf32>
    %11 = tpu.matmul %8, %10, %cst_7 {dimension_numbers = #tpu.dot_dimension_numbers<[1], [0], [0], [1], [0, 0, 1, 1], [], []>} : vector<512x4xf32>, vector<4x16xf32>, vector<512x16xf32> -> vector<512x16xf32>
    %12 = arith.truncf %11 : vector<512x16xf32> to vector<512x16xbf16>
    %c0_8 = arith.constant 0 : index
    %c0_9 = arith.constant 0 : index
    %13 = vector.load %arg5[%c0_8, %c0_9] : memref<512x16xbf16, #tpu.memory_space<vmem>>, vector<512x16xbf16>
    tpu.vector_store %arg5[%c0_8, %c0_9], %12 {strides = array<i32>} : memref<512x16xbf16, #tpu.memory_space<vmem>>, vector<512x16xbf16>,
    %cst_10 = arith.constant 0.000000e+00 : f32
    %14 = vector.broadcast %cst_10 : f32 to vector<1x8x16xf32>
    %c0_11 = arith.constant 0 : index
    %c0_12 = arith.constant 0 : index
    %c0_13 = arith.constant 0 : index
    %15 = vector.load %arg6[%c0_11, %c0_12, %c0_13] : memref<1x8x16xf32, #tpu.memory_space<vmem>>, vector<1x8x16xf32>
    tpu.vector_store %arg6[%c0_11, %c0_12, %c0_13], %14 {strides = array<i32>} : memref<1x8x16xf32, #tpu.memory_space<vmem>>, vector<1x8x16xf32>,
    %cst_14 = arith.constant dense<0.000000e+00> : vector<16xf32>
    %16 = vector.multi_reduction <add>, %11, %cst_14 [0] : vector<512x16xf32> to vector<16xf32>
    %17 = vector.shape_cast %16 : vector<16xf32> to vector<1x16xf32>
    %c0_15 = arith.constant 0 : index
    %c0_16 = arith.constant 0 : index
    %c0_17 = arith.constant 0 : index
    %18 = vector.load %arg6[%c0_15, %c0_16, %c0_17] : memref<1x8x16xf32, #tpu.memory_space<vmem>>, vector<1x1x16xf32>
    %19 = vector.shape_cast %18 : vector<1x1x16xf32> to vector<1x16xf32>
    %20 = vector.shape_cast %17 : vector<1x16xf32> to vector<1x1x16xf32>
    tpu.vector_store %arg6[%c0_15, %c0_16, %c0_17], %20 {strides = array<i32>} : memref<1x8x16xf32, #tpu.memory_space<vmem>>, vector<1x1x16xf32>,
    %21 = arith.mulf %11, %11 : vector<512x16xf32>
    %cst_18 = arith.constant dense<0.000000e+00> : vector<16xf32>
    %22 = vector.multi_reduction <add>, %21, %cst_18 [0] : vector<512x16xf32> to vector<16xf32>
    %23 = vector.shape_cast %22 : vector<16xf32> to vector<1x16xf32>
    %c0_19 = arith.constant 0 : index
    %c1 = arith.constant 1 : index
    %c0_20 = arith.constant 0 : index
    %24 = vector.load %arg6[%c0_19, %c1, %c0_20] : memref<1x8x16xf32, #tpu.memory_space<vmem>>, vector<1x1x16xf32>
    %25 = vector.shape_cast %24 : vector<1x1x16xf32> to vector<1x16xf32>
    %26 = vector.shape_cast %23 : vector<1x16xf32> to vector<1x1x16xf32>
    tpu.vector_store %arg6[%c0_19, %c1, %c0_20], %26 {strides = array<i32>} : memref<1x8x16xf32, #tpu.memory_space<vmem>>, vector<1x1x16xf32>,
    return
  }
  func.func @transform_0(%arg0: i32) -> (i32, i32) {
    %c0_i32 = arith.constant 0 : i32
    %c0_i32_0 = arith.constant 0 : i32
    return %arg0, %c0_i32 : i32, i32
  }
  func.func @transform_1(%arg0: i32) -> (i32, i32) {
    %c0_i32 = arith.constant 0 : i32
    %c0_i32_0 = arith.constant 0 : i32
    %c0_i32_1 = arith.constant 0 : i32
    return %c0_i32, %c0_i32_0 : i32, i32
  }
  func.func @transform_2(%arg0: i32) -> (i32, i32) {
    %c0_i32 = arith.constant 0 : i32
    %c0_i32_0 = arith.constant 0 : i32
    %c0_i32_1 = arith.constant 0 : i32
    return %c0_i32, %c0_i32_0 : i32, i32
  }
  func.func @transform_3(%arg0: i32) -> (i32, i32) {
    %c0_i32 = arith.constant 0 : i32
    %c0_i32_0 = arith.constant 0 : i32
    %c0_i32_1 = arith.constant 0 : i32
    return %c0_i32, %c0_i32_0 : i32, i32
  }
  func.func @transform_4(%arg0: i32) -> (i32, i32) {
    %c0_i32 = arith.constant 0 : i32
    %c0_i32_0 = arith.constant 0 : i32
    return %arg0, %c0_i32 : i32, i32
  }
  func.func @transform_5(%arg0: i32) -> (i32, i32, i32) {
    %c0_i32 = arith.constant 0 : i32
    %c0_i32_0 = arith.constant 0 : i32
    %c0_i32_1 = arith.constant 0 : i32
    return %arg0, %c0_i32, %c0_i32_0 : i32, i32, i32
  }
}

</mosaic_0001>

<bundles_post_ra>
// kernel: bottleneck_forward.2
= control target key start
LH: loop header
LB: loop body
LE: loop exit
PB: predicated region body
PF: predicated region fallthrough
CT: control target
= control target key end

     0   :  { %vm478_vm0 = vcmask 1043456   ;;  %vm285_vm1 = vcmask 31744   ;;  %vm755_vm2 = vcmask 125952   ;;  %vm820_vm3 = vcmask 130048   ;;  %s2447_s3 = inlined_call_operand.vmem [shape: bf16[4,16], index: 3, kind: input, shape index: {}]   ;;  %s2448_s0 = inlined_call_operand.vmem [shape: f32[512,4], index: 0, kind: input, shape index: {}]   ;;  %s2449_s1 = inlined_call_operand.vmem [shape: f32[1,4], index: 1, kind: input, shape index: {}]   ;;  %s2450_s2 = inlined_call_operand.vmem [shape: f32[1,4], index: 2, kind: input, shape index: {}]   ;;  %s2451_s4 = inlined_call_operand.vmem [shape: bf16[512,16], index: 4, kind: output, shape index: {0}]   ;;  %s2452_s5 = inlined_call_operand.vmem [shape: f32[1,8,16], index: 5, kind: output, shape index: {1}]  }
   0x1   :  { %v283_v0 = vld [vmem:[%s2447_s3] sm:$0x3]  ;;  %v20_v5 = vld [vmem:[%s2448_s0 + $0x8] sm:$0xff]  ;;  %v21_v15 = vld [vmem:[%s2448_s0 + $0x10] sm:$0xff]  ;;  %vm955_vm4 = vcmask 122880  }
   0x2   :  { %v19_v1 = vld [vmem:[%s2448_s0] sm:$0xff]  ;;  %v284_v2 = vunpack.c.l.bf16 %v283_v0  ;;  %v36_v16 = vld [vmem:[%s2448_s0 + $0x88] sm:$0xff]  ;;  %v22_v23 = vld [vmem:[%s2448_s0 + $0x18] sm:$0xff] }
   0x3   :  { %v1274_v3 = vld [vmem:[%s2449_s1] ss:$0 sm:$0xff]  ;;  %v37_v24 = vld [vmem:[%s2448_s0 + $0x90] sm:$0xff]  ;;  %v38_v32 = vld [vmem:[%s2448_s0 + $0x98] sm:$0xff] }
   0x4   :  { %v1279_v4 = vld [vmem:[%s2450_s2] ss:$0 sm:$0xff]  ;;  %1163 = vmatpush.msk.msra.mxu0 %vm478_vm0, %v284_v2  ;;  %v87_v6 = vmul.f32 %v1274_v3, %v19_v1  ;;  %1228 = vmatpush.msk.msra.mxu1 %vm478_vm0, %v284_v2  ;;  %v88_v10 = vmul.f32 %v1274_v3, %v20_v5  ;;  %v104_v17 = vmul.f32 %v1274_v3, %v36_v16  ;;  %v24_v43 = vld [vmem:[%s2448_s0 + $0x28] sm:$0xff]  ;;  %v25_v55 = vld [vmem:[%s2448_s0 + $0x30] sm:$0xff] }
   0x5   :  { %v35_v7 = vld [vmem:[%s2448_s0 + $0x80] sm:$0xff]  ;;  %1229 = vmatpush.msk.msra.mxu2 %vm478_vm0, %v284_v2  ;;  %1230 = vmatpush.msk.msra.mxu3 %vm478_vm0, %v284_v2  ;;  %v89_v19 = vmul.f32 %v1274_v3, %v21_v15  ;;  %v105_v25 = vmul.f32 %v1274_v3, %v37_v24  ;;  %v90_v27 = vmul.f32 %v1274_v3, %v22_v23  ;;  %v52_v46 = vld [vmem:[%s2448_s0 + $0x108] sm:$0xff]  ;;  %v53_v58 = vld [vmem:[%s2448_s0 + $0x110] sm:$0xff] }
   0x6   :  { %v103_v8 = vmul.f32 %v1274_v3, %v35_v7  ;;  %v155_v9 = vadd.f32 %v1279_v4, %v87_v6  ;;  %v156_v14 = vadd.f32 %v1279_v4, %v88_v10  ;;  %v172_v20 = vadd.f32 %v1279_v4, %v104_v17  ;;  %v23_v31 = vld [vmem:[%s2448_s0 + $0x20] sm:$0xff]  ;;  %v40_v56 = vld [vmem:[%s2448_s0 + $0xa8] sm:$0xff]  ;;  %v26_v5 = vld [vmem:[%s2448_s0 + $0x38] sm:$0xff] }
   0x7   :  { %v157_v22 = vadd.f32 %v1279_v4, %v89_v19  ;;  %v173_v28 = vadd.f32 %v1279_v4, %v105_v25  ;;  %v158_v30 = vadd.f32 %v1279_v4, %v90_v27  ;;  %v106_v33 = vmul.f32 %v1274_v3, %v38_v32  ;;  %v51_v34 = vld [vmem:[%s2448_s0 + $0x100] sm:$0xff]  ;;  %v41_v6 = vld [vmem:[%s2448_s0 + $0xb0] sm:$0xff] }
   0x8   :  { %v171_v11 = vadd.f32 %v1279_v4, %v103_v8  ;;  %v219_v12 = vmax.f32 %v155_v9, 0.0  ;;  %v220_v18 = vmax.f32 %v156_v14, 0.0  ;;  %v236_v21 = vmax.f32 %v172_v20, 0.0  ;;  %v39_v44 = vld [vmem:[%s2448_s0 + $0xa0] sm:$0xff]  ;;  %v54_v8 = vld [vmem:[%s2448_s0 + $0x118] sm:$0xff] }
   0x9   :  { %v221_v26 = vmax.f32 %v157_v22, 0.0  ;;  %v237_v29 = vmax.f32 %v173_v28, 0.0  ;;  %v222_v35 = vmax.f32 %v158_v30, 0.0  ;;  %v91_v36 = vmul.f32 %v1274_v3, %v23_v31  ;;  %v27_v16 = vld [vmem:[%s2448_s0 + $0x40] sm:$0xff] }
   0xa   :  { %v235_v13 = vmax.f32 %v171_v11, 0.0  ;;  %1164 = vmatmul.msk.f32.vlgmr.msra.gmra.mxu0 %vm285_vm1, %v219_v12  ;;  %v174_v37 = vadd.f32 %v1279_v4, %v106_v33  ;;  %v119_v38 = vmul.f32 %v1274_v3, %v51_v34  ;;  %v107_v45 = vmul.f32 %v1274_v3, %v39_v44  ;;  %v67_v22 = vld [vmem:[%s2448_s0 + $0x180] sm:$0xff]  ;;  %v28_v33 = vld [vmem:[%s2448_s0 + $0x48] sm:$0xff] }
   0xb   :  { %v159_v41 = vadd.f32 %v1279_v4, %v91_v36  ;;  %v92_v48 = vmul.f32 %v1274_v3, %v24_v43  ;;  %v120_v50 = vmul.f32 %v1274_v3, %v52_v46  ;;  %v108_v57 = vmul.f32 %v1274_v3, %v40_v56  ;;  %v43_v34 = vld [vmem:[%s2448_s0 + $0xc0] sm:$0xff] }
   0xc   :  { %1180 = vmatmul.msk.f32.vlgmr.msra.gmra.mxu1 %vm285_vm1, %v235_v13  ;;  %v238_v39 = vmax.f32 %v174_v37, 0.0  ;;  %v187_v40 = vadd.f32 %v1279_v4, %v119_v38  ;;  %v175_v49 = vadd.f32 %v1279_v4, %v107_v45  ;;  %v93_v60 = vmul.f32 %v1274_v3, %v25_v55  ;;  %v56_v37 = vld [vmem:[%s2448_s0 + $0x128] sm:$0xff] }
   0xd   :  { %v223_v47 = vmax.f32 %v159_v41, 0.0  ;;  %v188_v52 = vadd.f32 %v1279_v4, %v120_v50  ;;  %v160_v53 = vadd.f32 %v1279_v4, %v92_v48  ;;  %v176_v61 = vadd.f32 %v1279_v4, %v108_v57  ;;  %v68_v38 = vld [vmem:[%s2448_s0 + $0x188] sm:$0xff] }
   0xe   :  { %v251_v42 = vmax.f32 %v187_v40, 0.0  ;;  %v239_v51 = vmax.f32 %v175_v49, 0.0  ;;  %v121_v62 = vmul.f32 %v1274_v3, %v53_v58  ;;  %v161_v1 = vadd.f32 %v1279_v4, %v93_v60  ;;  %v44_v50 = vld [vmem:[%s2448_s0 + $0xc8] sm:$0xff] }
   0xf   :  { %v252_v54 = vmax.f32 %v188_v52, 0.0  ;;  %v224_v59 = vmax.f32 %v160_v53, 0.0  ;;  %v240_v63 = vmax.f32 %v176_v61, 0.0  ;;  %v109_v7 = vmul.f32 %v1274_v3, %v41_v6  ;;  %v57_v53 = vld [vmem:[%s2448_s0 + $0x130] sm:$0xff] }
  0x10   :  { %1196 = vmatmul.msk.f32.vlgmr.msra.gmra.mxu2 %vm285_vm1, %v251_v42  ;;  %v189_v0 = vadd.f32 %v1279_v4, %v121_v62  ;;  %v225_v9 = vmax.f32 %v161_v1, 0.0  ;;  %v94_v10 = vmul.f32 %v1274_v3, %v26_v5  ;;  %v122_v12 = vmul.f32 %v1274_v3, %v54_v8  ;;  %v30_v1 = vld [vmem:[%s2448_s0 + $0x58] sm:$0xff] }
  0x11   :  { %v177_v11 = vadd.f32 %v1279_v4, %v109_v7  ;;  %v95_v20 = vmul.f32 %v1274_v3, %v27_v16  ;;  %v124_v41 = vmul.f32 %v1274_v3, %v56_v37  ;;  %v136_v42 = vmul.f32 %v1274_v3, %v68_v38  ;;  %v58_v7 = vld [vmem:[%s2448_s0 + $0x138] sm:$0xff] }
  0x12   :  { %1165 = vmatmul.msk.f32.gmra.mxu0 %vm285_vm1, %v220_v18  ;;  %v253_v2 = vmax.f32 %v189_v0, 0.0  ;;  %v190_v14 = vadd.f32 %v1279_v4, %v122_v12  ;;  %v162_v15 = vadd.f32 %v1279_v4, %v94_v10  ;;  %v42_v18 = vld [vmem:[%s2448_s0 + $0xb8] sm:$0xff]  ;;  %v125_v57 = vmul.f32 %v1274_v3, %v57_v53 }
  0x13   :  { %v241_v13 = vmax.f32 %v177_v11, 0.0  ;;  %v110_v19 = vmul.f32 %v1274_v3, %v42_v18  ;;  %v163_v30 = vadd.f32 %v1279_v4, %v95_v20  ;;  %v192_v44 = vadd.f32 %v1279_v4, %v124_v41  ;;  %v70_v8 = vld [vmem:[%s2448_s0 + $0x198] sm:$0xff] }
  0x14   :  { %1181 = vmatmul.msk.f32.gmra.mxu1 %vm285_vm1, %v236_v21  ;;  %v254_v17 = vmax.f32 %v190_v14, 0.0  ;;  %v55_v21 = vld [vmem:[%s2448_s0 + $0x120] sm:$0xff]  ;;  %v226_v23 = vmax.f32 %v162_v15, 0.0  ;;  %v204_v45 = vadd.f32 %v1279_v4, %v136_v42  ;;  %v193_v60 = vadd.f32 %v1279_v4, %v125_v57  ;;  %v46_v20 = vld [vmem:[%s2448_s0 + $0xd8] sm:$0xff] }
  0x15   :  { %v178_v24 = vadd.f32 %v1279_v4, %v110_v19  ;;  %v123_v25 = vmul.f32 %v1274_v3, %v55_v21  ;;  %v227_v36 = vmax.f32 %v163_v30, 0.0  ;;  %v256_v48 = vmax.f32 %v192_v44, 0.0 }
  0x16   :  { %v268_v49 = vmax.f32 %v204_v45, 0.0  ;;  %v126_v11 = vmul.f32 %v1274_v3, %v58_v7  ;;  %v138_v12 = vmul.f32 %v1274_v3, %v70_v8  ;;  %v114_v21 = vmul.f32 %v1274_v3, %v46_v20 }
  0x17   :  { %v242_v27 = vmax.f32 %v178_v24, 0.0  ;;  %v191_v28 = vadd.f32 %v1279_v4, %v123_v25  ;;  %v71_v24 = vld [vmem:[%s2448_s0 + $0x1a0] sm:$0xff] }
  0x18   :  { %1197 = vmatmul.msk.f32.gmra.mxu2 %vm285_vm1, %v252_v54  ;;  %v69_v54 = vld [vmem:[%s2448_s0 + $0x190] sm:$0xff]  ;;  %v194_v14 = vadd.f32 %v1279_v4, %v126_v11  ;;  %v206_v15 = vadd.f32 %v1279_v4, %v138_v12 }
  0x19   :  { %v255_v31 = vmax.f32 %v191_v28, 0.0  ;;  %v137_v58 = vmul.f32 %v1274_v3, %v69_v54  ;;  %v139_v28 = vmul.f32 %v1274_v3, %v71_v24  ;;  %v75_v24 = vld [vmem:[%s2448_s0 + $0x1c0] sm:$0xff] }
  0x1a   :  { %1166 = vmatmul.msk.f32.gmra.mxu0 %vm285_vm1, %v221_v26  ;;  %v135_v26 = vmul.f32 %v1274_v3, %v67_v22  ;;  %v258_v18 = vmax.f32 %v194_v14, 0.0  ;;  %v270_v19 = vmax.f32 %v206_v15, 0.0 }
  0x1b   :  { %v205_v61 = vadd.f32 %v1279_v4, %v137_v58 }
  0x1c   :  { %1182 = vmatmul.msk.f32.gmra.mxu1 %vm285_vm1, %v237_v29  ;;  %v203_v29 = vadd.f32 %v1279_v4, %v135_v26  ;;  %v182_v26 = vadd.f32 %v1279_v4, %v114_v21  ;;  %v50_v21 = vld [vmem:[%s2448_s0 + $0xf8] sm:$0xff] }
  0x1d   :  { %v269_v0 = vmax.f32 %v205_v61, 0.0 }
  0x1e   :  { %v267_v32 = vmax.f32 %v203_v29, 0.0  ;;  %v246_v29 = vmax.f32 %v182_v26, 0.0 }
  0x20   :  { %1198 = vmatmul.msk.f32.gmra.mxu2 %vm285_vm1, %v253_v2  ;;  %1212 = vmatmul.msk.f32.vlgmr.msra.gmra.mxu3 %vm285_vm1, %v267_v32  ;;  %v45_v2 = vld [vmem:[%s2448_s0 + $0xd0] sm:$0xff] }
  0x21   :  { %v113_v5 = vmul.f32 %v1274_v3, %v45_v2 }
  0x22   :  { %1167 = vmatmul.msk.f32.gmra.mxu0 %vm285_vm1, %v222_v35  ;;  %v111_v35 = vmul.f32 %v1274_v3, %v43_v34 }
  0x23   :  { %v181_v10 = vadd.f32 %v1279_v4, %v113_v5  ;;  %v34_v5 = vld [vmem:[%s2448_s0 + $0x78] sm:$0xff] }
  0x24   :  { %1183 = vmatmul.msk.f32.gmra.mxu1 %vm285_vm1, %v238_v39  ;;  %v96_v39 = vmul.f32 %v1274_v3, %v28_v33  ;;  %v179_v40 = vadd.f32 %v1279_v4, %v111_v35  ;;  %v32_v35 = vld [vmem:[%s2448_s0 + $0x68] sm:$0xff]  ;;  %v102_v11 = vmul.f32 %v1274_v3, %v34_v5  ;;  %v78_v5 = vld [vmem:[%s2448_s0 + $0x1d8] sm:$0xff] }
  0x25   :  { %v100_v41 = vmul.f32 %v1274_v3, %v32_v35  ;;  %v76_v35 = vld [vmem:[%s2448_s0 + $0x1c8] sm:$0xff] }
  0x26   :  { %v243_v43 = vmax.f32 %v179_v40, 0.0  ;;  %v164_v46 = vadd.f32 %v1279_v4, %v96_v39  ;;  %v60_v39 = vld [vmem:[%s2448_s0 + $0x148] sm:$0xff] }
  0x27   :  { %v72_v40 = vld [vmem:[%s2448_s0 + $0x1a8] sm:$0xff] }
  0x28   :  { %1199 = vmatmul.msk.f32.gmra.mxu2 %vm285_vm1, %v254_v17  ;;  %1213 = vmatmul.msk.f32.gmra.mxu3 %vm285_vm1, %v268_v49  ;;  %v228_v55 = vmax.f32 %v164_v46, 0.0  ;;  %v31_v17 = vld [vmem:[%s2448_s0 + $0x60] sm:$0xff]  ;;  %v140_v44 = vmul.f32 %v1274_v3, %v72_v40  ;;  %v33_v49 = vld [vmem:[%s2448_s0 + $0x70] sm:$0xff] }
  0x29   :  { %v99_v22 = vmul.f32 %v1274_v3, %v31_v17  ;;  %v101_v54 = vmul.f32 %v1274_v3, %v33_v49 }
  0x2a   :  { %1168 = vmatmul.msk.f32.gmra.mxu0 %vm285_vm1, %v223_v47  ;;  %v29_v47 = vld [vmem:[%s2448_s0 + $0x50] sm:$0xff] }
  0x2b   :  { %v97_v52 = vmul.f32 %v1274_v3, %v29_v47  ;;  %v167_v32 = vadd.f32 %v1279_v4, %v99_v22  ;;  %v208_v47 = vadd.f32 %v1279_v4, %v140_v44  ;;  %v118_v22 = vmul.f32 %v1274_v3, %v50_v21  ;;  %v79_v21 = vld [vmem:[%s2448_s0 + $0x1e0] sm:$0xff] }
  0x2c   :  { %1184 = vmatmul.msk.f32.gmra.mxu1 %vm285_vm1, %v239_v51  ;;  %v112_v51 = vmul.f32 %v1274_v3, %v44_v50 }
  0x2d   :  { %v165_v62 = vadd.f32 %v1279_v4, %v97_v52  ;;  %v231_v38 = vmax.f32 %v167_v32, 0.0  ;;  %v48_v52 = vld [vmem:[%s2448_s0 + $0xe8] sm:$0xff]  ;;  %v186_v26 = vadd.f32 %v1279_v4, %v118_v22  ;;  %v147_v22 = vmul.f32 %v1274_v3, %v79_v21 }
  0x2e   :  { %v180_v56 = vadd.f32 %v1279_v4, %v112_v51  ;;  %v272_v51 = vmax.f32 %v208_v47, 0.0  ;;  %v116_v53 = vmul.f32 %v1274_v3, %v48_v52  ;;  %v77_v47 = vld [vmem:[%s2448_s0 + $0x1d0] sm:$0xff] }
  0x2f   :  { %v229_v6 = vmax.f32 %v165_v62, 0.0 }
  0x30   :  { %1200 = vmatmul.msk.f32.gmra.mxu2 %vm285_vm1, %v255_v31  ;;  %1214 = vmatmul.msk.f32.gmra.mxu3 %vm285_vm1, %v269_v0  ;;  %v207_v31 = vadd.f32 %v1279_v4, %v139_v28  ;;  %v184_v58 = vadd.f32 %v1279_v4, %v116_v53  ;;  %v169_v0 = vadd.f32 %v1279_v4, %v101_v54 }
  0x31   :  { %v143_v28 = vmul.f32 %v1274_v3, %v75_v24 }
  0x32   :  { %1169 = vmatmul.msk.f32.gmra.mxu0 %vm285_vm1, %v224_v59  ;;  %v244_v59 = vmax.f32 %v180_v56, 0.0  ;;  %v271_v34 = vmax.f32 %v207_v31, 0.0  ;;  %v73_v56 = vld [vmem:[%s2448_s0 + $0x1b0] sm:$0xff]  ;;  %v248_v61 = vmax.f32 %v184_v58, 0.0  ;;  %v233_v8 = vmax.f32 %v169_v0, 0.0 }
  0x33   :  { %v211_v31 = vadd.f32 %v1279_v4, %v143_v28  ;;  %v215_v28 = vadd.f32 %v1279_v4, %v147_v22 }
  0x34   :  { %1185 = vmatmul.msk.f32.gmra.mxu1 %vm285_vm1, %v240_v63  ;;  %v257_v63 = vmax.f32 %v193_v60, 0.0  ;;  %v141_v60 = vmul.f32 %v1274_v3, %v73_v56 }
  0x38   :  { %1201 = vmatmul.msk.f32.gmra.mxu2 %vm285_vm1, %v256_v48  ;;  %1215 = vmatmul.msk.f32.gmra.mxu3 %vm285_vm1, %v270_v19  ;;  %v168_v48 = vadd.f32 %v1279_v4, %v100_v41 }
  0x3a   :  { %1170 = vmatmul.msk.f32.gmra.mxu0 %vm285_vm1, %v225_v9  ;;  %v98_v9 = vmul.f32 %v1274_v3, %v30_v1  ;;  %v232_v57 = vmax.f32 %v168_v48, 0.0 }
  0x3c   :  { %1186 = vmatmul.msk.f32.gmra.mxu1 %vm285_vm1, %v241_v13  ;;  %v245_v13 = vmax.f32 %v181_v10, 0.0  ;;  %v166_v16 = vadd.f32 %v1279_v4, %v98_v9  ;;  %v62_v9 = vld [vmem:[%s2448_s0 + $0x158] sm:$0xff] }
  0x3d   :  { %v74_v10 = vld [vmem:[%s2448_s0 + $0x1b8] sm:$0xff] }
  0x3e   :  { %v230_v25 = vmax.f32 %v166_v16, 0.0  ;;  %v142_v14 = vmul.f32 %v1274_v3, %v74_v10 }
  0x40   :  { %1202 = vmatmul.msk.f32.gmra.mxu2 %vm285_vm1, %v257_v63  ;;  %1216 = vmatmul.msk.f32.gmra.mxu3 %vm285_vm1, %v271_v34  ;;  %v209_v63 = vadd.f32 %v1279_v4, %v141_v60  ;;  %v210_v17 = vadd.f32 %v1279_v4, %v142_v14  ;;  %v64_v34 = vld [vmem:[%s2448_s0 + $0x168] sm:$0xff] }
  0x42   :  { %1171 = vmatmul.msk.f32.gmra.mxu0 %vm285_vm1, %v226_v23  ;;  %v59_v23 = vld [vmem:[%s2448_s0 + $0x140] sm:$0xff]  ;;  %v273_v2 = vmax.f32 %v209_v63, 0.0  ;;  %v274_v20 = vmax.f32 %v210_v17, 0.0 }
  0x44   :  { %1187 = vmatmul.msk.f32.gmra.mxu1 %vm285_vm1, %v242_v27  ;;  %v127_v27 = vmul.f32 %v1274_v3, %v59_v23  ;;  %v63_v23 = vld [vmem:[%s2448_s0 + $0x160] sm:$0xff] }
  0x46   :  { %v195_v30 = vadd.f32 %v1279_v4, %v127_v27  ;;  %v131_v27 = vmul.f32 %v1274_v3, %v63_v23 }
  0x48   :  { %1203 = vmatmul.msk.f32.gmra.mxu2 %vm285_vm1, %v258_v18  ;;  %v259_v33 = vmax.f32 %v195_v30, 0.0  ;;  %1217 = vmatmul.msk.f32.gmra.mxu3 %vm285_vm1, %v272_v51  ;;  %v170_v18 = vadd.f32 %v1279_v4, %v102_v11  ;;  %v199_v30 = vadd.f32 %v1279_v4, %v131_v27 }
  0x4a   :  { %1172 = vmatmul.msk.f32.gmra.mxu0 %vm285_vm1, %v227_v36  ;;  %v47_v36 = vld [vmem:[%s2448_s0 + $0xe0] sm:$0xff]  ;;  %v263_v32 = vmax.f32 %v199_v30, 0.0 }
  0x4b   :  { %v115_v37 = vmul.f32 %v1274_v3, %v47_v36  ;;  %v132_v36 = vmul.f32 %v1274_v3, %v64_v34  ;;  %v80_v34 = vld [vmem:[%s2448_s0 + $0x1e8] sm:$0xff] }
  0x4c   :  { %1188 = vmatmul.msk.f32.gmra.mxu1 %vm285_vm1, %v243_v43  ;;  %v128_v43 = vmul.f32 %v1274_v3, %v60_v39 }
  0x4d   :  { %v183_v42 = vadd.f32 %v1279_v4, %v115_v37  ;;  %v144_v37 = vmul.f32 %v1274_v3, %v76_v35  ;;  %v200_v41 = vadd.f32 %v1279_v4, %v132_v36  ;;  %v148_v35 = vmul.f32 %v1274_v3, %v80_v34 }
  0x4e   :  { %v196_v46 = vadd.f32 %v1279_v4, %v128_v43 }
  0x4f   :  { %v247_v45 = vmax.f32 %v183_v42, 0.0  ;;  %v212_v43 = vadd.f32 %v1279_v4, %v144_v37  ;;  %v264_v44 = vmax.f32 %v200_v41, 0.0 }
  0x50   :  { %1204 = vmatmul.msk.f32.gmra.mxu2 %vm285_vm1, %v259_v33  ;;  %v260_v50 = vmax.f32 %v196_v46, 0.0  ;;  %1218 = vmatmul.msk.f32.gmra.mxu3 %vm285_vm1, %v273_v2  ;;  %v275_v33 = vmax.f32 %v211_v31, 0.0  ;;  %v65_v46 = vld [vmem:[%s2448_s0 + $0x170] sm:$0xff]  ;;  %v66_v2 = vld [vmem:[%s2448_s0 + $0x178] sm:$0xff] }
  0x51   :  { %v133_v49 = vmul.f32 %v1274_v3, %v65_v46 }
  0x52   :  { %1173 = vmatmul.msk.f32.gmra.mxu0 %vm285_vm1, %v228_v55  ;;  %v61_v55 = vld [vmem:[%s2448_s0 + $0x150] sm:$0xff] }
  0x54   :  { %1189 = vmatmul.msk.f32.gmra.mxu1 %vm285_vm1, %v244_v59  ;;  %v129_v59 = vmul.f32 %v1274_v3, %v61_v55 }
  0x56   :  { %v197_v62 = vadd.f32 %v1279_v4, %v129_v59 }
  0x58   :  { %1205 = vmatmul.msk.f32.gmra.mxu2 %vm285_vm1, %v260_v50  ;;  %v261_v1 = vmax.f32 %v197_v62, 0.0  ;;  %1219 = vmatmul.msk.f32.gmra.mxu3 %vm285_vm1, %v274_v20  ;;  %v145_v50 = vmul.f32 %v1274_v3, %v77_v47  ;;  %v216_v47 = vadd.f32 %v1279_v4, %v148_v35 }
  0x5a   :  { %1174 = vmatmul.msk.f32.gmra.mxu0 %vm285_vm1, %v229_v6  ;;  %v49_v6 = vld [vmem:[%s2448_s0 + $0xf0] sm:$0xff]  ;;  %v213_v63 = vadd.f32 %v1279_v4, %v145_v50 }
  0x5b   :  { %v117_v7 = vmul.f32 %v1274_v3, %v49_v6  ;;  %v134_v6 = vmul.f32 %v1274_v3, %v66_v2  ;;  %v81_v50 = vld [vmem:[%s2448_s0 + $0x1f0] sm:$0xff] }
  0x5c   :  { %1190 = vmatmul.msk.f32.gmra.mxu1 %vm285_vm1, %v245_v13  ;;  %v130_v13 = vmul.f32 %v1274_v3, %v62_v9 }
  0x5d   :  { %v185_v12 = vadd.f32 %v1279_v4, %v117_v7  ;;  %v146_v7 = vmul.f32 %v1274_v3, %v78_v5 }
  0x5e   :  { %v198_v16 = vadd.f32 %v1279_v4, %v130_v13  ;;  %v202_v13 = vadd.f32 %v1279_v4, %v134_v6 }
  0x5f   :  { %v249_v15 = vmax.f32 %v185_v12, 0.0 }
  0x60   :  { %1206 = vmatmul.msk.f32.gmra.mxu2 %vm285_vm1, %v261_v1  ;;  %v262_v19 = vmax.f32 %v198_v16, 0.0  ;;  %1220 = vmatmul.msk.f32.gmra.mxu3 %vm285_vm1, %v275_v33  ;;  %v277_v1 = vmax.f32 %v213_v63, 0.0  ;;  %v266_v17 = vmax.f32 %v202_v13, 0.0 }
  0x62   :  { %1175 = vmatmul.msk.f32.gmra.mxu0 %vm285_vm1, %v230_v25  ;;  %v234_v25 = vmax.f32 %v170_v18, 0.0  ;;  %v214_v18 = vadd.f32 %v1279_v4, %v146_v7 }
  0x64   :  { %1191 = vmatmul.msk.f32.gmra.mxu1 %vm285_vm1, %v246_v29  ;;  %v250_v29 = vmax.f32 %v186_v26, 0.0  ;;  %v278_v20 = vmax.f32 %v214_v18, 0.0 }
  0x68   :  { %1207 = vmatmul.msk.f32.gmra.mxu2 %vm285_vm1, %v262_v19 }
  0x6a   :  { %1176 = vmatmul.msk.f32.gmra.mxu0 %vm285_vm1, %v231_v38 }
  0x6c   :  { %1192 = vmatmul.msk.f32.gmra.mxu1 %vm285_vm1, %v247_v45  ;;  %v276_v45 = vmax.f32 %v212_v43, 0.0 }
  0x6e   :  { %1221 = vmatmul.msk.f32.gmra.mxu3 %vm285_vm1, %v276_v45 }
  0x70   :  { %1208 = vmatmul.msk.f32.gmra.mxu2 %vm285_vm1, %v263_v32  ;;  %v279_v32 = vmax.f32 %v215_v28, 0.0 }
  0x72   :  { %1177 = vmatmul.msk.f32.gmra.mxu0 %vm285_vm1, %v232_v57  ;;  %v201_v57 = vadd.f32 %v1279_v4, %v133_v49  ;;  %v280_v49 = vmax.f32 %v216_v47, 0.0 }
  0x74   :  { %1193 = vmatmul.msk.f32.gmra.mxu1 %vm285_vm1, %v248_v61  ;;  %v265_v62 = vmax.f32 %v201_v57, 0.0 }
  0x76   :  { %1222 = vmatmul.msk.f32.gmra.mxu3 %vm285_vm1, %v277_v1 }
  0x78   :  { %1209 = vmatmul.msk.f32.gmra.mxu2 %vm285_vm1, %v264_v44 }
  0x7a   :  { %1178 = vmatmul.msk.f32.gmra.mxu0 %vm285_vm1, %v233_v8 }
  0x7c   :  { %1194 = vmatmul.msk.f32.gmra.mxu1 %vm285_vm1, %v249_v15 }
  0x7e   :  { %1223 = vmatmul.msk.f32.gmra.mxu3 %vm285_vm1, %v278_v20 }
  0x80   :  { %1210 = vmatmul.msk.f32.gmra.mxu2 %vm285_vm1, %v265_v62 }
  0x82   :  { %1179 = vmatmul.msk.f32.gmra.mxu0 %vm285_vm1, %v234_v25 }
  0x84   :  { %1195 = vmatmul.msk.f32.gmra.mxu1 %vm285_vm1, %v250_v29 }
  0x86   :  { %1224 = vmatmul.msk.f32.gmra.mxu3 %vm285_vm1, %v279_v32 }
  0x87   :  { %v499_v38 = vpop.f32.mrf.mxu0 }
  0x88   :  { %v691_v39 = vpack.c.bf16 %v499_v38, %v499_v38  ;;  %v957_v48 = vmul.f32 %v499_v38, %v499_v38  ;;  %v822_v51 = vsel %vm820_vm3, %v499_v38, 0.0  ;;  %1211 = vmatmul.msk.f32.gmra.mxu2 %vm285_vm1, %v266_v17 }
  0x89   :  { %v1610_v40 = vpop.f32.mrf.mxu1 }
  0x8a   :  { %v707_v42 = vpack.c.bf16 %v1610_v40, %v1610_v40  ;;  %756 = vst.msk [vmem:[%s2451_s4] sm:$0xf] %vm755_vm2, %v691_v39  ;;  %v1021_v60 = vsel %vm820_vm3, %v957_v48, 0.0 }
  0x8c   :  { %772 = vst.msk [vmem:[%s2451_s4 + $0x40] sm:$0xf] %vm755_vm2, %v707_v42 }
  0x8e   :  { %1225 = vmatmul.msk.f32.gmra.mxu3 %vm285_vm1, %v280_v49 }
  0x8f   :  { %v502_v52 = vpop.f32.mrf.mxu0 }
  0x90   :  { %v692_v53 = vpack.c.bf16 %v502_v52, %v502_v52  ;;  %v823_v54 = vsel %vm820_vm3, %v502_v52, 0.0  ;;  %v958_v55 = vmul.f32 %v502_v52, %v502_v52 }
  0x91   :  { %v1636_v56 = vpop.f32.mrf.mxu1  ;;  %v824_v58 = vadd.f32 %v823_v54, %v822_v51  ;;  %v149_v51 = vmul.f32 %v1274_v3, %v81_v50 }
  0x92   :  { %v708_v59 = vpack.c.bf16 %v1636_v56, %v1636_v56  ;;  %757 = vst.msk [vmem:[%s2451_s4 + $0x4] sm:$0xf] %vm755_vm2, %v692_v53  ;;  %v1022_v61 = vsel %vm820_vm3, %v958_v55, 0.0 }
  0x93   :  { %v1023_v0 = vadd.f32 %v1022_v61, %v1021_v60  ;;  %v1704_v37 = vpop.f32.mrf.mxu2  ;;  %v82_v61 = vld [vmem:[%s2448_s0 + $0x1f8] sm:$0xff] }
  0x94   :  { %773 = vst.msk [vmem:[%s2451_s4 + $0x44] sm:$0xf] %vm755_vm2, %v708_v59  ;;  %v723_v43 = vpack.c.bf16 %v1704_v37, %v1704_v37  ;;  %v217_v59 = vadd.f32 %v1279_v4, %v149_v51  ;;  %v150_v62 = vmul.f32 %v1274_v3, %v82_v61 }
  0x96   :  { %788 = vst.msk [vmem:[%s2451_s4 + $0x80] sm:$0xf] %vm755_vm2, %v723_v43  ;;  %v281_v60 = vmax.f32 %v217_v59, 0.0  ;;  %v218_v3 = vadd.f32 %v1279_v4, %v150_v62 }
  0x97   :  { %v505_v8 = vpop.f32.mrf.mxu0 }
  0x98   :  { %v693_v9 = vpack.c.bf16 %v505_v8, %v505_v8  ;;  %v825_v10 = vsel %vm820_vm3, %v505_v8, 0.0  ;;  %v959_v11 = vmul.f32 %v505_v8, %v505_v8  ;;  %1226 = vmatmul.msk.f32.gmra.mxu3 %vm285_vm1, %v281_v60  ;;  %v282_v7 = vmax.f32 %v218_v3, 0.0 }
  0x99   :  { %v1663_v12 = vpop.f32.mrf.mxu1  ;;  %v826_v14 = vadd.f32 %v825_v10, %v824_v58 }
  0x9a   :  { %v709_v15 = vpack.c.bf16 %v1663_v12, %v1663_v12  ;;  %758 = vst.msk [vmem:[%s2451_s4 + $0x8] sm:$0xf] %vm755_vm2, %v693_v9  ;;  %v1024_v16 = vsel %vm820_vm3, %v959_v11, 0.0 }
  0x9b   :  { %v1025_v19 = vadd.f32 %v1024_v16, %v1023_v0  ;;  %v1738_v53 = vpop.f32.mrf.mxu2 }
  0x9c   :  { %774 = vst.msk [vmem:[%s2451_s4 + $0x48] sm:$0xf] %vm755_vm2, %v709_v15  ;;  %v724_v57 = vpack.c.bf16 %v1738_v53, %v1738_v53 }
  0x9e   :  { %789 = vst.msk [vmem:[%s2451_s4 + $0x84] sm:$0xf] %vm755_vm2, %v724_v57 }
  0x9f   :  { %v508_v23 = vpop.f32.mrf.mxu0 }
  0xa0   :  { %v694_v24 = vpack.c.bf16 %v508_v23, %v508_v23  ;;  %v827_v25 = vsel %vm820_vm3, %v508_v23, 0.0  ;;  %v960_v26 = vmul.f32 %v508_v23, %v508_v23  ;;  %1227 = vmatmul.msk.f32.gmra.mxu3 %vm285_vm1, %v282_v7 }
  0xa1   :  { %v1685_v27 = vpop.f32.mrf.mxu1  ;;  %v828_v29 = vadd.f32 %v827_v25, %v826_v14 }
  0xa2   :  { %v710_v30 = vpack.c.bf16 %v1685_v27, %v1685_v27  ;;  %759 = vst.msk [vmem:[%s2451_s4 + $0xc] sm:$0xf] %vm755_vm2, %v694_v24  ;;  %v1026_v31 = vsel %vm820_vm3, %v960_v26, 0.0 }
  0xa3   :  { %v1027_v33 = vadd.f32 %v1026_v31, %v1025_v19  ;;  %v1768_v0 = vpop.f32.mrf.mxu2  ;;  %v1826_v19 = vpop.f32.mrf.mxu3 }
  0xa4   :  { %775 = vst.msk [vmem:[%s2451_s4 + $0x4c] sm:$0xf] %vm755_vm2, %v710_v30  ;;  %v725_v5 = vpack.c.bf16 %v1768_v0, %v1768_v0  ;;  %v739_v21 = vpack.c.bf16 %v1826_v19, %v1826_v19 }
  0xa6   :  { %790 = vst.msk [vmem:[%s2451_s4 + $0x88] sm:$0xf] %vm755_vm2, %v725_v5 }
  0xa7   :  { %v511_v36 = vpop.f32.mrf.mxu0  ;;  %804 = vst.msk [vmem:[%s2451_s4 + $0xc0] sm:$0xf] %vm755_vm2, %v739_v21 }
  0xa8   :  { %v695_v38 = vpack.c.bf16 %v511_v36, %v511_v36  ;;  %v829_v39 = vsel %vm820_vm3, %v511_v36, 0.0  ;;  %v961_v41 = vmul.f32 %v511_v36, %v511_v36 }
  0xa9   :  { %v1707_v42 = vpop.f32.mrf.mxu1  ;;  %v1711_v44 = vadd.f32 %v829_v39, %v828_v29 }
  0xaa   :  { %v711_v45 = vpack.c.bf16 %v1707_v42, %v1707_v42  ;;  %760 = vst.msk [vmem:[%s2451_s4 + $0x10] sm:$0xf] %vm755_vm2, %v695_v38  ;;  %v1028_v46 = vsel %vm820_vm3, %v961_v41, 0.0 }
  0xab   :  { %v1721_v48 = vadd.f32 %v1028_v46, %v1027_v33  ;;  %v1794_v9 = vpop.f32.mrf.mxu2  ;;  %v1858_v28 = vpop.f32.mrf.mxu3 }
  0xac   :  { %776 = vst.msk [vmem:[%s2451_s4 + $0x50] sm:$0xf] %vm755_vm2, %v711_v45  ;;  %v726_v11 = vpack.c.bf16 %v1794_v9, %v1794_v9  ;;  %v740_v30 = vpack.c.bf16 %v1858_v28, %v1858_v28 }
  0xae   :  { %791 = vst.msk [vmem:[%s2451_s4 + $0x8c] sm:$0xf] %vm755_vm2, %v726_v11 }
  0xaf   :  { %v1736_v52 = vpop.f32.mrf.mxu0  ;;  %805 = vst.msk [vmem:[%s2451_s4 + $0xc4] sm:$0xf] %vm755_vm2, %v740_v30 }
  0xb0   :  { %v696_v54 = vpack.c.bf16 %v1736_v52, %v1736_v52  ;;  %v831_v5 = vsel %vm820_vm3, %v1736_v52, 0.0 }
  0xb1   :  { %v1742_v55 = vpop.f32.mrf.mxu1  ;;  %v832_v11 = vadd.f32 %v831_v5, %v1711_v44 }
  0xb2   :  { %v712_v58 = vpack.c.bf16 %v1742_v55, %v1742_v55  ;;  %761 = vst.msk [vmem:[%s2451_s4 + $0x14] sm:$0xf] %vm755_vm2, %v696_v54 }
  0xb3   :  { %v1818_v15 = vpop.f32.mrf.mxu2  ;;  %v1890_v36 = vpop.f32.mrf.mxu3 }
  0xb4   :  { %777 = vst.msk [vmem:[%s2451_s4 + $0x54] sm:$0xf] %vm755_vm2, %v712_v58  ;;  %v727_v18 = vpack.c.bf16 %v1818_v15, %v1818_v15  ;;  %v741_v39 = vpack.c.bf16 %v1890_v36, %v1890_v36  ;;  %v962_v58 = vmul.f32 %v1736_v52, %v1736_v52 }
  0xb6   :  { %792 = vst.msk [vmem:[%s2451_s4 + $0x90] sm:$0xf] %vm755_vm2, %v727_v18  ;;  %v1030_v52 = vsel %vm820_vm3, %v962_v58, 0.0 }
  0xb7   :  { %v1766_v63 = vpop.f32.mrf.mxu0  ;;  %806 = vst.msk [vmem:[%s2451_s4 + $0xc8] sm:$0xf] %vm755_vm2, %v741_v39  ;;  %v1031_v18 = vadd.f32 %v1030_v52, %v1721_v48 }
  0xb8   :  { %v697_v1 = vpack.c.bf16 %v1766_v63, %v1766_v63 }
  0xb9   :  { %v1772_v2 = vpop.f32.mrf.mxu1 }
  0xba   :  { %v713_v6 = vpack.c.bf16 %v1772_v2, %v1772_v2  ;;  %762 = vst.msk [vmem:[%s2451_s4 + $0x18] sm:$0xf] %vm755_vm2, %v697_v1 }
  0xbb   :  { %v1850_v23 = vpop.f32.mrf.mxu2  ;;  %v1922_v49 = vpop.f32.mrf.mxu3 }
  0xbc   :  { %778 = vst.msk [vmem:[%s2451_s4 + $0x58] sm:$0xf] %vm755_vm2, %v713_v6  ;;  %v728_v26 = vpack.c.bf16 %v1850_v23, %v1850_v23  ;;  %v742_v51 = vpack.c.bf16 %v1922_v49, %v1922_v49  ;;  %v963_v6 = vmul.f32 %v1766_v63, %v1766_v63 }
  0xbe   :  { %793 = vst.msk [vmem:[%s2451_s4 + $0x94] sm:$0xf] %vm755_vm2, %v728_v26 }
  0xbf   :  { %v1792_v8 = vpop.f32.mrf.mxu0  ;;  %807 = vst.msk [vmem:[%s2451_s4 + $0xcc] sm:$0xf] %vm755_vm2, %v742_v51 }
  0xc0   :  { %v698_v4 = vpack.c.bf16 %v1792_v8, %v1792_v8  ;;  %v964_v7 = vmul.f32 %v1792_v8, %v1792_v8 }
  0xc1   :  { %v1798_v10 = vpop.f32.mrf.mxu1 }
  0xc2   :  { %v714_v13 = vpack.c.bf16 %v1798_v10, %v1798_v10  ;;  %763 = vst.msk [vmem:[%s2451_s4 + $0x1c] sm:$0xf] %vm755_vm2, %v698_v4  ;;  %v833_v4 = vsel %vm820_vm3, %v1766_v63, 0.0  ;;  %v1034_v21 = vsel %vm820_vm3, %v964_v7, 0.0 }
  0xc3   :  { %v1882_v32 = vpop.f32.mrf.mxu2  ;;  %v1952_v62 = vpop.f32.mrf.mxu3 }
  0xc4   :  { %779 = vst.msk [vmem:[%s2451_s4 + $0x5c] sm:$0xf] %vm755_vm2, %v714_v13  ;;  %v729_v35 = vpack.c.bf16 %v1882_v32, %v1882_v32  ;;  %v743_v3 = vpack.c.bf16 %v1952_v62, %v1952_v62  ;;  %v1032_v13 = vsel %vm820_vm3, %v963_v6, 0.0 }
  0xc5   :  { %v1033_v48 = vadd.f32 %v1032_v13, %v1031_v18 }
  0xc6   :  { %794 = vst.msk [vmem:[%s2451_s4 + $0x98] sm:$0xf] %vm755_vm2, %v729_v35 }
  0xc7   :  { %v1816_v14 = vpop.f32.mrf.mxu0  ;;  %808 = vst.msk [vmem:[%s2451_s4 + $0xd0] sm:$0xf] %vm755_vm2, %v743_v3  ;;  %v1035_v51 = vadd.f32 %v1034_v21, %v1033_v48 }
  0xc8   :  { %v699_v16 = vpack.c.bf16 %v1816_v14, %v1816_v14  ;;  %v965_v63 = vmul.f32 %v1816_v14, %v1816_v14  ;;  %v837_v26 = vsel %vm820_vm3, %v1816_v14, 0.0 }
  0xc9   :  { %v1822_v17 = vpop.f32.mrf.mxu1 }
  0xca   :  { %v715_v20 = vpack.c.bf16 %v1822_v17, %v1822_v17  ;;  %764 = vst.msk [vmem:[%s2451_s4 + $0x20] sm:$0xf] %vm755_vm2, %v699_v16  ;;  %v835_v16 = vsel %vm820_vm3, %v1792_v8, 0.0 }
  0xcb   :  { %v1914_v43 = vpop.f32.mrf.mxu2  ;;  %v2001_v35 = vpop.f32.mrf.mxu3 }
  0xcc   :  { %780 = vst.msk [vmem:[%s2451_s4 + $0x60] sm:$0xf] %vm755_vm2, %v715_v20  ;;  %v730_v47 = vpack.c.bf16 %v1914_v43, %v1914_v43  ;;  %v834_v20 = vadd.f32 %v833_v4, %v832_v11 }
  0xce   :  { %795 = vst.msk [vmem:[%s2451_s4 + $0x9c] sm:$0xf] %vm755_vm2, %v730_v47 }
  0xcf   :  { %v1848_v22 = vpop.f32.mrf.mxu0 }
  0xd0   :  { %v700_v24 = vpack.c.bf16 %v1848_v22, %v1848_v22  ;;  %v839_v14 = vsel %vm820_vm3, %v1848_v22, 0.0 }
  0xd1   :  { %v1854_v25 = vpop.f32.mrf.mxu1 }
  0xd2   :  { %v716_v29 = vpack.c.bf16 %v1854_v25, %v1854_v25  ;;  %765 = vst.msk [vmem:[%s2451_s4 + $0x24] sm:$0xf] %vm755_vm2, %v700_v24 }
  0xd3   :  { %v1944_v57 = vpop.f32.mrf.mxu2 }
  0xd4   :  { %781 = vst.msk [vmem:[%s2451_s4 + $0x64] sm:$0xf] %vm755_vm2, %v716_v29  ;;  %v731_v61 = vpack.c.bf16 %v1944_v57, %v1944_v57  ;;  %v966_v29 = vmul.f32 %v1848_v22, %v1848_v22 }
  0xd6   :  { %796 = vst.msk [vmem:[%s2451_s4 + $0xa0] sm:$0xf] %vm755_vm2, %v731_v61  ;;  %v1038_v22 = vsel %vm820_vm3, %v966_v29, 0.0 }
  0xd7   :  { %v1880_v31 = vpop.f32.mrf.mxu0 }
  0xd8   :  { %v701_v33 = vpack.c.bf16 %v1880_v31, %v1880_v31  ;;  %v967_v47 = vmul.f32 %v1880_v31, %v1880_v31  ;;  %v841_v61 = vsel %vm820_vm3, %v1880_v31, 0.0 }
  0xd9   :  { %v1886_v34 = vpop.f32.mrf.mxu1 }
  0xda   :  { %v717_v38 = vpack.c.bf16 %v1886_v34, %v1886_v34  ;;  %766 = vst.msk [vmem:[%s2451_s4 + $0x28] sm:$0xf] %vm755_vm2, %v701_v33  ;;  %v1040_v6 = vsel %vm820_vm3, %v967_v47, 0.0 }
  0xdb   :  { %v1991_v44 = vpop.f32.mrf.mxu2 }
  0xdc   :  { %782 = vst.msk [vmem:[%s2451_s4 + $0x68] sm:$0xf] %vm755_vm2, %v717_v38  ;;  %v732_v8 = vpack.c.bf16 %v1991_v44, %v1991_v44  ;;  %v836_v38 = vadd.f32 %v835_v16, %v834_v20 }
  0xde   :  { %v838_v58 = vadd.f32 %v837_v26, %v836_v38  ;;  %797 = vst.msk [vmem:[%s2451_s4 + $0xa4] sm:$0xf] %vm755_vm2, %v732_v8  ;;  %v2044_v26 = vpop.f32.mrf.mxu3 }
  0xdf   :  { %v1912_v41 = vpop.f32.mrf.mxu0  ;;  %v745_v38 = vpack.c.bf16 %v2044_v26, %v2044_v26 }
  0xe0   :  { %v702_v45 = vpack.c.bf16 %v1912_v41, %v1912_v41  ;;  %v840_v5 = vadd.f32 %v839_v14, %v838_v58  ;;  %v843_v3 = vsel %vm820_vm3, %v1912_v41, 0.0  ;;  %v973_v58 = vmul.f32 %v1610_v40, %v1610_v40 }
  0xe1   :  { %v1918_v46 = vpop.f32.mrf.mxu1  ;;  %810 = vst.msk [vmem:[%s2451_s4 + $0xd8] sm:$0xf] %vm755_vm2, %v745_v38 }
  0xe2   :  { %v718_v50 = vpack.c.bf16 %v1918_v46, %v1918_v46  ;;  %767 = vst.msk [vmem:[%s2451_s4 + $0x2c] sm:$0xf] %vm755_vm2, %v702_v45  ;;  %v1036_v45 = vsel %vm820_vm3, %v965_v63, 0.0  ;;  %v842_v31 = vadd.f32 %v841_v61, %v840_v5 }
  0xe3   :  { %v2037_v13 = vpop.f32.mrf.mxu2 }
  0xe4   :  { %783 = vst.msk [vmem:[%s2451_s4 + $0x6c] sm:$0xf] %vm755_vm2, %v718_v50  ;;  %v744_v50 = vpack.c.bf16 %v2001_v35, %v2001_v35  ;;  %v733_v21 = vpack.c.bf16 %v2037_v13, %v2037_v13  ;;  %v844_v29 = vadd.f32 %v843_v3, %v842_v31 }
  0xe6   :  { %809 = vst.msk [vmem:[%s2451_s4 + $0xd4] sm:$0xf] %vm755_vm2, %v744_v50  ;;  %v2080_v31 = vpop.f32.mrf.mxu3 }
  0xe7   :  { %v535_v54 = vpop.f32.mrf.mxu0  ;;  %798 = vst.msk [vmem:[%s2451_s4 + $0xa8] sm:$0xf] %vm755_vm2, %v733_v21 }
  0xe8   :  { %v703_v59 = vpack.c.bf16 %v535_v54, %v535_v54  ;;  %v969_v7 = vmul.f32 %v535_v54, %v535_v54  ;;  %v845_v16 = vsel %vm820_vm3, %v535_v54, 0.0 }
  0xe9   :  { %v1948_v60 = vpop.f32.mrf.mxu1 }
  0xea   :  { %v719_v1 = vpack.c.bf16 %v1948_v60, %v1948_v60  ;;  %768 = vst.msk [vmem:[%s2451_s4 + $0x30] sm:$0xf] %vm755_vm2, %v703_v59  ;;  %v968_v59 = vmul.f32 %v1912_v41, %v1912_v41  ;;  %v1044_v8 = vsel %vm820_vm3, %v969_v7, 0.0 }
  0xec   :  { %784 = vst.msk [vmem:[%s2451_s4 + $0x70] sm:$0xf] %vm755_vm2, %v719_v1  ;;  %v1037_v1 = vadd.f32 %v1036_v45, %v1035_v51  ;;  %v1042_v4 = vsel %vm820_vm3, %v968_v59, 0.0  ;;  %v846_v45 = vadd.f32 %v845_v16, %v844_v29 }
  0xee   :  { %v1039_v52 = vadd.f32 %v1038_v22, %v1037_v1  ;;  %v2073_v1 = vpop.f32.mrf.mxu2 }
  0xef   :  { %v538_v24 = vpop.f32.mrf.mxu0 }
  0xf0   :  { %v704_v30 = vpack.c.bf16 %v538_v24, %v538_v24  ;;  %v970_v63 = vmul.f32 %v538_v24, %v538_v24  ;;  %v1041_v41 = vadd.f32 %v1040_v6, %v1039_v52  ;;  %v847_v48 = vsel %vm820_vm3, %v538_v24, 0.0 }
  0xf1   :  { %v1997_v33 = vpop.f32.mrf.mxu1  ;;  %v848_v50 = vadd.f32 %v847_v48, %v846_v45  ;;  %v734_v52 = vpack.c.bf16 %v2073_v1, %v2073_v1  ;;  %v975_v48 = vmul.f32 %v1663_v12, %v1663_v12  ;;  %v976_v45 = vmul.f32 %v1685_v27, %v1685_v27 }
  0xf2   :  { %v720_v39 = vpack.c.bf16 %v1997_v33, %v1997_v33  ;;  %769 = vst.msk [vmem:[%s2451_s4 + $0x34] sm:$0xf] %vm755_vm2, %v704_v30  ;;  %v1046_v14 = vsel %vm820_vm3, %v970_v63, 0.0  ;;  %v853_v63 = vsel %vm820_vm3, %v1610_v40, 0.0  ;;  %v1052_v40 = vsel %vm820_vm3, %v973_v58, 0.0 }
  0xf3   :  { %799 = vst.msk [vmem:[%s2451_s4 + $0xac] sm:$0xf] %vm755_vm2, %v734_v52  ;;  %v977_v58 = vmul.f32 %v1707_v42, %v1707_v42 }
  0xf4   :  { %785 = vst.msk [vmem:[%s2451_s4 + $0x74] sm:$0xf] %vm755_vm2, %v720_v39  ;;  %v1043_v39 = vadd.f32 %v1042_v4, %v1041_v41  ;;  %v746_v41 = vpack.c.bf16 %v2080_v31, %v2080_v31 }
  0xf6   :  { %v1045_v47 = vadd.f32 %v1044_v8, %v1043_v39  ;;  %v855_v8 = vsel %vm820_vm3, %v1636_v56, 0.0  ;;  %811 = vst.msk [vmem:[%s2451_s4 + $0xdc] sm:$0xf] %vm755_vm2, %v746_v41  ;;  %v865_v41 = vsel %vm820_vm3, %v1772_v2, 0.0 }
  0xf7   :  { %v541_v11 = vpop.f32.mrf.mxu0 }
  0xf8   :  { %v705_v18 = vpack.c.bf16 %v541_v11, %v541_v11  ;;  %v971_v54 = vmul.f32 %v541_v11, %v541_v11  ;;  %v849_v24 = vsel %vm820_vm3, %v541_v11, 0.0  ;;  %v1047_v59 = vadd.f32 %v1046_v14, %v1045_v47  ;;  %v2117_v47 = vpop.f32.mrf.mxu2 }
  0xf9   :  { %v2040_v20 = vpop.f32.mrf.mxu1  ;;  %v850_v22 = vadd.f32 %v849_v24, %v848_v50  ;;  %v1056_v50 = vsel %vm820_vm3, %v975_v48, 0.0 }
  0xfa   :  { %v721_v30 = vpack.c.bf16 %v2040_v20, %v2040_v20  ;;  %770 = vst.msk [vmem:[%s2451_s4 + $0x38] sm:$0xf] %vm755_vm2, %v705_v18  ;;  %v1048_v51 = vsel %vm820_vm3, %v971_v54, 0.0  ;;  %v974_v18 = vmul.f32 %v1636_v56, %v1636_v56  ;;  %v857_v56 = vsel %vm820_vm3, %v1663_v12, 0.0 }
  0xfb   :  { %v1049_v4 = vadd.f32 %v1048_v51, %v1047_v59  ;;  %v859_v51 = vsel %vm820_vm3, %v1685_v27, 0.0  ;;  %v735_v59 = vpack.c.bf16 %v2117_v47, %v2117_v47  ;;  %v978_v27 = vmul.f32 %v1742_v55, %v1742_v55 }
  0xfc   :  { %786 = vst.msk [vmem:[%s2451_s4 + $0x78] sm:$0xf] %vm755_vm2, %v721_v30  ;;  %v1054_v39 = vsel %vm820_vm3, %v974_v18, 0.0 }
  0xfd   :  { %800 = vst.msk [vmem:[%s2451_s4 + $0xb0] sm:$0xf] %vm755_vm2, %v735_v59  ;;  %v983_v59 = vmul.f32 %v1886_v34, %v1886_v34 }
  0xff   :  { %v544_v61 = vpop.f32.mrf.mxu0 }
 0x100   :  { %v706_v5 = vpack.c.bf16 %v544_v61, %v544_v61  ;;  %v851_v6 = vsel %vm820_vm3, %v544_v61, 0.0  ;;  %v972_v3 = vmul.f32 %v544_v61, %v544_v61 }
 0x101   :  { %v2076_v7 = vpop.f32.mrf.mxu1  ;;  %v852_v11 = vadd.f32 %v851_v6, %v850_v22  ;;  %v2126_v22 = vpop.f32.mrf.mxu3  ;;  %v1058_v6 = vsel %vm820_vm3, %v976_v45, 0.0 }
 0x102   :  { %v722_v16 = vpack.c.bf16 %v2076_v7, %v2076_v7  ;;  %771 = vst.msk [vmem:[%s2451_s4 + $0x3c] sm:$0xf] %vm755_vm2, %v706_v5  ;;  %v1050_v21 = vsel %vm820_vm3, %v972_v3, 0.0  ;;  %v747_v5 = vpack.c.bf16 %v2126_v22, %v2126_v22  ;;  %v861_v3 = vsel %vm820_vm3, %v1707_v42, 0.0 }
 0x103   :  { %v854_v29 = vadd.f32 %v853_v63, %v852_v11  ;;  %v1051_v30 = vadd.f32 %v1050_v21, %v1049_v4  ;;  %v1060_v11 = vsel %vm820_vm3, %v977_v58, 0.0  ;;  %v863_v42 = vsel %vm820_vm3, %v1742_v55, 0.0 }
 0x104   :  { %787 = vst.msk [vmem:[%s2451_s4 + $0x7c] sm:$0xf] %vm755_vm2, %v722_v16  ;;  %v979_v16 = vmul.f32 %v1772_v2, %v1772_v2  ;;  %v1062_v21 = vsel %vm820_vm3, %v978_v27, 0.0  ;;  %v867_v55 = vsel %vm820_vm3, %v1798_v10, 0.0 }
 0x105   :  { %v856_v54 = vadd.f32 %v855_v8, %v854_v29  ;;  %v1053_v38 = vadd.f32 %v1052_v40, %v1051_v30  ;;  %812 = vst.msk [vmem:[%s2451_s4 + $0xe0] sm:$0xf] %vm755_vm2, %v747_v5  ;;  %v980_v29 = vmul.f32 %v1798_v10, %v1798_v10  ;;  %v2153_v8 = vpop.f32.mrf.mxu2  ;;  %v982_v10 = vmul.f32 %v1854_v25, %v1854_v25 }
 0x106   :  { %v1064_v48 = vsel %vm820_vm3, %v979_v16, 0.0 }
 0x107   :  { %v858_v14 = vadd.f32 %v857_v56, %v856_v54  ;;  %v1055_v24 = vadd.f32 %v1054_v39, %v1053_v38  ;;  %v981_v54 = vmul.f32 %v1822_v17, %v1822_v17  ;;  %v736_v38 = vpack.c.bf16 %v2153_v8, %v2153_v8 }
 0x108   :  { %v1070_v5 = vsel %vm820_vm3, %v982_v10, 0.0 }
 0x109   :  { %v860_v12 = vadd.f32 %v859_v51, %v858_v14  ;;  %v1057_v61 = vadd.f32 %v1056_v50, %v1055_v24  ;;  %v2162_v39 = vpop.f32.mrf.mxu3  ;;  %v1066_v14 = vsel %vm820_vm3, %v980_v29, 0.0  ;;  %v869_v24 = vsel %vm820_vm3, %v1822_v17, 0.0  ;;  %801 = vst.msk [vmem:[%s2451_s4 + $0xb4] sm:$0xf] %vm755_vm2, %v736_v38 }
 0x10a   :  { %v748_v45 = vpack.c.bf16 %v2162_v39, %v2162_v39  ;;  %v1068_v58 = vsel %vm820_vm3, %v981_v54, 0.0  ;;  %v871_v17 = vsel %vm820_vm3, %v1854_v25, 0.0  ;;  %v875_v25 = vsel %vm820_vm3, %v1918_v46, 0.0 }
 0x10b   :  { %v862_v52 = vadd.f32 %v861_v3, %v860_v12  ;;  %v1059_v4 = vadd.f32 %v1058_v6, %v1057_v61  ;;  %v873_v6 = vsel %vm820_vm3, %v1886_v34, 0.0  ;;  %v984_v3 = vmul.f32 %v1918_v46, %v1918_v46 }
 0x10c   :  { %813 = vst.msk [vmem:[%s2451_s4 + $0xe4] sm:$0xf] %vm755_vm2, %v748_v45  ;;  %v986_v29 = vmul.f32 %v1997_v33, %v1997_v33  ;;  %v988_v54 = vmul.f32 %v2076_v7, %v2076_v7  ;;  %v881_v45 = vsel %vm820_vm3, %v2040_v20, 0.0 }
 0x10d   :  { %v864_v63 = vadd.f32 %v863_v42, %v862_v52  ;;  %v1061_v18 = vadd.f32 %v1060_v11, %v1059_v4  ;;  %v2189_v4 = vpop.f32.mrf.mxu2  ;;  %v1072_v11 = vsel %vm820_vm3, %v983_v59, 0.0  ;;  %v985_v42 = vmul.f32 %v1948_v60, %v1948_v60 }
 0x10e   :  { %v737_v16 = vpack.c.bf16 %v2189_v4, %v2189_v4 }
 0x10f   :  { %v1063_v30 = vadd.f32 %v1062_v21, %v1061_v18  ;;  %v866_v40 = vadd.f32 %v865_v41, %v864_v63  ;;  %v1074_v21 = vsel %vm820_vm3, %v984_v3, 0.0  ;;  %v877_v41 = vsel %vm820_vm3, %v1948_v60, 0.0 }
 0x110   :  { %802 = vst.msk [vmem:[%s2451_s4 + $0xb8] sm:$0xf] %vm755_vm2, %v737_v16  ;;  %v987_v60 = vmul.f32 %v2040_v20, %v2040_v20  ;;  %v889_v16 = vsel %vm820_vm3, %v1768_v0, 0.0 }
 0x111   :  { %v868_v2 = vadd.f32 %v867_v55, %v866_v40  ;;  %v1065_v56 = vadd.f32 %v1064_v48, %v1063_v30  ;;  %v2198_v18 = vpop.f32.mrf.mxu3  ;;  %v1076_v48 = vsel %vm820_vm3, %v985_v42, 0.0  ;;  %v879_v55 = vsel %vm820_vm3, %v1997_v33, 0.0 }
 0x112   :  { %v749_v46 = vpack.c.bf16 %v2198_v18, %v2198_v18  ;;  %v883_v33 = vsel %vm820_vm3, %v2076_v7, 0.0  ;;  %v885_v7 = vsel %vm820_vm3, %v1704_v37, 0.0 }
 0x113   :  { %v870_v50 = vadd.f32 %v869_v24, %v868_v2  ;;  %v1067_v51 = vadd.f32 %v1066_v14, %v1065_v56  ;;  %v1078_v56 = vsel %vm820_vm3, %v986_v29, 0.0  ;;  %v993_v29 = vmul.f32 %v1818_v15, %v1818_v15 }
 0x114   :  { %814 = vst.msk [vmem:[%s2451_s4 + $0xe8] sm:$0xf] %vm755_vm2, %v749_v46 }
 0x115   :  { %v872_v12 = vadd.f32 %v871_v17, %v870_v50  ;;  %v1069_v61 = vadd.f32 %v1068_v58, %v1067_v51  ;;  %v2227_v10 = vpop.f32.mrf.mxu2  ;;  %v989_v50 = vmul.f32 %v1704_v37, %v1704_v37  ;;  %v1080_v51 = vsel %vm820_vm3, %v987_v60, 0.0 }
 0x116   :  { %v1082_v58 = vsel %vm820_vm3, %v988_v54, 0.0  ;;  %v738_v17 = vpack.c.bf16 %v2227_v10, %v2227_v10  ;;  %v991_v37 = vmul.f32 %v1768_v0, %v1768_v0  ;;  %v893_v0 = vsel %vm820_vm3, %v1818_v15, 0.0 }
 0x117   :  { %v874_v27 = vadd.f32 %v873_v6, %v872_v12  ;;  %v1071_v52 = vadd.f32 %v1070_v5, %v1069_v61  ;;  %v990_v61 = vmul.f32 %v1738_v53, %v1738_v53 }
 0x118   :  { %803 = vst.msk [vmem:[%s2451_s4 + $0xbc] sm:$0xf] %vm755_vm2, %v738_v17  ;;  %v997_v17 = vmul.f32 %v1944_v57, %v1944_v57 }
 0x119   :  { %v876_v63 = vadd.f32 %v875_v25, %v874_v27  ;;  %v1073_v34 = vadd.f32 %v1072_v11, %v1071_v52  ;;  %v2235_v20 = vpop.f32.mrf.mxu3  ;;  %v1084_v27 = vsel %vm820_vm3, %v989_v50, 0.0  ;;  %v887_v52 = vsel %vm820_vm3, %v1738_v53, 0.0 }
 0x11a   :  { %v750_v5 = vpack.c.bf16 %v2235_v20, %v2235_v20  ;;  %v1086_v42 = vsel %vm820_vm3, %v990_v61, 0.0 }
 0x11b   :  { %v1075_v30 = vadd.f32 %v1074_v21, %v1073_v34  ;;  %v878_v40 = vadd.f32 %v877_v41, %v876_v63  ;;  %v992_v63 = vmul.f32 %v1794_v9, %v1794_v9  ;;  %v1088_v21 = vsel %vm820_vm3, %v991_v37, 0.0 }
 0x11c   :  { %815 = vst.msk [vmem:[%s2451_s4 + $0xec] sm:$0xf] %vm755_vm2, %v750_v5  ;;  %v891_v41 = vsel %vm820_vm3, %v1794_v9, 0.0  ;;  %v998_v5 = vmul.f32 %v1991_v44, %v1991_v44  ;;  %v999_v37 = vmul.f32 %v2037_v13, %v2037_v13 }
 0x11d   :  { %v1077_v38 = vadd.f32 %v1076_v48, %v1075_v30  ;;  %v880_v2 = vadd.f32 %v879_v55, %v878_v40  ;;  %v1090_v48 = vsel %vm820_vm3, %v992_v63, 0.0  ;;  %v994_v55 = vmul.f32 %v1850_v23, %v1850_v23 }
 0x11f   :  { %v1079_v14 = vadd.f32 %v1078_v56, %v1077_v38  ;;  %v882_v24 = vadd.f32 %v881_v45, %v880_v2  ;;  %v1092_v38 = vsel %vm820_vm3, %v993_v29, 0.0  ;;  %v895_v2 = vsel %vm820_vm3, %v1850_v23, 0.0 }
 0x120   :  { %v995_v56 = vmul.f32 %v1882_v32, %v1882_v32 }
 0x121   :  { %v1081_v59 = vadd.f32 %v1080_v51, %v1079_v14  ;;  %v884_v12 = vadd.f32 %v883_v33, %v882_v24  ;;  %v2266_v40 = vpop.f32.mrf.mxu3  ;;  %v1094_v33 = vsel %vm820_vm3, %v994_v55, 0.0  ;;  %v897_v14 = vsel %vm820_vm3, %v1882_v32, 0.0 }
 0x122   :  { %v751_v60 = vpack.c.bf16 %v2266_v40, %v2266_v40  ;;  %v996_v24 = vmul.f32 %v1914_v43, %v1914_v43  ;;  %v1096_v51 = vsel %vm820_vm3, %v995_v56, 0.0  ;;  %v901_v32 = vsel %vm820_vm3, %v1944_v57, 0.0 }
 0x123   :  { %v886_v6 = vadd.f32 %v885_v7, %v884_v12  ;;  %v1083_v3 = vadd.f32 %v1082_v58, %v1081_v59  ;;  %v899_v58 = vsel %vm820_vm3, %v1914_v43, 0.0 }
 0x124   :  { %816 = vst.msk [vmem:[%s2451_s4 + $0xf0] sm:$0xf] %vm755_vm2, %v751_v60  ;;  %v1098_v61 = vsel %vm820_vm3, %v996_v24, 0.0 }
 0x125   :  { %v888_v11 = vadd.f32 %v887_v52, %v886_v6  ;;  %v1085_v25 = vadd.f32 %v1084_v27, %v1083_v3  ;;  %v1100_v27 = vsel %vm820_vm3, %v997_v17, 0.0  ;;  %v903_v52 = vsel %vm820_vm3, %v1991_v44, 0.0 }
 0x126   :  { %v917_v17 = vsel %vm820_vm3, %v1826_v19, 0.0 }
 0x127   :  { %v890_v34 = vadd.f32 %v889_v16, %v888_v11  ;;  %v1087_v53 = vadd.f32 %v1086_v42, %v1085_v25  ;;  %v1102_v25 = vsel %vm820_vm3, %v998_v5, 0.0  ;;  %v905_v42 = vsel %vm820_vm3, %v2037_v13, 0.0 }
 0x128   :  { %v1000_v16 = vmul.f32 %v2073_v1, %v2073_v1  ;;  %v909_v13 = vsel %vm820_vm3, %v2117_v47, 0.0  ;;  %v919_v5 = vsel %vm820_vm3, %v1858_v28, 0.0 }
 0x129   :  { %v892_v46 = vadd.f32 %v891_v41, %v890_v34  ;;  %v1089_v30 = vadd.f32 %v1088_v21, %v1087_v53  ;;  %v2294_v7 = vpop.f32.mrf.mxu3  ;;  %v1104_v34 = vsel %vm820_vm3, %v999_v37, 0.0  ;;  %v907_v53 = vsel %vm820_vm3, %v2073_v1, 0.0 }
 0x12a   :  { %v752_v6 = vpack.c.bf16 %v2294_v7, %v2294_v7  ;;  %v1001_v21 = vmul.f32 %v2117_v47, %v2117_v47 }
 0x12b   :  { %v894_v54 = vadd.f32 %v893_v0, %v892_v46  ;;  %v1091_v9 = vadd.f32 %v1090_v48, %v1089_v30  ;;  %v1106_v30 = vsel %vm820_vm3, %v1000_v16, 0.0  ;;  %v1002_v48 = vmul.f32 %v2153_v8, %v2153_v8 }
 0x12c   :  { %817 = vst.msk [vmem:[%s2451_s4 + $0xf4] sm:$0xf] %vm755_vm2, %v752_v6  ;;  %v1108_v60 = vsel %vm820_vm3, %v1001_v21, 0.0 }
 0x12d   :  { %v896_v15 = vadd.f32 %v895_v2, %v894_v54  ;;  %v1093_v45 = vadd.f32 %v1092_v38, %v1091_v9  ;;  %v911_v54 = vsel %vm820_vm3, %v2153_v8, 0.0  ;;  %v1003_v9 = vmul.f32 %v2189_v4, %v2189_v4 }
 0x12e   :  { %v1004_v38 = vmul.f32 %v2227_v10, %v2227_v10  ;;  %v1110_v56 = vsel %vm820_vm3, %v1002_v48, 0.0  ;;  %v915_v8 = vsel %vm820_vm3, %v2227_v10, 0.0  ;;  %v1012_v48 = vmul.f32 %v2080_v31, %v2080_v31 }
 0x12f   :  { %v1095_v50 = vadd.f32 %v1094_v33, %v1093_v45  ;;  %v898_v23 = vadd.f32 %v897_v14, %v896_v15  ;;  %v913_v15 = vsel %vm820_vm3, %v2189_v4, 0.0  ;;  %v1005_v14 = vmul.f32 %v1826_v19, %v1826_v19 }
 0x130   :  { %v1112_v24 = vsel %vm820_vm3, %v1003_v9, 0.0  ;;  %v1006_v4 = vmul.f32 %v1858_v28, %v1858_v28  ;;  %v1007_v19 = vmul.f32 %v1890_v36, %v1890_v36 }
 0x131   :  { %v900_v59 = vadd.f32 %v899_v58, %v898_v23  ;;  %v1097_v12 = vadd.f32 %v1096_v51, %v1095_v50  ;;  %v2322_v46 = vpop.f32.mrf.mxu3  ;;  %v1114_v50 = vsel %vm820_vm3, %v1004_v38, 0.0  ;;  %v1130_v38 = vsel %vm820_vm3, %v1012_v48, 0.0 }
 0x132   :  { %v753_v0 = vpack.c.bf16 %v2322_v46, %v2322_v46 }
 0x133   :  { %v902_v3 = vadd.f32 %v901_v32, %v900_v59  ;;  %v1099_v43 = vadd.f32 %v1098_v61, %v1097_v12  ;;  %v1234_v59 = vmov 0.0   ;;  %v1116_v32 = vsel %vm820_vm3, %v1005_v14, 0.0 }
 0x134   :  { %818 = vst.msk [vmem:[%s2451_s4 + $0xf8] sm:$0xf] %vm755_vm2, %v753_v0 }
 0x135   :  { %v904_v57 = vadd.f32 %v903_v52, %v902_v3  ;;  %v1101_v11 = vadd.f32 %v1100_v27, %v1099_v43  ;;  %821 = vst.msk [vmem:[%s2452_s5] sm:$0xff] %vm820_vm3, %v1234_v59  ;;  %v1118_v43 = vsel %vm820_vm3, %v1006_v4, 0.0  ;;  %v921_v27 = vsel %vm820_vm3, %v1890_v36, 0.0 }
 0x136   :  { %v1008_v52 = vmul.f32 %v1922_v49, %v1922_v49  ;;  %v925_v36 = vsel %vm820_vm3, %v1952_v62, 0.0 }
 0x137   :  { %v906_v63 = vadd.f32 %v905_v42, %v904_v57  ;;  %v1103_v44 = vadd.f32 %v1102_v25, %v1101_v11  ;;  %v1120_v57 = vsel %vm820_vm3, %v1007_v19, 0.0  ;;  %v923_v11 = vsel %vm820_vm3, %v1922_v49, 0.0 }
 0x138   :  { %v1009_v25 = vmul.f32 %v1952_v62, %v1952_v62  ;;  %v927_v49 = vsel %vm820_vm3, %v2001_v35, 0.0  ;;  %v929_v62 = vsel %vm820_vm3, %v2044_v26, 0.0  ;;  %v1019_v19 = vmul.f32 %v2322_v46, %v2322_v46 }
 0x139   :  { %v908_v41 = vadd.f32 %v907_v53, %v906_v63  ;;  %v1105_v29 = vadd.f32 %v1104_v34, %v1103_v44  ;;  %v2351_v58 = vpop.f32.mrf.mxu3  ;;  %v1122_v63 = vsel %vm820_vm3, %v1008_v52, 0.0  ;;  %v1010_v44 = vmul.f32 %v2001_v35, %v2001_v35 }
 0x13a   :  { %v754_v10 = vpack.c.bf16 %v2351_v58, %v2351_v58  ;;  %v1124_v21 = vsel %vm820_vm3, %v1009_v25, 0.0  ;;  %v931_v35 = vsel %vm820_vm3, %v2080_v31, 0.0  ;;  %v935_v31 = vsel %vm820_vm3, %v2162_v39, 0.0 }
 0x13b   :  { %v1107_v55 = vadd.f32 %v1106_v30, %v1105_v29  ;;  %v910_v1 = vadd.f32 %v909_v13, %v908_v41  ;;  %v1011_v41 = vmul.f32 %v2044_v26, %v2044_v26  ;;  %v1126_v13 = vsel %vm820_vm3, %v1010_v44, 0.0 }
 0x13c   :  { %819 = vst.msk [vmem:[%s2451_s4 + $0xfc] sm:$0xf] %vm755_vm2, %v754_v10  ;;  %v933_v26 = vsel %vm820_vm3, %v2126_v22, 0.0  ;;  %v947_v52 = vsel %vm820_vm3, %v2351_v58, 0.0 }
 0x13d   :  { %v1109_v47 = vadd.f32 %v1108_v60, %v1107_v55  ;;  %v912_v2 = vadd.f32 %v911_v54, %v910_v1  ;;  %v1128_v1 = vsel %vm820_vm3, %v1011_v41, 0.0  ;;  %v1013_v60 = vmul.f32 %v2126_v22, %v2126_v22 }
 0x13e   :  { %v937_v22 = vsel %vm820_vm3, %v2198_v18, 0.0 }
 0x13f   :  { %v1111_v45 = vadd.f32 %v1110_v56, %v1109_v47  ;;  %v914_v33 = vadd.f32 %v913_v15, %v912_v2  ;;  %v1014_v47 = vmul.f32 %v2162_v39, %v2162_v39  ;;  %v1132_v15 = vsel %vm820_vm3, %v1013_v60, 0.0 }
 0x140   :  { %v939_v39 = vsel %vm820_vm3, %v2235_v20, 0.0 }
 0x141   :  { %v1113_v23 = vadd.f32 %v1112_v24, %v1111_v45  ;;  %v916_v51 = vadd.f32 %v915_v8, %v914_v33  ;;  %v1015_v8 = vmul.f32 %v2198_v18, %v2198_v18  ;;  %v1134_v14 = vsel %vm820_vm3, %v1014_v47, 0.0 }
 0x142   :  { %v1016_v24 = vmul.f32 %v2235_v20, %v2235_v20  ;;  %v941_v18 = vsel %vm820_vm3, %v2266_v40, 0.0  ;;  %v943_v20 = vsel %vm820_vm3, %v2294_v7, 0.0 }
 0x143   :  { %v918_v12 = vadd.f32 %v917_v17, %v916_v51  ;;  %v1115_v61 = vadd.f32 %v1114_v50, %v1113_v23  ;;  %v1136_v51 = vsel %vm820_vm3, %v1015_v8, 0.0  ;;  %v1017_v17 = vmul.f32 %v2266_v40, %v2266_v40 }
 0x144   :  { %v1138_v59 = vsel %vm820_vm3, %v1016_v24, 0.0 }
 0x145   :  { %v920_v6 = vadd.f32 %v919_v5, %v918_v12  ;;  %v1117_v3 = vadd.f32 %v1116_v32, %v1115_v61  ;;  %v1018_v12 = vmul.f32 %v2294_v7, %v2294_v7  ;;  %v1140_v5 = vsel %vm820_vm3, %v1017_v17, 0.0 }
 0x146   :  { %v1144_v7 = vsel %vm820_vm3, %v1019_v19, 0.0 }
 0x147   :  { %v922_v37 = vadd.f32 %v921_v27, %v920_v6  ;;  %v1119_v28 = vadd.f32 %v1118_v43, %v1117_v3  ;;  %v1020_v6 = vmul.f32 %v2351_v58, %v2351_v58  ;;  %v1142_v40 = vsel %vm820_vm3, %v1018_v12, 0.0 }
 0x148   :  { %v945_v27 = vsel %vm820_vm3, %v2322_v46, 0.0 }
 0x149   :  { %v924_v42 = vadd.f32 %v923_v11, %v922_v37  ;;  %v1121_v16 = vadd.f32 %v1120_v57, %v1119_v28  ;;  %v1146_v57 = vsel %vm820_vm3, %v1020_v6, 0.0 }
 0x14b   :  { %v926_v34 = vadd.f32 %v925_v36, %v924_v42  ;;  %v1123_v53 = vadd.f32 %v1122_v63, %v1121_v16 }
 0x14d   :  { %v928_v29 = vadd.f32 %v927_v49, %v926_v34  ;;  %v1125_v30 = vadd.f32 %v1124_v21, %v1123_v53 }
 0x14f   :  { %v1127_v0 = vadd.f32 %v1126_v13, %v1125_v30  ;;  %v930_v55 = vadd.f32 %v929_v62, %v928_v29 }
 0x151   :  { %v932_v54 = vadd.f32 %v931_v35, %v930_v55  ;;  %v1129_v9 = vadd.f32 %v1128_v1, %v1127_v0 }
 0x153   :  { %v934_v2 = vadd.f32 %v933_v26, %v932_v54  ;;  %v1131_v56 = vadd.f32 %v1130_v38, %v1129_v9 }
 0x155   :  { %v936_v45 = vadd.f32 %v935_v31, %v934_v2  ;;  %v1133_v33 = vadd.f32 %v1132_v15, %v1131_v56 }
 0x157   :  { %v938_v50 = vadd.f32 %v937_v22, %v936_v45  ;;  %v1135_v23 = vadd.f32 %v1134_v14, %v1133_v33 }
 0x159   :  { %v940_v4 = vadd.f32 %v939_v39, %v938_v50  ;;  %v1137_v10 = vadd.f32 %v1136_v51, %v1135_v23 }
 0x15b   :  { %v1139_v61 = vadd.f32 %v1138_v59, %v1137_v10  ;;  %v942_v32 = vadd.f32 %v941_v18, %v940_v4 }
 0x15d   :  { %v1141_v3 = vadd.f32 %v1140_v5, %v1139_v61  ;;  %v944_v43 = vadd.f32 %v943_v20, %v942_v32 }
 0x15f   :  { %v1143_v37 = vadd.f32 %v1142_v40, %v1141_v3  ;;  %v946_v28 = vadd.f32 %v945_v27, %v944_v43 }
 0x161   :  { %v1145_v11 = vadd.f32 %v1144_v7, %v1143_v37  ;;  %v948_v25 = vadd.f32 %v947_v52, %v946_v28 }
 0x163   :  { %v949_v42 = vrot.slane %v948_v25, 4  ;;  %v1147_v16 = vadd.f32 %v1146_v57, %v1145_v11 }
 0x165   :  { %v950_v63 = vadd.f32 %v949_v42, %v948_v25  ;;  %v1148_v36 = vrot.slane %v1147_v16, 4 }
 0x167   :  { %v951_v44 = vrot.slane %v950_v63, 2  ;;  %v1149_v34 = vadd.f32 %v1148_v36, %v1147_v16 }
 0x169   :  { %v952_v53 = vadd.f32 %v951_v44, %v950_v63  ;;  %v1150_v21 = vrot.slane %v1149_v34, 2 }
 0x16b   :  { %v953_v46 = vrot.slane %v952_v53, 1  ;;  %v1151_v49 = vadd.f32 %v1150_v21, %v1149_v34 }
 0x16d   :  { %v954_v58 = vadd.f32 %v953_v46, %v952_v53  ;;  %v1152_v41 = vrot.slane %v1151_v49, 1 }
 0x16f   :  { %956 = vst.msk [vmem:[%s2452_s5] sm:$0x1] %vm955_vm4, %v954_v58  ;;  %v1153_v29 = vadd.f32 %v1152_v41, %v1151_v49 }
 0x171   :  { %1154 = vst.msk [vmem:[%s2452_s5 + $0x1] sm:$0x1] %vm955_vm4, %v1153_v29 }

// kernel: bottleneck_forward.3
= control target key start
LH: loop header
LB: loop body
LE: loop exit
PB: predicated region body
PF: predicated region fallthrough
CT: control target
= control target key end

     0   :  { %s5089_s21 = smov 0   ;;  %s5091_s22 = smov 0   ;;  %s7463_s0 = inlined_call_operand.vmem [shape: bf16[2,16,16,16], index: 0, kind: input, shape index: {}, may-alias: {0,1,2}]   ;;  %s7464_s1 = inlined_call_operand.vmem [shape: bf16[2,16,16,16], index: 1, kind: input, shape index: {}, may-alias: {0,1,2}]   ;;  %s7465_s2 = inlined_call_operand.vmem [shape: bf16[2,16,16,16], index: 2, kind: input, shape index: {}, may-alias: {0,1,2}]   ;;  %s7466_s3 = inlined_call_operand.vmem [shape: f32[1,16], index: 3, kind: input, shape index: {}]   ;;  %s7467_s4 = inlined_call_operand.vmem [shape: f32[1,16], index: 4, kind: input, shape index: {}]   ;;  %s7468_s5 = inlined_call_operand.vmem [shape: f32[3,16,12], index: 5, kind: input, shape index: {}]   ;;  %s7469_s6 = inlined_call_operand.vmem [shape: f32[2,4,16,16], index: 6, kind: output, shape index: {}]  }
   0x1   :  { %s5093_s23 = smov 0  }
   0x2 LB: > { %s28_s24 = sadd.s32 1, %s5036_s22  ;;  %p4364_p0 = scmp.ge.s32.totalorder %s5040_s23, 1  ;;  %s5040_s23 = sphi %s5093_s23, %s16_s23   ;;  %s5036_s22 = sphi %s5091_s22, %s7779_s22   ;;  %s5032_s21 = sphi %s5089_s21, %s7778_s21  }
   0x3   : > { %p30_p1 = scmp.ge.s32.totalorder %s28_s24, 2  ;;  %p298_p2 = scmp.lt.s32.totalorder %s5040_s23, 3 }
   0x5   : > { %s7781_s24 = smov (%p30_p1, %s28_s24), 0  ;;  %p299_p3 = pnand %p4364_p0, %p298_p2 }
   0x7   : > { %302 = sbr.rel (%p299_p3) target bundleno = 1097 (0x449), region = 44 }
   0xc   : > { %v4422_v0 = vld [vmem:[%s7468_s5 + $0x18] sm:$0xff]  ;;  %v1393_v1 = vld [vmem:[%s7468_s5 + $0x8] sm:$0xff]  ;;  %v4421_v2 = vld [vmem:[%s7468_s5 + $0x10] sm:$0xff]  ;;  %p364_p4 = scmp.lt.s32.totalorder %s5032_s21, 1  ;;  %vm421_vm0 = vcmask 122880   ;;  %vm478_vm3 = vcmask 125952  }
   0xd   : > { %2455 = vmatpush.msra.mxu1 %v4422_v0  ;;  %4969 = vmatpush.msra.mxu3 %v1393_v1  ;;  %v5119_v3 = vld [vmem:[%s7468_s5 + $0x28] sm:$0xff]  ;;  %vm422_vm1 = vsmask.f32 256  ;;  %v1392_v5 = vld [vmem:[%s7468_s5] sm:$0xff]  ;;  %vm479_vm4 = vsmask.f32 7938 }
   0xe   : > { %3356 = vmatpush.msra.mxu2 %v5119_v3  ;;  %s7783_s21 = smov (!%p364_p4, %s5032_s21), 1  ;;  %v427_v4 = vld [vmem:[#allocation2 + $0xc] sm:$0x1]  ;;  %1553 = vmatpush.msra.mxu0 %v1393_v1  ;;  %vm5128_vm2 = vmand %vm421_vm0, %vm422_vm1  ;;  %v5135_v7 = vld [vmem:[%s7466_s3] ss:$0 sm:$0xff]  ;;  %v5042_v16 = vmov 0.0  }
   0xf   : > { %2456 = vmatpush.msra.mxu1 %v4421_v2  ;;  %4970 = vmatpush.msra.mxu3 %v1392_v5  ;;  %s5138_s13 = sshll.u32 %s7783_s21, 7  ;;  %v428_v8 = vsel %vm5128_vm2, 0, %v427_v4  ;;  %v5145_v9 = vld [vmem:[%s7468_s5 + $0x20] sm:$0xff]  ;;  %v460_v10 = vld [vmem:[#allocation2 + $0x90] sm:$0x1]  ;;  %vm5167_vm5 = vmand %vm478_vm3, %vm479_vm4  ;;  %v5173_v17 = vunpack.c.l.bf16 %v5042_v16  ;;  %vm1394_vm8 = vcmask 130048  }
  0x10   : > { %1554 = vmatpush.msra.mxu0 %v1392_v5  ;;  %s5151_s18 = scalar_lea.vmem %s7463_s0, %s5138_s13  ;;  %429 = vst [vmem:[#allocation2 + $0xc] sm:$0x1] %v428_v8  ;;  %v5156_v11 = vld [vmem:[%s7467_s4] ss:$0 sm:$0xff]  ;;  %3357 = vmatpush.msra.mxu2 %v5145_v9  ;;  %v461_v12 = vsel %vm5128_vm2, 0, %v460_v10  ;;  %s386_s27 = scalar_lea.vmem %s7464_s1, %s5138_s13  ;;  %vm1989_vm9 = vcmask 1045504  }
  0x11   : > { %4971 = vmatpush.msrb.mxu3 %v4422_v0  ;;  %v4529_v14 = vld [vmem:[%s5151_s18] sm:$0xff]   ;;  %462 = vst [vmem:[#allocation2 + $0x90] sm:$0x1] %v461_v12  ;;  %v4895_v15 = vld [vmem:[%s5151_s18 + $0x58] sm:$0xff]   ;;  %v4885_v22 = vld [vmem:[%s5151_s18 + $0x8] sm:$0xff]   ;;  %vm1780_vm10 = vcmask 1046528  }
  0x12   : > { %v4530_v18 = vunpack.c.l.bf16 %v4529_v14  ;;  %v4574_v19 = vunpack.c.l.bf16 %v4895_v15  ;;  %v4575_v20 = vunpack.c.h.bf16 %v4895_v15  ;;  %v430_v21 = vld [vmem:[#allocation2 + $0x18] sm:$0x1]  ;;  %v424_v23 = vld [vmem:[#allocation2] sm:$0x1]  ;;  %v4531_v24 = vunpack.c.h.bf16 %v4529_v14  ;;  %v484_v30 = vld [vmem:[#allocation2 + $0x14] sm:$0xf] }
  0x13   : > { %4972 = vmatpush.msrb.mxu3 %v4421_v2  ;;  %v431_v25 = vsel %vm5128_vm2, 0, %v430_v21  ;;  %v4534_v26 = vunpack.c.l.bf16 %v4885_v22  ;;  %v4535_v27 = vunpack.c.h.bf16 %v4885_v22  ;;  %v425_v28 = vsel %vm5128_vm2, 0, %v424_v23  ;;  %v4593_v29 = vld [vmem:[%s386_s27] sm:$0xff]   ;;  %s5043_s28 = smov 120   ;;  %s5044_s29 = smov 124  }
  0x14   : > { %v602_v31 = vmul.f32 %v5135_v7, %v4530_v18  ;;  %v624_v32 = vmul.f32 %v5135_v7, %v4574_v19  ;;  %v625_v33 = vmul.f32 %v5135_v7, %v4575_v20  ;;  %432 = vst [vmem:[#allocation2 + $0x18] sm:$0x1] %v431_v25  ;;  %v4594_v34 = vunpack.c.l.bf16 %v4593_v29  ;;  %s4526_s15 = sadd.s32 120, %s5138_s13  ;;  %s5045_s13 = smov 112  }
  0x15   : > { %vm733_vm6 = vsmask.f32 4368  ;;  %v604_v35 = vmul.f32 %v5135_v7, %v4534_v26  ;;  %v605_v36 = vmul.f32 %v5135_v7, %v4535_v27  ;;  %426 = vst [vmem:[#allocation2] sm:$0x1] %v425_v28  ;;  %v4595_v37 = vunpack.c.h.bf16 %v4593_v29  ;;  %s5046_s19 = smov 96   ;;  %s5047_s20 = smov 80  }
  0x16   : > { %v485_v38 = vsel %vm5167_vm5, 0, %v484_v30  ;;  %v637_v39 = vadd.f32 %v5156_v11, %v602_v31  ;;  %v659_v40 = vadd.f32 %v5156_v11, %v624_v32  ;;  %v660_v41 = vadd.f32 %v5156_v11, %v625_v33  ;;  %vm5205_vm7 = vmor %vm422_vm1, %vm733_vm6  ;;  %s5048_s25 = smov 32   ;;  %s5049_s26 = smov 16  }
  0x17   : > { %v1173_v42 = vmul.f32 %v5135_v7, %v4594_v34  ;;  %486 = vst [vmem:[#allocation2 + $0x14] sm:$0xf] %v485_v38  ;;  %v639_v43 = vadd.f32 %v5156_v11, %v604_v35  ;;  %v640_v44 = vadd.f32 %v5156_v11, %v605_v36  ;;  %v1174_v45 = vmul.f32 %v5135_v7, %v4595_v37  ;;  %v1056_v18 = vld [vmem:[#allocation2 + $0xc] sm:$0xf]  ;;  %v463_v38 = vld [vmem:[#allocation2 + $0x9c] sm:$0x1] }
  0x18   : > { %v603_v46 = vmul.f32 %v5135_v7, %v4531_v24  ;;  %v669_v47 = vmax.f32 %v637_v39, 0.0  ;;  %v691_v48 = vmax.f32 %v659_v40, 0.0  ;;  %v692_v49 = vmax.f32 %v660_v41, 0.0  ;;  %v1134_v20 = vld [vmem:[#allocation2 + $0x90] sm:$0xf]  ;;  %s5050_s27 = smov 64  }
  0x19   : > { %v1175_v50 = vadd.f32 %v5156_v11, %v1173_v42  ;;  %v671_v51 = vmax.f32 %v639_v43, 0.0  ;;  %v672_v52 = vmax.f32 %v640_v44, 0.0  ;;  %v1176_v53 = vadd.f32 %v5156_v11, %v1174_v45  ;;  %v517_v43 = vld [vmem:[#allocation2 + $0x98] sm:$0xf]  ;;  %v5223_v44 = vld [vmem:[%s5151_s18 + $0x60] sm:$0xff]  }
  0x1a   : > { %v638_v54 = vadd.f32 %v5156_v11, %v603_v46  ;;  %v701_v55 = vpack.c.bf16 %v669_v47, %v669_v47  ;;  %v723_v56 = vpack.c.bf16 %v691_v48, %v691_v48  ;;  %v724_v57 = vpack.c.bf16 %v692_v49, %v692_v49  ;;  %v481_v47 = vld [vmem:[#allocation2 + $0x8] sm:$0xf]  ;;  %v433_v48 = vld [vmem:[#allocation2 + $0x24] sm:$0x1] }
  0x1b   : > { %v1177_v58 = vmax.f32 %v1175_v50, 0.0  ;;  %v703_v59 = vpack.c.bf16 %v671_v51, %v671_v51  ;;  %v704_v60 = vpack.c.bf16 %v672_v52, %v672_v52  ;;  %v1178_v61 = vmax.f32 %v1176_v53, 0.0  ;;  %v1064_v29 = vld [vmem:[#allocation2 + $0x18] sm:$0xf] }
  0x1c   : > { %v670_v62 = vmax.f32 %v638_v54, 0.0  ;;  %v736_v63 = vshrl.u32 %v701_v55, 16  ;;  %v739_v0 = vshll.u32 %v701_v55, 16  ;;  %v923_v1 = vshrl.u32 %v723_v56, 16 }
  0x1d   : > { %v926_v2 = vshll.u32 %v723_v56, 16  ;;  %v931_v4 = vshrl.u32 %v724_v57, 16  ;;  %v934_v5 = vshll.u32 %v724_v57, 16  ;;  %v753_v8 = vshrl.u32 %v703_v59, 16  ;;  %v5236_v57 = vld [vmem:[%s5151_s18 + $0x10] sm:$0xff]  }
  0x1e   : > { %v756_v10 = vshll.u32 %v703_v59, 16  ;;  %v5198_v12 = vrot.slane %v736_v63, 7  ;;  %v925_v14 = vrot.slane %v923_v1, 7  ;;  %v761_v15 = vshrl.u32 %v704_v60, 16  ;;  %v1225_v1 = vld [vmem:[#allocation2] sm:$0xf] }
  0x1f   : > { %v764_v16 = vshll.u32 %v704_v60, 16  ;;  %v5200_v19 = vrot.slane %v931_v4, 7  ;;  %v755_v21 = vrot.slane %v753_v8, 7  ;;  %v1179_v22 = vpack.c.bf16 %v1177_v58, %v1177_v58 }
  0x20   : > { %v1180_v23 = vpack.c.bf16 %v1178_v61, %v1178_v61  ;;  %v741_v24 = vor.u32 %v739_v0, %v5198_v12  ;;  %v928_v26 = vor.u32 %v926_v2, %v925_v14  ;;  %v929_v27 = vrot.slane %v925_v14, 4  ;;  %v1061_v61 = vld [vmem:[#allocation2 + $0x14] sm:$0x1] }
  0x21   : > { %v5209_v28 = vrot.slane %v761_v15, 7  ;;  %v936_v30 = vor.u32 %v934_v5, %v5200_v19  ;;  %v758_v31 = vor.u32 %v756_v10, %v755_v21  ;;  %v759_v32 = vrot.slane %v755_v21, 4 }
  0x22   : > { %v1198_v33 = vunpack.c.l.bf16 %v1179_v22  ;;  %v1057_v34 = vsel %vm5167_vm5, %v741_v24, %v1056_v18  ;;  %v1135_v35 = vsel %vm5167_vm5, %v928_v26, %v1134_v20  ;;  %v1199_v37 = vunpack.c.l.bf16 %v1180_v23 }
  0x23   : > { %v766_v36 = vor.u32 %v764_v16, %v5209_v28  ;;  %1058 = vst [vmem:[#allocation2 + $0xc] sm:$0xf] %v1057_v34  ;;  %v937_v39 = vsel %vm5205_vm7, %v929_v27, %v936_v30  ;;  %v1065_v40 = vsel %vm5167_vm5, %v758_v31, %v1064_v29  ;;  %v702_v42 = vpack.c.bf16 %v670_v62, %v670_v62 }
  0x24   : > { %v1201_v41 = vmul.f32 %v5173_v17, %v1198_v33  ;;  %1136 = vst [vmem:[#allocation2 + $0x90] sm:$0xf] %v1135_v35  ;;  %v1202_v46 = vmul.f32 %v5173_v17, %v1199_v37  ;;  %v464_v52 = vsel %vm5128_vm2, 0, %v463_v38  ;;  %v742_v54 = vrot.slane %v5198_v12, 4  ;;  %v487_v12 = vld [vmem:[#allocation2 + $0x20] sm:$0xf] }
  0x25   : > { %v767_v45 = vsel %vm5205_vm7, %v759_v32, %v766_v36  ;;  %1137 = vst.msk [vmem:[#allocation2 + $0x94] sm:$0xf] %vm478_vm3, %v937_v39  ;;  %v744_v50 = vshrl.u32 %v702_v42, 16  ;;  %v747_v51 = vshll.u32 %v702_v42, 16  ;;  %v518_v55 = vsel %vm5167_vm5, 0, %v517_v43 }
  0x26   : > { %v1203_v49 = vpack.c.bf16 %v1201_v41, %v1201_v41  ;;  %1066 = vst [vmem:[#allocation2 + $0x18] sm:$0xf] %v1065_v40  ;;  %v1204_v53 = vpack.c.bf16 %v1202_v46, %v1202_v46  ;;  %v4578_v56 = vunpack.c.l.bf16 %v5223_v44  ;;  %v482_v62 = vsel %vm5167_vm5, 0, %v481_v47 }
  0x27   : > { %1067 = vst.msk [vmem:[#allocation2 + $0x1c] sm:$0xf] %vm478_vm3, %v767_v45  ;;  %v746_v60 = vrot.slane %v744_v50, 7  ;;  %v434_v4 = vsel %vm5128_vm2, 0, %v433_v48  ;;  %v4538_v14 = vunpack.c.l.bf16 %v5236_v57  ;;  %v4579_v20 = vunpack.c.h.bf16 %v5223_v44 }
  0x28   : > { %v1206_v58 = vshrl.u32 %v1203_v49, 16  ;;  %v1209_v59 = vshll.u32 %v1203_v49, 16  ;;  %v1214_v63 = vshrl.u32 %v1204_v53, 16  ;;  %v1217_v0 = vshll.u32 %v1204_v53, 16  ;;  %465 = vst [vmem:[#allocation2 + $0x9c] sm:$0x1] %v464_v52 }
  0x29   : > { %v626_v2 = vmul.f32 %v5135_v7, %v4578_v56  ;;  %v749_v8 = vor.u32 %v747_v51, %v746_v60  ;;  %v751_v10 = vrot.slane %v746_v60, 4  ;;  %519 = vst [vmem:[#allocation2 + $0x98] sm:$0xf] %v518_v55  ;;  %v938_v31 = vrot.slane %v5200_v19, 4  ;;  %v520_v49 = vld [vmem:[#allocation2 + $0xa4] sm:$0xf] }
  0x2a   : > { %v1208_v5 = vrot.slane %v1206_v58, 7  ;;  %v2198_v15 = vld [vmem:[#allocation2 + $0xc] sm:$0xf]  ;;  %v1216_v16 = vrot.slane %v1214_v63, 7  ;;  %483 = vst [vmem:[#allocation2 + $0x8] sm:$0xf] %v482_v62  ;;  %v606_v35 = vmul.f32 %v5135_v7, %v4538_v14  ;;  %v627_v19 = vmul.f32 %v5135_v7, %v4579_v20 }
  0x2b   : > { %v661_v18 = vadd.f32 %v5156_v11, %v626_v2  ;;  %v2246_v21 = vunpack.c.l.bf16 %v2198_v15  ;;  %v750_v24 = vsel %vm5205_vm7, %v742_v54, %v749_v8  ;;  %435 = vst [vmem:[#allocation2 + $0x24] sm:$0x1] %v434_v4  ;;  %v1062_v29 = vsel %vm5128_vm2, %v751_v10, %v1061_v61 }
  0x2c   : > { %v1211_v22 = vor.u32 %v1209_v59, %v1208_v5  ;;  %v1212_v23 = vrot.slane %v1208_v5, 4  ;;  %v4917_v26 = vld [vmem:[#allocation2 + $0x90] sm:$0xff]   ;;  %v1219_v27 = vor.u32 %v1217_v0, %v1216_v16  ;;  %1060 = vst.msk [vmem:[#allocation2 + $0x10] sm:$0xf] %vm478_vm3, %v750_v24  ;;  %v488_v34 = vsel %vm5167_vm5, 0, %v487_v12 }
  0x2d   : > { %v693_v30 = vmax.f32 %v661_v18, 0.0  ;;  %4423 = vmatmul.msk.f32.vlgmr.msra.gmra.mxu1 %vm1394_vm8, %v2246_v21  ;;  %v4674_v32 = vunpack.c.l.bf16 %v4917_v26  ;;  %1063 = vst [vmem:[#allocation2 + $0x14] sm:$0x1] %v1062_v29  ;;  %v1221_v39 = vrot.slane %v1216_v16, 4  ;;  %v641_v41 = vadd.f32 %v5156_v11, %v606_v35  ;;  %v490_v16 = vld [vmem:[#allocation2 + $0x2c] sm:$0xf] }
  0x2e   : > { %v1226_v33 = vsel %vm5167_vm5, %v1211_v22, %v1225_v1  ;;  %v4789_v36 = vld [vmem:[#allocation2 + $0x18] sm:$0xff]   ;;  %v1220_v37 = vsel %vm5205_vm7, %v1212_v23, %v1219_v27  ;;  %489 = vst [vmem:[#allocation2 + $0x20] sm:$0xf] %v488_v34  ;;  %v662_v45 = vadd.f32 %v5156_v11, %v627_v19  ;;  %v521_v52 = vsel %vm5167_vm5, 0, %v520_v49 }
  0x2f   : > { %1227 = vst [vmem:[#allocation2] sm:$0xf] %v1226_v33  ;;  %v725_v38 = vpack.c.bf16 %v693_v30, %v693_v30  ;;  %4409 = vmatmul.msk.f32.vlgmr.msra.gmra.mxu3 %vm1394_vm8, %v4674_v32  ;;  %v5263_v40 = vunpack.c.l.bf16 %v4789_v36  ;;  %v673_v48 = vmax.f32 %v641_v41, 0.0  ;;  %v4539_v53 = vunpack.c.h.bf16 %v5236_v57  ;;  %v1141_v54 = vld [vmem:[#allocation2 + $0x9c] sm:$0xf] }
  0x30   : > { %1228 = vst.msk [vmem:[#allocation2 + $0x4] sm:$0xf] %vm478_vm3, %v1220_v37  ;;  %v1138_v44 = vld [vmem:[#allocation2 + $0x98] sm:$0x1]  ;;  %4973 = vmatpush.msra.mxu3 %v5119_v3  ;;  %v4675_v3 = vunpack.c.h.bf16 %v4917_v26  ;;  %v694_v56 = vmax.f32 %v662_v45, 0.0  ;;  %v768_v60 = vrot.slane %v5209_v28, 4  ;;  %v5284_v63 = vunpack.c.h.bf16 %v4789_v36 }
  0x31   : > { %v940_v42 = vshrl.u32 %v725_v38, 16  ;;  %v943_v43 = vshll.u32 %v725_v38, 16  ;;  %4473 = vmatmul.msk.f32.vlgmr.msra.gmra.mxu2 %vm1394_vm8, %v5263_v40  ;;  %v1139_v46 = vsel %vm5128_vm2, %v938_v31, %v1138_v44  ;;  %v1229_v47 = vld [vmem:[#allocation2 + $0x8] sm:$0x1]  ;;  %v705_v55 = vpack.c.bf16 %v673_v48, %v673_v48  ;;  %522 = vst [vmem:[#allocation2 + $0xa4] sm:$0xf] %v521_v52 }
  0x32   : > { %1140 = vst [vmem:[#allocation2 + $0x98] sm:$0x1] %v1139_v46  ;;  %v1230_v51 = vsel %vm5128_vm2, %v1221_v39, %v1229_v47  ;;  %4974 = vmatpush.msra.mxu3 %v5145_v9  ;;  %v607_v61 = vmul.f32 %v5135_v7, %v4539_v53  ;;  %v726_v2 = vpack.c.bf16 %v694_v56, %v694_v56  ;;  %v1071_v12 = vld [vmem:[#allocation2 + $0x24] sm:$0xf]  ;;  %v491_v20 = vsel %vm5167_vm5, 0, %v490_v16  ;;  %v4897_v52 = vld [vmem:[%s5151_s18 + $0x68] sm:$0xff]  }
  0x33   : > { %v942_v50 = vrot.slane %v940_v42, 7  ;;  %1231 = vst [vmem:[#allocation2 + $0x8] sm:$0x1] %v1230_v51  ;;  %v770_v57 = vshrl.u32 %v705_v55, 16  ;;  %v773_v0 = vshll.u32 %v705_v55, 16  ;;  %v4582_v55 = vunpack.c.l.bf16 %v4897_v52 }
  0x34   : > { %v5279_v58 = vld [vmem:[#allocation2 + $0x10] sm:$0xff]   ;;  %v642_v4 = vadd.f32 %v5156_v11, %v607_v61  ;;  %v948_v14 = vshrl.u32 %v726_v2, 16  ;;  %v951_v15 = vshll.u32 %v726_v2, 16  ;;  %492 = vst [vmem:[#allocation2 + $0x2c] sm:$0xf] %v491_v20  ;;  %v4583_v56 = vunpack.c.h.bf16 %v4897_v52 }
  0x35   : > { %v945_v59 = vor.u32 %v943_v43, %v942_v50  ;;  %v4698_v62 = vunpack.c.l.bf16 %v5279_v58  ;;  %v772_v28 = vrot.slane %v770_v57, 7  ;;  %v1068_v8 = vld [vmem:[#allocation2 + $0x20] sm:$0x1]  ;;  %v946_v22 = vrot.slane %v942_v50, 4  ;;  %v466_v51 = vld [vmem:[#allocation2 + $0xa8] sm:$0x1] }
  0x36   : > { %v1069_v10 = vsel %vm5128_vm2, %v768_v60, %v1068_v8  ;;  %v674_v21 = vmax.f32 %v642_v4, 0.0  ;;  %v950_v23 = vrot.slane %v948_v14, 7  ;;  %v4699_v24 = vunpack.c.h.bf16 %v5279_v58  ;;  %v4887_v8 = vld [vmem:[%s5151_s18 + $0x18] sm:$0xff]  }
  0x37   : > { %v4601_v9 = vld [vmem:[#allocation2] sm:$0xff]   ;;  %v1142_v1 = vsel %vm5167_vm5, %v945_v59, %v1141_v54  ;;  %4424 = vmatmul.msk.f32.gmra.mxu1 %vm1394_vm8, %v4698_v62  ;;  %4410 = vmatmul.msk.f32.gmra.mxu3 %vm1394_vm8, %v4675_v3  ;;  %v775_v18 = vor.u32 %v773_v0, %v772_v28  ;;  %1070 = vst [vmem:[#allocation2 + $0x20] sm:$0x1] %v1069_v10  ;;  %v776_v39 = vrot.slane %v772_v28, 4  ;;  %v467_v54 = vsel %vm5128_vm2, 0, %v466_v51 }
  0x38   : > { %v4602_v5 = vunpack.c.l.bf16 %v4601_v9  ;;  %1143 = vst [vmem:[#allocation2 + $0x9c] sm:$0xf] %v1142_v1  ;;  %v1145_v27 = vld [vmem:[#allocation2 + $0xa4] sm:$0x1]  ;;  %v706_v29 = vpack.c.bf16 %v674_v21, %v674_v21  ;;  %v953_v30 = vor.u32 %v951_v15, %v950_v23  ;;  %v955_v31 = vrot.slane %v950_v23, 4 }
  0x39   : > { %4474 = vmatmul.msk.f32.gmra.mxu2 %vm1394_vm8, %v5284_v63  ;;  %v1072_v26 = vsel %vm5167_vm5, %v775_v18, %v1071_v12  ;;  %v4603_v32 = vunpack.c.h.bf16 %v4601_v9  ;;  %468 = vst [vmem:[#allocation2 + $0xa8] sm:$0x1] %v467_v54  ;;  %v628_v59 = vmul.f32 %v5135_v7, %v4582_v55  ;;  %v629_v60 = vmul.f32 %v5135_v7, %v4583_v56  ;;  %v436_v28 = vld [vmem:[#allocation2 + $0x30] sm:$0x1]  ;;  %v439_v54 = vld [vmem:[#allocation2 + $0x3c] sm:$0x1] }
  0x3a   : > { %4373 = vmatmul.msk.f32.vlgmr.msra.gmra.mxu0 %vm1394_vm8, %v4602_v5  ;;  %1073 = vst [vmem:[#allocation2 + $0x24] sm:$0xf] %v1072_v26  ;;  %v778_v33 = vshrl.u32 %v706_v29, 16  ;;  %v781_v34 = vshll.u32 %v706_v29, 16  ;;  %v954_v36 = vsel %vm5205_vm7, %v946_v22, %v953_v30  ;;  %v1146_v37 = vsel %vm5128_vm2, %v955_v31, %v1145_v27  ;;  %v4900_v44 = vld [vmem:[#allocation2 + $0x8] sm:$0xff]  }
  0x3b   : > { %1144 = vst.msk [vmem:[#allocation2 + $0xa0] sm:$0xf] %vm478_vm3, %v954_v36  ;;  %v1075_v43 = vld [vmem:[#allocation2 + $0x2c] sm:$0x1]  ;;  %v4606_v49 = vunpack.c.l.bf16 %v4900_v44  ;;  %v4607_v61 = vunpack.c.h.bf16 %v4900_v44  ;;  %v663_v9 = vadd.f32 %v5156_v11, %v628_v59  ;;  %v664_v1 = vadd.f32 %v5156_v11, %v629_v60  ;;  %v493_v56 = vld [vmem:[#allocation2 + $0x38] sm:$0xf] }
  0x3c   : > { %v780_v19 = vrot.slane %v778_v33, 7  ;;  %1147 = vst [vmem:[#allocation2 + $0xa4] sm:$0x1] %v1146_v37  ;;  %v437_v14 = vsel %vm5128_vm2, 0, %v436_v28  ;;  %v4542_v15 = vunpack.c.l.bf16 %v4887_v8  ;;  %v4543_v16 = vunpack.c.h.bf16 %v4887_v8 }
  0x3d   : > { %v695_v2 = vmax.f32 %v663_v9, 0.0  ;;  %v696_v4 = vmax.f32 %v664_v1, 0.0  ;;  %438 = vst [vmem:[#allocation2 + $0x30] sm:$0x1] %v437_v14  ;;  %v440_v55 = vsel %vm5128_vm2, 0, %v439_v54  ;;  %vm4108_vm11 = vcmask 1047556  }
  0x3e   : > { %v783_v41 = vor.u32 %v781_v34, %v780_v19  ;;  %v785_v42 = vrot.slane %v780_v19, 4  ;;  %v608_v26 = vmul.f32 %v5135_v7, %v4542_v15  ;;  %v609_v27 = vmul.f32 %v5135_v7, %v4543_v16  ;;  %v469_v19 = vld [vmem:[#allocation2 + $0xb4] sm:$0x1]  ;;  %441 = vst [vmem:[#allocation2 + $0x3c] sm:$0x1] %v440_v55 }
  0x3f   : > { %v5303_v35 = vld [vmem:[#allocation2 + $0x98] sm:$0xff]   ;;  %4425 = vmatmul.msk.f32.gmra.mxu1 %vm1394_vm8, %v4699_v24  ;;  %v727_v10 = vpack.c.bf16 %v695_v2, %v695_v2  ;;  %v728_v12 = vpack.c.bf16 %v696_v4, %v696_v4  ;;  %v494_v2 = vsel %vm5167_vm5, 0, %v493_v56 }
  0x40   : > { %v4678_v38 = vunpack.c.l.bf16 %v5303_v35  ;;  %v784_v46 = vsel %vm5205_vm7, %v776_v39, %v783_v41  ;;  %v1076_v47 = vsel %vm5128_vm2, %v785_v42, %v1075_v43  ;;  %v4679_v50 = vunpack.c.h.bf16 %v5303_v35  ;;  %v1148_v31 = vld [vmem:[#allocation2 + $0xa8] sm:$0xf]  ;;  %v523_v41 = vld [vmem:[#allocation2 + $0xb0] sm:$0xf]  ;;  %495 = vst [vmem:[#allocation2 + $0x38] sm:$0xf] %v494_v2 }
  0x41   : > { %v4946_v45 = vld [vmem:[#allocation2 + $0x20] sm:$0xff]   ;;  %1074 = vst.msk [vmem:[#allocation2 + $0x28] sm:$0xf] %vm478_vm3, %v784_v46  ;;  %v957_v18 = vshrl.u32 %v727_v10, 16  ;;  %v960_v20 = vshll.u32 %v727_v10, 16  ;;  %v965_v21 = vshrl.u32 %v728_v12, 16  ;;  %v644_v33 = vadd.f32 %v5156_v11, %v609_v27 }
  0x42   : > { %4374 = vmatmul.msk.f32.gmra.mxu0 %vm1394_vm8, %v4603_v32  ;;  %4411 = vmatmul.msk.f32.gmra.mxu3 %vm1394_vm8, %v4678_v38  ;;  %v5320_v48 = vunpack.c.l.bf16 %v4946_v45  ;;  %1077 = vst [vmem:[#allocation2 + $0x2c] sm:$0x1] %v1076_v47  ;;  %v5335_v3 = vunpack.c.h.bf16 %v4946_v45  ;;  %v968_v22 = vshll.u32 %v728_v12, 16  ;;  %v643_v32 = vadd.f32 %v5156_v11, %v608_v26  ;;  %v5385_v46 = vld [vmem:[%s5151_s18 + $0x20] sm:$0xff]   ;;  %v526_v10 = vld [vmem:[#allocation2 + $0xbc] sm:$0xf] }
  0x43   : > { %v5333_v53 = vld [vmem:[#allocation2 + $0xa0] sm:$0xff]   ;;  %v959_v29 = vrot.slane %v957_v18, 7  ;;  %v5362_v30 = vrot.slane %v965_v21, 7  ;;  %v676_v39 = vmax.f32 %v644_v33, 0.0  ;;  %v470_v45 = vsel %vm5128_vm2, 0, %v469_v19 }
  0x44   : > { %4475 = vmatmul.msk.f32.gmra.mxu2 %vm1394_vm8, %v5320_v48  ;;  %v4682_v57 = vunpack.c.l.bf16 %v5333_v53  ;;  %v4683_v23 = vunpack.c.h.bf16 %v5333_v53  ;;  %v675_v38 = vmax.f32 %v643_v32, 0.0  ;;  %v524_v51 = vsel %vm5167_vm5, 0, %v523_v41  ;;  %471 = vst [vmem:[#allocation2 + $0xb4] sm:$0x1] %v470_v45  ;;  %v1078_v14 = vld [vmem:[#allocation2 + $0x30] sm:$0xf] }
  0x45   : > { %v962_v34 = vor.u32 %v960_v20, %v959_v29  ;;  %v963_v36 = vrot.slane %v959_v29, 4  ;;  %v970_v37 = vor.u32 %v968_v22, %v5362_v30  ;;  %v4546_v59 = vunpack.c.l.bf16 %v5385_v46  ;;  %525 = vst [vmem:[#allocation2 + $0xb0] sm:$0xf] %v524_v51  ;;  %v1085_v54 = vld [vmem:[#allocation2 + $0x3c] sm:$0xf] }
  0x46   : > { %v707_v47 = vpack.c.bf16 %v675_v38, %v675_v38  ;;  %v527_v18 = vsel %vm5167_vm5, 0, %v526_v10  ;;  %v972_v27 = vrot.slane %v5362_v30, 4 }
  0x47   : > { %4426 = vmatmul.msk.f32.gmra.mxu1 %vm1394_vm8, %v5263_v40  ;;  %v971_v43 = vsel %vm5205_vm7, %v963_v36, %v970_v37  ;;  %v1149_v44 = vsel %vm5167_vm5, %v962_v34, %v1148_v31  ;;  %v610_v4 = vmul.f32 %v5135_v7, %v4546_v59  ;;  %528 = vst [vmem:[#allocation2 + $0xbc] sm:$0xf] %v527_v18  ;;  %v1082_v45 = vld [vmem:[#allocation2 + $0x38] sm:$0x1] }
  0x48   : > { %1150 = vst [vmem:[#allocation2 + $0xa8] sm:$0xf] %v1149_v44  ;;  %v787_v60 = vshrl.u32 %v707_v47, 16 }
  0x49   : > { %v4947_v0 = vld [vmem:[#allocation2 + $0x28] sm:$0xff]   ;;  %1151 = vst.msk [vmem:[#allocation2 + $0xac] sm:$0xf] %vm478_vm3, %v971_v43  ;;  %v645_v16 = vadd.f32 %v5156_v11, %v610_v4 }
  0x4a   : > { %4375 = vmatmul.msk.f32.gmra.mxu0 %vm1394_vm8, %v4606_v49  ;;  %4412 = vmatmul.msk.f32.gmra.mxu3 %vm1394_vm8, %v4679_v50  ;;  %v5352_v5 = vunpack.c.l.bf16 %v4947_v0  ;;  %v5375_v42 = vunpack.c.h.bf16 %v4947_v0  ;;  %v708_v49 = vpack.c.bf16 %v676_v39, %v676_v39  ;;  %v789_v28 = vrot.slane %v787_v60, 7 }
  0x4b   : > { %v677_v29 = vmax.f32 %v645_v16, 0.0 }
  0x4c   : > { %4476 = vmatmul.msk.f32.gmra.mxu2 %vm1394_vm8, %v5335_v3  ;;  %v795_v0 = vshrl.u32 %v708_v49, 16  ;;  %v798_v9 = vshll.u32 %v708_v49, 16  ;;  %v793_v21 = vrot.slane %v789_v28, 4  ;;  %v1152_v30 = vld [vmem:[#allocation2 + $0xb0] sm:$0x1] }
  0x4d   : > { %v709_v36 = vpack.c.bf16 %v677_v29, %v677_v29  ;;  %v1153_v41 = vsel %vm5128_vm2, %v972_v27, %v1152_v30  ;;  %v4547_v27 = vunpack.c.h.bf16 %v5385_v46 }
  0x4e   : > { %v797_v8 = vrot.slane %v795_v0, 7  ;;  %1154 = vst [vmem:[#allocation2 + $0xb0] sm:$0x1] %v1153_v41 }
  0x4f   : > { %4427 = vmatmul.msk.f32.gmra.mxu1 %vm1394_vm8, %v5284_v63  ;;  %v804_v43 = vshrl.u32 %v709_v36, 16  ;;  %v807_v44 = vshll.u32 %v709_v36, 16  ;;  %v611_v29 = vmul.f32 %v5135_v7, %v4547_v27 }
  0x50   : > { %v800_v22 = vor.u32 %v798_v9, %v797_v8  ;;  %v5410_v32 = vld [vmem:[#allocation2 + $0xa8] sm:$0xff]   ;;  %v802_v37 = vrot.slane %v797_v8, 4  ;;  %v1159_v8 = vld [vmem:[#allocation2 + $0xbc] sm:$0x1] }
  0x51   : > { %v5426_v49 = vrot.slane %v804_v43, 7  ;;  %v4687_v56 = vunpack.c.h.bf16 %v5410_v32 }
  0x52   : > { %4376 = vmatmul.msk.f32.gmra.mxu0 %vm1394_vm8, %v4607_v61  ;;  %4413 = vmatmul.msk.f32.gmra.mxu3 %vm1394_vm8, %v4682_v57  ;;  %v790_v61 = vshll.u32 %v707_v47, 16  ;;  %v801_v33 = vsel %vm5205_vm7, %v793_v21, %v800_v22  ;;  %v1083_v51 = vsel %vm5128_vm2, %v802_v37, %v1082_v45 }
  0x53   : > { %1081 = vst.msk [vmem:[#allocation2 + $0x34] sm:$0xf] %vm478_vm3, %v801_v33  ;;  %v809_v60 = vor.u32 %v807_v44, %v5426_v49  ;;  %v496_v33 = vld [vmem:[#allocation2 + $0x44] sm:$0xf] }
  0x54   : > { %4477 = vmatmul.msk.f32.gmra.mxu2 %vm1394_vm8, %v5352_v5  ;;  %v792_v20 = vor.u32 %v790_v61, %v789_v28  ;;  %1084 = vst [vmem:[#allocation2 + $0x38] sm:$0x1] %v1083_v51 }
  0x55   : > { %v1086_v2 = vsel %vm5167_vm5, %v809_v60, %v1085_v54 }
  0x56   : > { %v1079_v58 = vsel %vm5167_vm5, %v792_v20, %v1078_v14  ;;  %1087 = vst [vmem:[#allocation2 + $0x3c] sm:$0xf] %v1086_v2 }
  0x57   : > { %4428 = vmatmul.msk.f32.gmra.mxu1 %vm1394_vm8, %v5320_v48  ;;  %1080 = vst [vmem:[#allocation2 + $0x30] sm:$0xf] %v1079_v58 }
  0x5a   : > { %4377 = vmatmul.msk.f32.gmra.mxu0 %vm1394_vm8, %v4698_v62  ;;  %4414 = vmatmul.msk.f32.gmra.mxu3 %vm1394_vm8, %v4683_v23  ;;  %v4898_v62 = vld [vmem:[%s5151_s18 + $0x70] sm:$0xff]  }
  0x5b   : > { %v4586_v52 = vunpack.c.l.bf16 %v4898_v62  ;;  %v4587_v12 = vunpack.c.h.bf16 %v4898_v62 }
  0x5c   : > { %4478 = vmatmul.msk.f32.gmra.mxu2 %vm1394_vm8, %v5375_v42 }
  0x5d   : > { %v630_v1 = vmul.f32 %v5135_v7, %v4586_v52  ;;  %v631_v31 = vmul.f32 %v5135_v7, %v4587_v12  ;;  %v1155_v52 = vld [vmem:[#allocation2 + $0xb4] sm:$0xf] }
  0x5e   : > { %v4948_v9 = vld [vmem:[#allocation2 + $0x30] sm:$0xff]  }
  0x5f   : > { %4429 = vmatmul.msk.f32.gmra.mxu1 %vm1394_vm8, %v5335_v3  ;;  %v665_v15 = vadd.f32 %v5156_v11, %v630_v1  ;;  %v666_v38 = vadd.f32 %v5156_v11, %v631_v31  ;;  %v4802_v4 = vunpack.c.l.bf16 %v4948_v9  ;;  %v4803_v16 = vunpack.c.h.bf16 %v4948_v9 }
  0x60   : > { %v646_v31 = vadd.f32 %v5156_v11, %v611_v29 }
  0x61   : > { %v697_v26 = vmax.f32 %v665_v15, 0.0  ;;  %v698_v62 = vmax.f32 %v666_v38, 0.0  ;;  %v810_v38 = vrot.slane %v5426_v49, 4 }
  0x62   : > { %4378 = vmatmul.msk.f32.gmra.mxu0 %vm1394_vm8, %v4699_v24  ;;  %v4686_v24 = vunpack.c.l.bf16 %v5410_v32  ;;  %v678_v58 = vmax.f32 %v646_v31, 0.0 }
  0x63   : > { %v729_v34 = vpack.c.bf16 %v697_v26, %v697_v26  ;;  %v730_v55 = vpack.c.bf16 %v698_v62, %v698_v62 }
  0x64   : > { %4415 = vmatmul.msk.f32.gmra.mxu3 %vm1394_vm8, %v4686_v24  ;;  %4479 = vmatmul.msk.f32.gmra.mxu2 %vm1394_vm8, %v4802_v4 }
  0x65   : > { %v974_v39 = vshrl.u32 %v729_v34, 16  ;;  %v977_v19 = vshll.u32 %v729_v34, 16  ;;  %v982_v61 = vshrl.u32 %v730_v55, 16  ;;  %v985_v0 = vshll.u32 %v730_v55, 16 }
  0x66   : > { %v710_v34 = vpack.c.bf16 %v678_v58, %v678_v58 }
  0x67   : > { %4430 = vmatmul.msk.f32.gmra.mxu1 %vm1394_vm8, %v5352_v5  ;;  %v976_v47 = vrot.slane %v974_v39, 7  ;;  %v984_v28 = vrot.slane %v982_v61, 7 }
  0x68   : > { %v812_v36 = vshrl.u32 %v710_v34, 16  ;;  %v815_v30 = vshll.u32 %v710_v34, 16 }
  0x69   : > { %v979_v59 = vor.u32 %v977_v19, %v976_v47  ;;  %v987_v10 = vor.u32 %v985_v0, %v984_v28  ;;  %v989_v12 = vrot.slane %v984_v28, 4 }
  0x6a   : > { %4379 = vmatmul.msk.f32.gmra.mxu0 %vm1394_vm8, %v5263_v40  ;;  %v980_v40 = vrot.slane %v976_v47, 4  ;;  %v814_v37 = vrot.slane %v812_v36, 7  ;;  %v5569_v36 = vld [vmem:[%s7466_s3] ss:$0 sm:$0xff] }
  0x6b   : > { %v1156_v1 = vsel %vm5167_vm5, %v979_v59, %v1155_v52  ;;  %v1160_v15 = vsel %vm5128_vm2, %v989_v12, %v1159_v8 }
  0x6c   : > { %1157 = vst [vmem:[#allocation2 + $0xb4] sm:$0xf] %v1156_v1  ;;  %4416 = vmatmul.msk.f32.gmra.mxu3 %vm1394_vm8, %v4687_v56  ;;  %v988_v14 = vsel %vm5205_vm7, %v980_v40, %v987_v10  ;;  %4480 = vmatmul.msk.f32.gmra.mxu2 %vm1394_vm8, %v4803_v16  ;;  %v817_v39 = vor.u32 %v815_v30, %v814_v37  ;;  %v819_v19 = vrot.slane %v814_v37, 4 }
  0x6d   : > { %1158 = vst.msk [vmem:[#allocation2 + $0xb8] sm:$0xf] %vm478_vm3, %v988_v14 }
  0x6e   : > { %1161 = vst [vmem:[#allocation2 + $0xbc] sm:$0x1] %v1160_v15 }
  0x6f   : > { %4431 = vmatmul.msk.f32.gmra.mxu1 %vm1394_vm8, %v5375_v42 }
  0x72   : > { %4380 = vmatmul.msk.f32.gmra.mxu0 %vm1394_vm8, %v5284_v63  ;;  %v4949_v63 = vld [vmem:[#allocation2 + $0x38] sm:$0xff]  }
  0x73   : > { %v5451_v18 = vld [vmem:[#allocation2 + $0xb0] sm:$0xff]   ;;  %v4806_v21 = vunpack.c.l.bf16 %v4949_v63  ;;  %v4807_v46 = vunpack.c.h.bf16 %v4949_v63 }
  0x74   : > { %v4690_v20 = vunpack.c.l.bf16 %v5451_v18  ;;  %v4691_v22 = vunpack.c.h.bf16 %v5451_v18 }
  0x75   : > { %4481 = vmatmul.msk.f32.gmra.mxu2 %vm1394_vm8, %v4806_v21  ;;  %v5466_v26 = vld [vmem:[#allocation2 + $0xb8] sm:$0xff]  }
  0x76   : > { %4417 = vmatmul.msk.f32.gmra.mxu3 %vm1394_vm8, %v4690_v20  ;;  %v4695_v44 = vunpack.c.h.bf16 %v5466_v26 }
  0x77   : > { %4432 = vmatmul.msk.f32.gmra.mxu1 %vm1394_vm8, %v4802_v4 }
  0x7a   : > { %4381 = vmatmul.msk.f32.gmra.mxu0 %vm1394_vm8, %v5320_v48  ;;  %v4694_v48 = vunpack.c.l.bf16 %v5466_v26 }
  0x7d   : > { %4482 = vmatmul.msk.f32.gmra.mxu2 %vm1394_vm8, %v4807_v46 }
  0x7e   : > { %4418 = vmatmul.msk.f32.gmra.mxu3 %vm1394_vm8, %v4691_v22 }
  0x7f   : > { %4433 = vmatmul.msk.f32.gmra.mxu1 %vm1394_vm8, %v4803_v16 }
  0x82   : > { %4382 = vmatmul.msk.f32.gmra.mxu0 %vm1394_vm8, %v5335_v3  ;;  %v497_v3 = vsel %vm5167_vm5, 0, %v496_v33  ;;  %v5554_v33 = vld [vmem:[%s5151_s18 + $0x30] sm:$0xff]  }
  0x83   : > { %498 = vst [vmem:[#allocation2 + $0x44] sm:$0xf] %v497_v3 }
  0x86   : > { %4419 = vmatmul.msk.f32.gmra.mxu3 %vm1394_vm8, %v4694_v48 }
  0x87   : > { %4434 = vmatmul.msk.f32.gmra.mxu1 %vm1394_vm8, %v4806_v21 }
  0x8a   : > { %4383 = vmatmul.msk.f32.gmra.mxu0 %vm1394_vm8, %v5352_v5  ;;  %v1089_v41 = vld [vmem:[#allocation2 + $0x44] sm:$0x1]  ;;  %v818_v5 = vsel %vm5205_vm7, %v810_v38, %v817_v39 }
  0x8b   : > { %v1090_v43 = vsel %vm5128_vm2, %v819_v19, %v1089_v41  ;;  %1088 = vst.msk [vmem:[#allocation2 + $0x40] sm:$0xf] %vm478_vm3, %v818_v5  ;;  %v5581_v41 = vld [vmem:[%s7467_s4] ss:$0 sm:$0xff] }
  0x8c   : > { %1091 = vst [vmem:[#allocation2 + $0x44] sm:$0x1] %v1090_v43 }
  0x8e   : > { %4420 = vmatmul.msk.f32.gmra.mxu3 %vm1394_vm8, %v4695_v44 }
  0x8f   : > { %4435 = vmatmul.msk.f32.gmra.mxu1 %vm1394_vm8, %v4807_v46 }
  0x92   : > { %4384 = vmatmul.msk.f32.gmra.mxu0 %vm1394_vm8, %v5375_v42  ;;  %v4889_v42 = vld [vmem:[%s5151_s18 + $0x28] sm:$0xff]  }
  0x93   : > { %v4950_v45 = vld [vmem:[#allocation2 + $0x40] sm:$0xff]   ;;  %v4550_v49 = vunpack.c.l.bf16 %v4889_v42  ;;  %v4551_v51 = vunpack.c.h.bf16 %v4889_v42 }
  0x94   : > { %v4810_v62 = vunpack.c.l.bf16 %v4950_v45  ;;  %v5515_v55 = vunpack.c.h.bf16 %v4950_v45 }
  0x95   : > { %v612_v52 = vmul.f32 %v5135_v7, %v4550_v49  ;;  %v613_v54 = vmul.f32 %v5135_v7, %v4551_v51  ;;  %v445_v51 = vld [vmem:[#allocation2 + $0x54] sm:$0x1] }
  0x96   : > { %4483 = vmatmul.msk.f32.gmra.mxu2 %vm1394_vm8, %v4810_v62  ;;  %4459 = vmatmul.msk.f32.vlgmr.msrb.gmra.mxu3 %vm1394_vm8, %v4679_v50  ;;  %v446_v32 = vsel %vm5128_vm2, 0, %v445_v51 }
  0x97   : > { %4436 = vmatmul.msk.f32.gmra.mxu1 %vm1394_vm8, %v4810_v62  ;;  %v647_v35 = vadd.f32 %v5156_v11, %v612_v52  ;;  %v648_v50 = vadd.f32 %v5156_v11, %v613_v54  ;;  %v499_v52 = vld [vmem:[#allocation2 + $0x50] sm:$0xf]  ;;  %447 = vst [vmem:[#allocation2 + $0x54] sm:$0x1] %v446_v32 }
  0x99   : > { %v679_v59 = vmax.f32 %v647_v35, 0.0  ;;  %v680_v60 = vmax.f32 %v648_v50, 0.0 }
  0x9a   : > { %4385 = vmatmul.msk.f32.gmra.mxu0 %vm1394_vm8, %v4802_v4 }
  0x9b   : > { %v711_v7 = vpack.c.bf16 %v679_v59, %v679_v59  ;;  %v712_v11 = vpack.c.bf16 %v680_v60, %v680_v60 }
  0x9d   : > { %v821_v9 = vshrl.u32 %v711_v7, 16  ;;  %v829_v1 = vshrl.u32 %v712_v11, 16  ;;  %v824_v12 = vshll.u32 %v711_v7, 16  ;;  %v832_v15 = vshll.u32 %v712_v11, 16 }
  0x9e   : > { %4460 = vmatmul.msk.f32.gmra.mxu3 %vm1394_vm8, %v4682_v57  ;;  %v442_v57 = vld [vmem:[#allocation2 + $0x48] sm:$0x1]  ;;  %4484 = vmatmul.msk.f32.gmra.mxu2 %vm1394_vm8, %v5515_v55 }
  0x9f   : > { %v443_v61 = vsel %vm5128_vm2, 0, %v442_v57  ;;  %4437 = vmatmul.msk.f32.gmra.mxu1 %vm1394_vm8, %v5515_v55  ;;  %v823_v10 = vrot.slane %v821_v9, 7  ;;  %v5539_v14 = vrot.slane %v829_v1, 7 }
  0xa0   : > { %444 = vst [vmem:[#allocation2 + $0x48] sm:$0x1] %v443_v61 }
  0xa1   : > { %v827_v27 = vrot.slane %v823_v10, 4  ;;  %v834_v29 = vor.u32 %v832_v15, %v5539_v14 }
  0xa2   : > { %4386 = vmatmul.msk.f32.gmra.mxu0 %vm1394_vm8, %v4803_v16 }
  0xa3   : > { %v835_v58 = vsel %vm5205_vm7, %v827_v27, %v834_v29  ;;  %v1099_v29 = vld [vmem:[#allocation2 + $0x54] sm:$0xf] }
  0xa4   : > { %1095 = vst.msk [vmem:[#allocation2 + $0x4c] sm:$0xf] %vm478_vm3, %v835_v58 }
  0xa6   : > { %4461 = vmatmul.msk.f32.gmra.mxu3 %vm1394_vm8, %v4683_v23 }
  0xa7   : > { %v1092_v31 = vld [vmem:[#allocation2 + $0x48] sm:$0xf] }
  0xaa   : > { %4387 = vmatmul.msk.f32.gmra.mxu0 %vm1394_vm8, %v4806_v21  ;;  %v5509_v47 = vpop.f32.mrf.mxu1  ;;  %v826_v21 = vor.u32 %v824_v12, %v823_v10 }
  0xab   : > { %7540 = vst [vmem:[#allocation3_spill] sm:$0xff] %v5509_v47  ;;  %v2890_v2 = vrot.slane %v5509_v47, 2  ;;  %v2682_v40 = vrot.slane %v5509_v47, 1 }
  0xac   : > { %v1093_v3 = vsel %vm5167_vm5, %v826_v21, %v1092_v31 }
  0xad   : > { %1094 = vst [vmem:[#allocation2 + $0x48] sm:$0xf] %v1093_v3 }
  0xae   : > { %4462 = vmatmul.msk.f32.gmra.mxu3 %vm1394_vm8, %v4686_v24  ;;  %v4554_v24 = vunpack.c.l.bf16 %v5554_v33 }
  0xb0   : > { %v614_v37 = vmul.f32 %v5569_v36, %v4554_v24 }
  0xb2   : > { %4388 = vmatmul.msk.f32.gmra.mxu0 %vm1394_vm8, %v4807_v46  ;;  %v5527_v53 = vpop.f32.mrf.mxu3  ;;  %v649_v5 = vadd.f32 %v5581_v41, %v614_v37 }
  0xb3   : > { %v1841_v11 = vrot.slane %v5527_v53, 1  ;;  %v2050_v9 = vrot.slane %v5527_v53, 2 }
  0xb4   : > { %v5529_v23 = vpop.f32.mrf.mxu1  ;;  %v5531_v0 = vpop.f32.mrf.mxu2  ;;  %v681_v54 = vmax.f32 %v649_v5, 0.0  ;;  %v4951_v60 = vld [vmem:[#allocation2 + $0x48] sm:$0xff]  }
  0xb5   : > { %7541 = vst [vmem:[#allocation4_spill] sm:$0xff] %v5529_v23  ;;  %v2891_v4 = vrot.slane %v5529_v23, 2  ;;  %v2683_v28 = vrot.slane %v5529_v23, 1  ;;  %v3791_v46 = vrot.slane %v5531_v0, 2  ;;  %v4814_v61 = vunpack.c.l.bf16 %v4951_v60 }
  0xb6   : > { %7542 = vst [vmem:[#allocation5_spill] sm:$0xff] %v5531_v0  ;;  %4463 = vmatmul.msk.f32.gmra.mxu3 %vm1394_vm8, %v4687_v56  ;;  %v500_v56 = vsel %vm5167_vm5, 0, %v499_v52  ;;  %v713_v57 = vpack.c.bf16 %v681_v54, %v681_v54  ;;  %v4815_v3 = vunpack.c.h.bf16 %v4951_v60 }
  0xb7   : > { %v5537_v8 = vpop.f32.mrf.mxu0  ;;  %v2892_v16 = vsel %vm1989_vm9, %v2890_v2, %v2891_v4  ;;  %v2684_v63 = vsel %vm1780_vm10, %v2682_v40, %v2683_v28  ;;  %501 = vst [vmem:[#allocation2 + $0x50] sm:$0xf] %v500_v56  ;;  %4485 = vmatmul.msk.f32.gmra.mxu2 %vm1394_vm8, %v4814_v61  ;;  %4438 = vmatmul.msk.f32.gmra.mxu1 %vm1394_vm8, %v4814_v61 }
  0xb8   : > { %7543 = vst [vmem:[#allocation6_spill] sm:$0xff] %v5537_v8  ;;  %2970 = vrot.lane.b32.xlu0 %v2892_v16, %s5043_s28  ;;  %2762 = vrot.lane.b32.xlu1 %v2684_v63, %s5044_s29  ;;  %v1781_v38 = vrot.slane %v5537_v8, 1  ;;  %v1990_v45 = vrot.slane %v5537_v8, 2  ;;  %v838_v7 = vshrl.u32 %v713_v57, 16  ;;  %v841_v12 = vshll.u32 %v713_v57, 16 }
  0xb9   : > { %v836_v16 = vrot.slane %v5539_v14, 4 }
  0xba   : > { %4389 = vmatmul.msk.f32.gmra.mxu0 %vm1394_vm8, %v4810_v62  ;;  %v5576_v19 = vpop.f32.mrf.mxu3  ;;  %v5616_v10 = vrot.slane %v838_v7, 7 }
  0xbb   : > { %v1842_v1 = vrot.slane %v5576_v19, 1  ;;  %v2051_v2 = vrot.slane %v5576_v19, 2 }
  0xbc   : > { %v5563_v34 = vpop.f32.mrf.mxu2  ;;  %v5593_v49 = vpop.f32.mrf.mxu1  ;;  %v843_v63 = vor.u32 %v841_v12, %v5616_v10 }
  0xbd   : > { %7544 = vst [vmem:[#allocation7_spill] sm:$0xff] %v5563_v34  ;;  %v3792_v30 = vrot.slane %v5563_v34, 2  ;;  %v2893_v59 = vrot.slane %v5593_v49, 2  ;;  %v2052_v21 = vsel %vm1989_vm9, %v2050_v9, %v2051_v2  ;;  %v1843_v27 = vsel %vm1780_vm10, %v1841_v11, %v1842_v1 }
  0xbe   : > { %4464 = vmatmul.msk.f32.gmra.mxu3 %vm1394_vm8, %v4690_v20  ;;  %v1096_v20 = vld [vmem:[#allocation2 + $0x50] sm:$0x1]  ;;  %v1100_v31 = vsel %vm5167_vm5, %v843_v63, %v1099_v29  ;;  %v3584_v14 = vrot.slane %v5563_v34, 1  ;;  %v2685_v18 = vrot.slane %v5593_v49, 1 }
  0xbf   : > { %v5574_v39 = vpop.f32.mrf.mxu0  ;;  %v3793_v42 = vsel %vm1989_vm9, %v3791_v46, %v3792_v30  ;;  %v1097_v24 = vsel %vm5128_vm2, %v836_v16, %v1096_v20  ;;  %1101 = vst [vmem:[#allocation2 + $0x54] sm:$0xf] %v1100_v31  ;;  %4486 = vmatmul.msk.f32.gmra.mxu2 %vm1394_vm8, %v4815_v3  ;;  %4439 = vmatmul.msk.f32.gmra.mxu1 %vm1394_vm8, %v4815_v3 }
  0xc0   : > { %7545 = vst [vmem:[#allocation8_spill] sm:$0xff] %v5574_v39  ;;  %v1782_v43 = vrot.slane %v5574_v39, 1  ;;  %v1991_v62 = vrot.slane %v5574_v39, 2  ;;  %3871 = vrot.lane.b32.xlu1 %v3793_v42, %s5043_s28  ;;  %v2686_v49 = vsel %vm1780_vm10, %v2683_v28, %v2685_v18 }
  0xc1   : > { %1098 = vst [vmem:[#allocation2 + $0x50] sm:$0x1] %v1097_v24 }
  0xc2   : > { %v1992_v35 = vsel %vm1989_vm9, %v1990_v45, %v1991_v62  ;;  %v1783_v50 = vsel %vm1780_vm10, %v1781_v38, %v1782_v43  ;;  %4390 = vmatmul.msk.f32.gmra.mxu0 %vm1394_vm8, %v5515_v55  ;;  %v2894_v55 = vsel %vm1989_vm9, %v2891_v4, %v2893_v59  ;;  %v3583_v4 = vrot.slane %v5531_v0, 1 }
  0xc3   : > { %2070 = vrot.lane.b32.xlu2 %v1992_v35, %s5043_s28  ;;  %1861 = vrot.lane.b32.xlu0 %v1783_v50, %s5044_s29  ;;  %v4555_v59 = vunpack.c.h.bf16 %v5554_v33 }
  0xc4   : > { %v3585_v38 = vsel %vm1780_vm10, %v3583_v4, %v3584_v14  ;;  %v5669_v35 = vpop.f32.mrf.mxu1 }
  0xc5   : > { %v5625_v15 = vpop.f32.mrf.mxu3  ;;  %7548 = vst [vmem:[#allocation11_spill] sm:$0xff] %v5669_v35  ;;  %v2895_v16 = vrot.slane %v5669_v35, 2 }
  0xc6   : > { %v1844_v58 = vrot.slane %v5625_v15, 1  ;;  %4465 = vmatmul.msk.f32.gmra.mxu3 %vm1394_vm8, %v4691_v22  ;;  %v2053_v60 = vrot.slane %v5625_v15, 2 }
  0xc7   : > { %v1562_v40 = vpop.f32.mrf.mxu0 }
  0xc8   : > { %2972 = vrot.lane.b32.xlu1 %v2894_v55, %s5043_s28  ;;  %v1784_v46 = vrot.slane %v1562_v40, 1  ;;  %v1845_v5 = vsel %vm1780_vm10, %v1842_v1, %v1844_v58  ;;  %v5661_v42 = vld [vmem:[#allocation2 + $0x50] sm:$0xff]   ;;  %v1993_v52 = vrot.slane %v1562_v40, 2  ;;  %v502_v1 = vld [vmem:[#allocation2 + $0x5c] sm:$0xf]  ;;  %v2054_v55 = vsel %vm1989_vm9, %v2051_v2, %v2053_v60 }
  0xc9   : > { %v4818_v51 = vunpack.c.l.bf16 %v5661_v42  ;;  %v503_v26 = vsel %vm5167_vm5, 0, %v502_v1  ;;  %v844_v58 = vrot.slane %v5616_v10, 4  ;;  %v4819_v10 = vunpack.c.h.bf16 %v5661_v42 }
  0xca   : > { %4391 = vmatmul.msk.f32.gmra.mxu0 %vm1394_vm8, %v4814_v61  ;;  %v1785_v45 = vsel %vm1780_vm10, %v1782_v43, %v1784_v46  ;;  %v3365_v43 = vpop.f32.mrf.mxu2  ;;  %v1994_v56 = vsel %vm1989_vm9, %v1991_v62, %v1993_v52  ;;  %v615_v62 = vmul.f32 %v5569_v36, %v4555_v59  ;;  %504 = vst [vmem:[#allocation2 + $0x5c] sm:$0xf] %v503_v26 }
  0xcb   : > { %2118 = vrot.lane.b32.xlu2 %v2052_v21, %s5043_s28  ;;  %1909 = vrot.lane.b32.xlu0 %v1843_v27, %s5044_s29  ;;  %v3794_v61 = vrot.slane %v3365_v43, 2  ;;  %v3586_v21 = vrot.slane %v3365_v43, 1  ;;  %v2687_v43 = vrot.slane %v5669_v35, 1 }
  0xcc   : > { %4487 = vmatmul.msk.f32.gmra.mxu2 %vm1394_vm8, %v4818_v51  ;;  %4440 = vmatmul.msk.f32.gmra.mxu1 %vm1394_vm8, %v4818_v51  ;;  %v650_v7 = vadd.f32 %v5581_v41, %v615_v62  ;;  %v5706_v9 = vpop.f32.mrf.mxu1 }
  0xcd   : > { %v5674_v32 = vpop.f32.mrf.mxu3  ;;  %7550 = vst [vmem:[#allocation13_spill] sm:$0xff] %v5706_v9  ;;  %v3795_v12 = vsel %vm1989_vm9, %v3792_v30, %v3794_v61  ;;  %v2896_v30 = vrot.slane %v5706_v9, 2 }
  0xce   : > { %4466 = vmatmul.msk.f32.gmra.mxu3 %vm1394_vm8, %v4694_v48  ;;  %v682_v40 = vmax.f32 %v650_v7, 0.0  ;;  %v2055_v63 = vrot.slane %v5674_v32, 2 }
  0xcf   : > { %v5644_v37 = vpop.f32.mrf.mxu0  ;;  %v2897_v4 = vsel %vm1989_vm9, %v2895_v16, %v2896_v30 }
  0xd0   : > { %7546 = vst [vmem:[#allocation9_spill] sm:$0xff] %v5644_v37  ;;  %1911 = vrot.lane.b32.xlu1 %v1845_v5, %s5044_s29  ;;  %v1786_v22 = vrot.slane %v5644_v37, 1  ;;  %v1995_v48 = vrot.slane %v5644_v37, 2 }
  0xd1   : > { %v1103_v5 = vld [vmem:[#allocation2 + $0x5c] sm:$0x1] }
  0xd2   : > { %4392 = vmatmul.msk.f32.gmra.mxu0 %vm1394_vm8, %v4815_v3  ;;  %v5698_v11 = vpop.f32.mrf.mxu2  ;;  %v3587_v3 = vsel %vm1780_vm10, %v3584_v14, %v3586_v21 }
  0xd3   : > { %3663 = vrot.lane.b32.xlu2 %v3585_v38, %s5044_s29  ;;  %1863 = vrot.lane.b32.xlu0 %v1785_v45, %s5044_s29  ;;  %7549 = vst [vmem:[#allocation12_spill] sm:$0xff] %v5698_v11  ;;  %v1846_v45 = vrot.slane %v5674_v32, 1  ;;  %v3588_v52 = vrot.slane %v5698_v11, 1  ;;  %v3796_v60 = vrot.slane %v5698_v11, 2 }
  0xd4   : > { %4488 = vmatmul.msk.f32.gmra.mxu2 %vm1394_vm8, %v4819_v10  ;;  %4441 = vmatmul.msk.f32.gmra.mxu1 %vm1394_vm8, %v4819_v10 }
  0xd5   : > { %v5714_v15 = vpop.f32.mrf.mxu3 }
  0xd6   : > { %4467 = vmatmul.msk.f32.gmra.mxu3 %vm1394_vm8, %v4695_v44  ;;  %7551 = vst [vmem:[#allocation14_spill] sm:$0xff] %v5714_v15  ;;  %v714_v44 = vpack.c.bf16 %v682_v40, %v682_v40  ;;  %v2056_v2 = vrot.slane %v5714_v15, 2 }
  0xd7   : > { %v5667_v54 = vpop.f32.mrf.mxu0 }
  0xd8   : > { %7547 = vst [vmem:[#allocation10_spill] sm:$0xff] %v5667_v54  ;;  %v1787_v50 = vrot.slane %v5667_v54, 1  ;;  %v1996_v28 = vrot.slane %v5667_v54, 2  ;;  %v846_v27 = vshrl.u32 %v714_v44, 16  ;;  %v849_v29 = vshll.u32 %v714_v44, 16 }
  0xd9   : > { %v2057_v31 = vsel %vm1989_vm9, %v2055_v63, %v2056_v2 }
  0xda   : > { %v1788_v57 = vsel %vm1780_vm10, %v1786_v22, %v1787_v50  ;;  %4393 = vmatmul.msk.f32.gmra.mxu0 %vm1394_vm8, %v4818_v51  ;;  %v1997_v33 = vsel %vm1989_vm9, %v1995_v48, %v1996_v28  ;;  %v848_v20 = vrot.slane %v846_v27, 7  ;;  %v5733_v24 = vpop.f32.mrf.mxu2  ;;  %v1847_v51 = vrot.slane %v5714_v15, 1  ;;  %v2473_v48 = vpop.f32.mrf.mxu1 }
  0xdb   : > { %2764 = vrot.lane.b32.xlu2 %v2686_v49, %s5044_s29  ;;  %2072 = vrot.lane.b32.xlu0 %v1994_v56, %s5043_s28  ;;  %7552 = vst [vmem:[#allocation15_spill] sm:$0xff] %v5733_v24  ;;  %v3589_v22 = vrot.slane %v5733_v24, 1  ;;  %v2688_v49 = vrot.slane %v5706_v9, 1  ;;  %v3797_v7 = vrot.slane %v5733_v24, 2  ;;  %v2690_v1 = vrot.slane %v2473_v48, 1 }
  0xdc   : > { %1865 = vrot.lane.b32.xlu1 %v1788_v57, %s5044_s29  ;;  %v851_v46 = vor.u32 %v849_v29, %v848_v20  ;;  %v853_v38 = vrot.slane %v848_v20, 4  ;;  %v1848_v42 = vsel %vm1780_vm10, %v1846_v45, %v1847_v51  ;;  %v2898_v63 = vrot.slane %v2473_v48, 2 }
  0xdd   : > { %v3590_v56 = vsel %vm1780_vm10, %v3588_v52, %v3589_v22  ;;  %v2689_v57 = vsel %vm1780_vm10, %v2687_v43, %v2688_v49  ;;  %v1679_v40 = vpop.f32.mrf.mxu3  ;;  %v2691_v26 = vsel %vm1780_vm10, %v2688_v49, %v2690_v1 }
  0xde   : > { %v852_v14 = vsel %vm5205_vm7, %v844_v58, %v851_v46  ;;  %v1104_v18 = vsel %vm5128_vm2, %v853_v38, %v1103_v5  ;;  %v2058_v44 = vrot.slane %v1679_v40, 2  ;;  %v1849_v46 = vrot.slane %v1679_v40, 1 }
  0xdf   : > { %1102 = vst.msk [vmem:[#allocation2 + $0x58] sm:$0xf] %vm478_vm3, %v852_v14  ;;  %v1571_v59 = vpop.f32.mrf.mxu0 }
  0xe0   : > { %1105 = vst [vmem:[#allocation2 + $0x5c] sm:$0x1] %v1104_v18  ;;  %v1998_v61 = vrot.slane %v1571_v59, 2  ;;  %v1789_v27 = vrot.slane %v1571_v59, 1  ;;  %v1850_v49 = vsel %vm1780_vm10, %v1847_v51, %v1849_v46 }
  0xe2   : > { %4394 = vmatmul.msk.f32.gmra.mxu0 %vm1394_vm8, %v4819_v10  ;;  %v5776_v21 = vpop.f32.mrf.mxu1  ;;  %v3374_v20 = vpop.f32.mrf.mxu2  ;;  %v4899_v10 = vld [vmem:[%s5151_s18 + $0x78] sm:$0xff]  }
  0xe3   : > { %3873 = vrot.lane.b32.xlu2 %v3795_v12, %s5043_s28  ;;  %2120 = vrot.lane.b32.xlu0 %v2054_v55, %s5043_s28  ;;  %v1999_v12 = vsel %vm1989_vm9, %v1996_v28, %v1998_v61  ;;  %v3798_v55 = vsel %vm1989_vm9, %v3796_v60, %v3797_v7  ;;  %7553 = vst [vmem:[#allocation16_spill] sm:$0xff] %v5776_v21  ;;  %v3591_v45 = vrot.slane %v3374_v20, 1  ;;  %v4590_v18 = vunpack.c.l.bf16 %v4899_v10 }
  0xe4   : > { %2074 = vrot.lane.b32.xlu1 %v1997_v33, %s5043_s28  ;;  %v2059_v28 = vsel %vm1989_vm9, %v2056_v2, %v2058_v44  ;;  %v1790_v2 = vsel %vm1780_vm10, %v1787_v50, %v1789_v27  ;;  %v4591_v52 = vunpack.c.h.bf16 %v4899_v10  ;;  %v3799_v43 = vrot.slane %v3374_v20, 2  ;;  %v448_v50 = vld [vmem:[#allocation2 + $0x60] sm:$0x1] }
  0xe5   : > { %v632_v60 = vmul.f32 %v5569_v36, %v4590_v18  ;;  %v3592_v51 = vsel %vm1780_vm10, %v3589_v22, %v3591_v45 }
  0xe6   : > { %v633_v61 = vmul.f32 %v5569_v36, %v4591_v52 }
  0xe7   : > { %v4953_v62 = vld [vmem:[#allocation2 + $0x58] sm:$0xff]   ;;  %v5778_v29 = vpop.f32.mrf.mxu0  ;;  %v5803_v59 = vpop.f32.mrf.mxu3  ;;  %v667_v44 = vadd.f32 %v5581_v41, %v632_v60 }
  0xe8   : > { %v4822_v33 = vunpack.c.l.bf16 %v4953_v62  ;;  %v4823_v16 = vunpack.c.h.bf16 %v4953_v62  ;;  %7554 = vst [vmem:[#allocation17_spill] sm:$0xff] %v5778_v29  ;;  %v449_v62 = vsel %vm5128_vm2, 0, %v448_v50 }
  0xe9   : > { %450 = vst [vmem:[#allocation2 + $0x60] sm:$0x1] %v449_v62 }
  0xea   : > { %4489 = vmatmul.msk.f32.gmra.mxu2 %vm1394_vm8, %v4822_v33  ;;  %4442 = vmatmul.msk.f32.gmra.mxu1 %vm1394_vm8, %v4822_v33  ;;  %v5805_v48 = vpop.f32.mrf.mxu1 }
  0xeb   : > { %2974 = vrot.lane.b32.xlu2 %v2897_v4, %s5043_s28  ;;  %3665 = vrot.lane.b32.xlu0 %v3587_v3, %s5044_s29  ;;  %v4891_v4 = vld [vmem:[%s5151_s18 + $0x38] sm:$0xff]   ;;  %v2899_v3 = vsel %vm1989_vm9, %v2896_v30, %v2898_v63  ;;  %7555 = vst [vmem:[#allocation18_spill] sm:$0xff] %v5805_v48  ;;  %v2693_v63 = vrot.slane %v5805_v48, 1  ;;  %v2901_v27 = vrot.slane %v5805_v48, 2 }
  0xec   : > { %2122 = vrot.lane.b32.xlu1 %v2057_v31, %s5043_s28  ;;  %4395 = vmatmul.msk.f32.gmra.mxu0 %vm1394_vm8, %v4822_v33  ;;  %v4558_v31 = vunpack.c.l.bf16 %v4891_v4  ;;  %v4559_v58 = vunpack.c.h.bf16 %v4891_v4  ;;  %v2900_v33 = vrot.slane %v5776_v21, 2  ;;  %v472_v4 = vld [vmem:[#allocation2 + $0xc0] sm:$0x1] }
  0xee   : > { %v616_v38 = vmul.f32 %v5569_v36, %v4558_v31  ;;  %v617_v5 = vmul.f32 %v5569_v36, %v4559_v58  ;;  %v699_v31 = vmax.f32 %v667_v44, 0.0 }
  0xef   : > { %v5812_v1 = vpop.f32.mrf.mxu0 }
  0xf0   : > { %v651_v14 = vadd.f32 %v5581_v41, %v616_v38  ;;  %v652_v30 = vadd.f32 %v5581_v41, %v617_v5  ;;  %7556 = vst [vmem:[#allocation19_spill] sm:$0xff] %v5812_v1  ;;  %v2001_v20 = vrot.slane %v5812_v1, 2  ;;  %v731_v18 = vpack.c.bf16 %v699_v31, %v699_v31 }
  0xf2   : > { %4490 = vmatmul.msk.f32.gmra.mxu2 %vm1394_vm8, %v4823_v16  ;;  %4443 = vmatmul.msk.f32.gmra.mxu1 %vm1394_vm8, %v4823_v16  ;;  %v991_v62 = vshrl.u32 %v731_v18, 16  ;;  %v994_v60 = vshll.u32 %v731_v18, 16 }
  0xf3   : > { %1913 = vrot.lane.b32.xlu2 %v1848_v42, %s5044_s29  ;;  %2766 = vrot.lane.b32.xlu0 %v2689_v57, %s5044_s29  ;;  %v683_v42 = vmax.f32 %v651_v14, 0.0  ;;  %v2692_v57 = vrot.slane %v5776_v21, 1 }
  0xf4   : > { %3667 = vrot.lane.b32.xlu1 %v3590_v56, %s5044_s29  ;;  %4396 = vmatmul.msk.f32.gmra.mxu0 %vm1394_vm8, %v4823_v16  ;;  %v684_v56 = vmax.f32 %v652_v30, 0.0  ;;  %v668_v16 = vadd.f32 %v5581_v41, %v633_v61  ;;  %v1106_v30 = vld [vmem:[#allocation2 + $0x60] sm:$0xf] }
  0xf5   : > { %v715_v40 = vpack.c.bf16 %v683_v42, %v683_v42  ;;  %v2694_v10 = vsel %vm1780_vm10, %v2692_v57, %v2693_v63 }
  0xf6   : > { %v700_v58 = vmax.f32 %v668_v16, 0.0  ;;  %v1792_v16 = vrot.slane %v5812_v1, 1 }
  0xf7   : > { %v855_v22 = vshrl.u32 %v715_v40, 16  ;;  %v858_v46 = vshll.u32 %v715_v40, 16 }
  0xf8   : > { %v732_v52 = vpack.c.bf16 %v700_v58, %v700_v58 }
  0xfa   : > { %v999_v61 = vshrl.u32 %v732_v52, 16 }
  0xfb   : > { %2076 = vrot.lane.b32.xlu2 %v1999_v12, %s5043_s28  ;;  %3875 = vrot.lane.b32.xlu0 %v3798_v55, %s5043_s28  ;;  %v716_v12 = vpack.c.bf16 %v684_v56, %v684_v56  ;;  %v2000_v55 = vrot.slane %v5778_v29, 2  ;;  %v5845_v56 = vpop.f32.mrf.mxu3 }
  0xfc   : > { %2768 = vrot.lane.b32.xlu1 %v2691_v26, %s5044_s29  ;;  %v3800_v26 = vsel %vm1989_vm9, %v3797_v7, %v3799_v43  ;;  %v473_v7 = vsel %vm5128_vm2, 0, %v472_v4  ;;  %v5835_v43 = vpop.f32.mrf.mxu2  ;;  %7558 = vst [vmem:[#allocation21_spill] sm:$0xff] %v5845_v56  ;;  %v5859_v44 = vrot.slane %v999_v61, 7  ;;  %v2061_v31 = vrot.slane %v5845_v56, 2  ;;  %v5890_v61 = vpop.f32.mrf.mxu0 }
  0xfd   : > { %v866_v38 = vshll.u32 %v716_v12, 16  ;;  %474 = vst [vmem:[#allocation2 + $0xc0] sm:$0x1] %v473_v7  ;;  %v2002_v50 = vsel %vm1989_vm9, %v2000_v55, %v2001_v20  ;;  %v1851_v55 = vrot.slane %v5803_v59, 1 }
  0xfe   : > { %7557 = vst [vmem:[#allocation20_spill] sm:$0xff] %v5835_v43 }
 0x103   : > { %2124 = vrot.lane.b32.xlu2 %v2059_v28, %s5043_s28  ;;  %2976 = vrot.lane.b32.xlu0 %v2899_v3, %s5043_s28  ;;  %v863_v28 = vshrl.u32 %v716_v12, 16  ;;  %v857_v3 = vrot.slane %v855_v22, 7  ;;  %v1791_v12 = vrot.slane %v5778_v29, 1  ;;  %v2060_v22 = vrot.slane %v5803_v59, 2 }
 0x104   : > { %1867 = vrot.lane.b32.xlu1 %v1790_v2, %s5044_s29  ;;  %v1162_v4 = vld [vmem:[#allocation2 + $0xc0] sm:$0xf] }
 0x105   : > { %v5829_v2 = vrot.slane %v863_v28, 7  ;;  %v860_v5 = vor.u32 %v858_v46, %v857_v3  ;;  %v861_v45 = vrot.slane %v857_v3, 4  ;;  %v1852_v28 = vrot.slane %v5845_v56, 1 }
 0x107   : > { %v868_v14 = vor.u32 %v866_v38, %v5829_v2  ;;  %v1107_v42 = vsel %vm5167_vm5, %v860_v5, %v1106_v30  ;;  %v1793_v30 = vsel %vm1780_vm10, %v1791_v12, %v1792_v16  ;;  %v1853_v18 = vsel %vm1780_vm10, %v1851_v55, %v1852_v28 }
 0x108   : > { %1108 = vst [vmem:[#allocation2 + $0x60] sm:$0xf] %v1107_v42  ;;  %v3593_v12 = vrot.slane %v5835_v43, 1  ;;  %v3801_v55 = vrot.slane %v5835_v43, 2 }
 0x109   : > { %v869_v57 = vsel %vm5205_vm7, %v861_v45, %v868_v14  ;;  %v505_v14 = vld [vmem:[#allocation2 + $0x68] sm:$0xf] }
 0x10a   : > { %1109 = vst.msk [vmem:[#allocation2 + $0x64] sm:$0xf] %vm478_vm3, %v869_v57 }
 0x10b   : > { %3669 = vrot.lane.b32.xlu2 %v3592_v51, %s5044_s29  ;;  %1915 = vrot.lane.b32.xlu0 %v1850_v49, %s5044_s29  ;;  %v2902_v49 = vsel %vm1989_vm9, %v2900_v33, %v2901_v27  ;;  %v5850_v51 = vld [vmem:[%s5151_s18 + $0x40] sm:$0xff]   ;;  %v1002_v33 = vshll.u32 %v732_v52, 16  ;;  %v2062_v52 = vsel %vm1989_vm9, %v2060_v22, %v2061_v31 }
 0x10c   : > { %3877 = vrot.lane.b32.xlu1 %v3800_v26, %s5043_s28  ;;  %v4562_v40 = vunpack.c.l.bf16 %v5850_v51  ;;  %v993_v26 = vrot.slane %v991_v62, 7  ;;  %v506_v62 = vsel %vm5167_vm5, 0, %v505_v14  ;;  %v870_v14 = vrot.slane %v5829_v2, 4 }
 0x10d   : > { %v1004_v46 = vor.u32 %v1002_v33, %v5859_v44  ;;  %507 = vst [vmem:[#allocation2 + $0x68] sm:$0xf] %v506_v62 }
 0x10e   : > { %v618_v7 = vmul.f32 %v5569_v36, %v4562_v40  ;;  %v996_v58 = vor.u32 %v994_v60, %v993_v26  ;;  %v997_v3 = vrot.slane %v993_v26, 4 }
 0x110   : > { %v653_v38 = vadd.f32 %v5581_v41, %v618_v7  ;;  %v1005_v5 = vsel %vm5205_vm7, %v997_v3, %v1004_v46  ;;  %v1163_v45 = vsel %vm5167_vm5, %v996_v58, %v1162_v4  ;;  %v2003_v4 = vrot.slane %v5890_v61, 2  ;;  %v2482_v7 = vpop.f32.mrf.mxu1 }
 0x111   : > { %1164 = vst [vmem:[#allocation2 + $0xc0] sm:$0xf] %v1163_v45  ;;  %v2695_v2 = vrot.slane %v2482_v7, 1 }
 0x112   : > { %1165 = vst.msk [vmem:[#allocation2 + $0xc4] sm:$0xf] %vm478_vm3, %v1005_v5  ;;  %v685_v60 = vmax.f32 %v653_v38, 0.0 }
 0x113   : > { %2770 = vrot.lane.b32.xlu2 %v2694_v10, %s5044_s29  ;;  %2078 = vrot.lane.b32.xlu0 %v2002_v50, %s5043_s28  ;;  %v451_v10 = vld [vmem:[#allocation2 + $0x6c] sm:$0x1]  ;;  %v5881_v50 = vpop.f32.mrf.mxu2 }
 0x114   : > { %2978 = vrot.lane.b32.xlu1 %v2902_v49, %s5043_s28  ;;  %v4954_v49 = vld [vmem:[#allocation2 + $0x60] sm:$0xff]   ;;  %7559 = vst [vmem:[#allocation22_spill] sm:$0xff] %v5881_v50  ;;  %v452_v57 = vsel %vm5128_vm2, 0, %v451_v10  ;;  %v717_v40 = vpack.c.bf16 %v685_v60, %v685_v60  ;;  %v3594_v26 = vrot.slane %v5881_v50, 1  ;;  %v3802_v22 = vrot.slane %v5881_v50, 2 }
 0x115   : > { %v4826_v42 = vunpack.c.l.bf16 %v4954_v49  ;;  %453 = vst [vmem:[#allocation2 + $0x6c] sm:$0x1] %v452_v57  ;;  %v4827_v10 = vunpack.c.h.bf16 %v4954_v49  ;;  %v5921_v57 = vpop.f32.mrf.mxu3  ;;  %v1110_v49 = vld [vmem:[#allocation2 + $0x68] sm:$0x1] }
 0x116   : > { %v872_v58 = vshrl.u32 %v717_v40, 16  ;;  %v875_v3 = vshll.u32 %v717_v40, 16  ;;  %v3803_v38 = vsel %vm1989_vm9, %v3801_v55, %v3802_v22  ;;  %v3595_v5 = vsel %vm1780_vm10, %v3593_v12, %v3594_v26 }
 0x117   : > { %4491 = vmatmul.msk.f32.gmra.mxu2 %vm1394_vm8, %v4826_v42  ;;  %4444 = vmatmul.msk.f32.gmra.mxu1 %vm1394_vm8, %v4826_v42  ;;  %v1111_v60 = vsel %vm5128_vm2, %v870_v14, %v1110_v49  ;;  %v2063_v12 = vrot.slane %v5921_v57, 2 }
 0x118   : > { %4397 = vmatmul.msk.f32.gmra.mxu0 %vm1394_vm8, %v4826_v42  ;;  %v5903_v46 = vrot.slane %v872_v58, 7  ;;  %1112 = vst [vmem:[#allocation2 + $0x68] sm:$0x1] %v1111_v60  ;;  %v529_v58 = vld [vmem:[#allocation2 + $0xc8] sm:$0xf] }
 0x119   : > { %v5911_v45 = vld [vmem:[#allocation2 + $0xc0] sm:$0xff]  }
 0x11a   : > { %v7470_v49 = vunpack.c.h.bf16 %v5911_v45 }
 0x11b   : > { %1869 = vrot.lane.b32.xlu2 %v1793_v30, %s5044_s29  ;;  %2126 = vrot.lane.b32.xlu0 %v2062_v52, %s5043_s28  ;;  %v2004_v30 = vsel %vm1989_vm9, %v2001_v20, %v2003_v4  ;;  %v877_v52 = vor.u32 %v875_v3, %v5903_v46  ;;  %v2903_v20 = vrot.slane %v2482_v7, 2  ;;  %v3383_v55 = vpop.f32.mrf.mxu2  ;;  %v5937_v4 = vpop.f32.mrf.mxu1  ;;  %v2696_v3 = vsel %vm1780_vm10, %v2693_v63, %v2695_v2 }
 0x11c   : > { %1917 = vrot.lane.b32.xlu1 %v1853_v18, %s5044_s29  ;;  %v7471_v18 = vunpack.c.l.bf16 %v5911_v45  ;;  %v1113_v42 = vld [vmem:[#allocation2 + $0x6c] sm:$0xf]  ;;  %v3596_v2 = vrot.slane %v3383_v55, 1 }
 0x11d   : > { %v5893_v33 = vpop.permute.xlu2 %2070  ;;  %v1114_v40 = vsel %vm5167_vm5, %v877_v52, %v1113_v42  ;;  %v2904_v7 = vsel %vm1989_vm9, %v2901_v27, %v2903_v20  ;;  %v4563_v27 = vunpack.c.h.bf16 %v5850_v51  ;;  %v1794_v52 = vrot.slane %v5890_v61, 1  ;;  %v5969_v51 = vpop.f32.mrf.mxu0 }
 0x11e   : > { %7560 = vst [vmem:[#allocation23_spill] sm:$0xff] %v5893_v33  ;;  %4468 = vmatmul.msk.f32.gmra.mxu3 %vm1394_vm8, %v7471_v18  ;;  %v3804_v42 = vrot.slane %v3383_v55, 2 }
 0x11f   : > { %4492 = vmatmul.msk.f32.gmra.mxu2 %vm1394_vm8, %v4827_v10  ;;  %4445 = vmatmul.msk.f32.gmra.mxu1 %vm1394_vm8, %v4827_v10  ;;  %1115 = vst [vmem:[#allocation2 + $0x6c] sm:$0xf] %v1114_v40  ;;  %v1795_v55 = vsel %vm1780_vm10, %v1792_v16, %v1794_v52 }
 0x120   : > { %4398 = vmatmul.msk.f32.gmra.mxu0 %vm1394_vm8, %v4827_v10 }
 0x123   : > { %3879 = vrot.lane.b32.xlu2 %v3803_v38, %s5043_s28  ;;  %3671 = vrot.lane.b32.xlu0 %v3595_v5, %s5044_s29  ;;  %v530_v38 = vsel %vm5167_vm5, 0, %v529_v58  ;;  %v2064_v5 = vsel %vm1989_vm9, %v2061_v31, %v2063_v12  ;;  %v5964_v60 = vpop.f32.mrf.mxu2  ;;  %v1006_v12 = vrot.slane %v5859_v44, 4  ;;  %v508_v58 = vld [vmem:[#allocation2 + $0x74] sm:$0xf]  ;;  %v3597_v44 = vsel %vm1780_vm10, %v3594_v26, %v3596_v2 }
 0x124   : > { %2080 = vrot.lane.b32.xlu1 %v2004_v30, %s5043_s28  ;;  %531 = vst [vmem:[#allocation2 + $0xc8] sm:$0xf] %v530_v38  ;;  %v619_v30 = vmul.f32 %v5569_v36, %v4563_v27  ;;  %v509_v38 = vsel %vm5167_vm5, 0, %v508_v58  ;;  %v1854_v26 = vrot.slane %v5921_v57, 1  ;;  %v2905_v2 = vrot.slane %v5937_v4, 2 }
 0x125   : > { %v5924_v62 = vpop.permute.xlu2 %2118  ;;  %510 = vst [vmem:[#allocation2 + $0x74] sm:$0xf] %v509_v38  ;;  %v6016_v18 = vpop.f32.mrf.mxu0 }
 0x126   : > { %v4955_v31 = vld [vmem:[#allocation2 + $0x68] sm:$0xff]   ;;  %v654_v20 = vadd.f32 %v5581_v41, %v619_v30  ;;  %4469 = vmatmul.msk.f32.gmra.mxu3 %vm1394_vm8, %v7470_v49 }
 0x127   : > { %v4830_v40 = vunpack.c.l.bf16 %v4955_v31  ;;  %v4893_v49 = vld [vmem:[%s5151_s18 + $0x48] sm:$0xff]   ;;  %v4831_v50 = vunpack.c.h.bf16 %v4955_v31  ;;  %v1796_v31 = vrot.slane %v5969_v51, 1 }
 0x128   : > { %v686_v61 = vmax.f32 %v654_v20, 0.0 }
 0x129   : > { %4493 = vmatmul.msk.f32.gmra.mxu2 %vm1394_vm8, %v4830_v40  ;;  %4446 = vmatmul.msk.f32.gmra.mxu1 %vm1394_vm8, %v4830_v40 }
 0x12a   : > { %v5952_v10 = vpop.permute.xlu0 %2970  ;;  %v5954_v14 = vpop.permute.xlu1 %2762  ;;  %v718_v27 = vpack.c.bf16 %v686_v61, %v686_v61  ;;  %4399 = vmatmul.msk.f32.gmra.mxu0 %vm1394_vm8, %v4830_v40  ;;  %v878_v40 = vrot.slane %v5903_v46, 4 }
 0x12b   : > { %2980 = vrot.lane.b32.xlu2 %v2904_v7, %s5043_s28  ;;  %2772 = vrot.lane.b32.xlu0 %v2696_v3, %s5044_s29  ;;  %7561 = vst [vmem:[#allocation24_spill] sm:$0xff] %v5952_v10  ;;  %v3805_v7 = vsel %vm1989_vm9, %v3802_v22, %v3804_v42  ;;  %v1166_v3 = vld [vmem:[#allocation2 + $0xc8] sm:$0x1]  ;;  %v6013_v38 = vpop.f32.mrf.mxu2 }
 0x12c   : > { %7562 = vst [vmem:[#allocation25_spill] sm:$0xff] %v5954_v14  ;;  %2128 = vrot.lane.b32.xlu1 %v2064_v5, %s5043_s28  ;;  %v5982_v5 = vpop.f32.mrf.mxu1  ;;  %v1167_v22 = vsel %vm5128_vm2, %v1006_v12, %v1166_v3  ;;  %v880_v42 = vshrl.u32 %v718_v27, 16  ;;  %v2697_v12 = vrot.slane %v5937_v4, 1  ;;  %v1855_v3 = vsel %vm1780_vm10, %v1852_v28, %v1854_v26 }
 0x12d   : > { %v5958_v63 = vpop.permute.xlu2 %3663  ;;  %1168 = vst [vmem:[#allocation2 + $0xc8] sm:$0x1] %v1167_v22  ;;  %v7472_v20 = vrot.slane %v5982_v5, 2  ;;  %v7476_v58 = vrot.slane %v5982_v5, 1  ;;  %v1117_v22 = vld [vmem:[#allocation2 + $0x74] sm:$0x1]  ;;  %v4566_v26 = vunpack.c.l.bf16 %v4893_v49  ;;  %v1589_v11 = vpop.f32.mrf.mxu0 }
 0x12e   : > { %7563 = vst [vmem:[#allocation26_spill] sm:$0xff] %v5958_v63  ;;  %v882_v61 = vrot.slane %v880_v42, 7 }
 0x12f   : > { %v2907_v57 = vsel %vm1989_vm9, %v2905_v2, %v7472_v20  ;;  %v2699_v46 = vsel %vm1780_vm10, %v2697_v12, %v7476_v58  ;;  %v4567_v2 = vunpack.c.h.bf16 %v4893_v49  ;;  %v7475_v12 = vrot.slane %v6013_v38, 2 }
 0x130   : > { %v887_v42 = vrot.slane %v882_v61, 4 }
 0x131   : > { %4494 = vmatmul.msk.f32.gmra.mxu2 %vm1394_vm8, %v4831_v50  ;;  %4447 = vmatmul.msk.f32.gmra.mxu1 %vm1394_vm8, %v4831_v50 }
 0x132   : > { %v5989_v16 = vpop.permute.xlu1 %3871  ;;  %v1118_v49 = vsel %vm5128_vm2, %v887_v42, %v1117_v22  ;;  %4400 = vmatmul.msk.f32.gmra.mxu0 %vm1394_vm8, %v4831_v50  ;;  %v6064_v50 = vld [vmem:[#allocation2 + $0xa8] sm:$0xff]  }
 0x133   : > { %1871 = vrot.lane.b32.xlu2 %v1795_v55, %s5044_s29  ;;  %3881 = vrot.lane.b32.xlu0 %v3805_v7, %s5043_s28  ;;  %7564 = vst [vmem:[#allocation27_spill] sm:$0xff] %v5989_v16  ;;  %v883_v55 = vshll.u32 %v718_v27, 16  ;;  %v6005_v7 = vpop.f32.mrf.mxu3 }
 0x134   : > { %3673 = vrot.lane.b32.xlu1 %v3597_v44, %s5044_s29  ;;  %v2245_v27 = vld [vmem:[#allocation2 + $0xc8] sm:$0xf]  ;;  %1119 = vst [vmem:[#allocation2 + $0x74] sm:$0x1] %v1118_v49  ;;  %v2065_v58 = vrot.slane %v6005_v7, 2 }
 0x135   : > { %v5995_v30 = vpop.permute.xlu2 %2764  ;;  %v5997_v52 = vpop.permute.xlu0 %1861  ;;  %v885_v44 = vor.u32 %v883_v55, %v882_v61  ;;  %v3806_v55 = vrot.slane %v5964_v60, 2  ;;  %v2293_v20 = vunpack.c.l.bf16 %v2245_v27  ;;  %v620_v61 = vmul.f32 %v5569_v36, %v4566_v26  ;;  %v454_v26 = vld [vmem:[#allocation2 + $0x78] sm:$0x1] }
 0x136   : > { %7565 = vst [vmem:[#allocation28_spill] sm:$0xff] %v5995_v30  ;;  %v2005_v27 = vrot.slane %v5969_v51, 2  ;;  %v455_v49 = vsel %vm5128_vm2, 0, %v454_v26  ;;  %v1856_v26 = vrot.slane %v6005_v7, 1  ;;  %v6123_v16 = vpop.f32.mrf.mxu0 }
 0x137   : > { %7566 = vst [vmem:[#allocation29_spill] sm:$0xff] %v5997_v52  ;;  %4470 = vmatmul.msk.f32.gmra.mxu3 %vm1394_vm8, %v2293_v20  ;;  %v3808_v42 = vsel %vm1989_vm9, %v3806_v55, %v7475_v12 }
 0x138   : > { %456 = vst [vmem:[#allocation2 + $0x78] sm:$0x1] %v455_v49 }
 0x13a   : > { %v6023_v28 = vpop.permute.xlu1 %2972 }
 0x13b   : > { %1919 = vrot.lane.b32.xlu2 %v1855_v3, %s5044_s29  ;;  %2982 = vrot.lane.b32.xlu0 %v2907_v57, %s5043_s28  ;;  %7567 = vst [vmem:[#allocation30_spill] sm:$0xff] %v6023_v28  ;;  %v886_v3 = vsel %vm5205_vm7, %v878_v40, %v885_v44  ;;  %v7477_v40 = vrot.slane %v6016_v18, 1  ;;  %v7478_v44 = vrot.slane %v6016_v18, 2  ;;  %v6066_v12 = vpop.f32.mrf.mxu3 }
 0x13c   : > { %2774 = vrot.lane.b32.xlu1 %v2699_v46, %s5044_s29  ;;  %1116 = vst.msk [vmem:[#allocation2 + $0x70] sm:$0xf] %vm478_vm3, %v886_v3  ;;  %v621_v46 = vmul.f32 %v5569_v36, %v4567_v2  ;;  %v655_v3 = vadd.f32 %v5581_v41, %v620_v61  ;;  %v6060_v61 = vpop.f32.mrf.mxu1 }
 0x13d   : > { %v6029_v57 = vpop.permute.xlu2 %3873  ;;  %v6031_v43 = vpop.permute.xlu0 %1909  ;;  %v2007_v20 = vsel %vm1989_vm9, %v2005_v27, %v7478_v44  ;;  %v1798_v2 = vsel %vm1780_vm10, %v1796_v31, %v7477_v40  ;;  %v4862_v31 = vunpack.c.l.bf16 %v6064_v50  ;;  %v7486_v44 = vrot.slane %v6066_v12, 2 }
 0x13e   : > { %7568 = vst [vmem:[#allocation31_spill] sm:$0xff] %v6029_v57  ;;  %v656_v22 = vadd.f32 %v5581_v41, %v621_v46  ;;  %v687_v55 = vmax.f32 %v655_v3, 0.0 }
 0x13f   : > { %4509 = vmatmul.msk.f32.vlgmr.msra.gmra.mxu3 %vm1394_vm8, %v4862_v31  ;;  %v7571_v31 = vrot.slane %v5982_v5, 2  ;;  %v1120_v9 = vld [vmem:[#allocation2 + $0x78] sm:$0xf] }
 0x140   : > { %v688_v46 = vmax.f32 %v656_v22, 0.0  ;;  %v719_v49 = vpack.c.bf16 %v687_v55, %v687_v55  ;;  %v2067_v22 = vsel %vm1989_vm9, %v2065_v58, %v7486_v44  ;;  %v3598_v44 = vrot.slane %v5964_v60, 1 }
 0x142   : > { %v6069_v27 = vpop.permute.xlu1 %1911  ;;  %v720_v3 = vpack.c.bf16 %v688_v46, %v688_v46  ;;  %v889_v1 = vshrl.u32 %v719_v49, 16  ;;  %v892_v24 = vshll.u32 %v719_v49, 16 }
 0x143   : > { %2082 = vrot.lane.b32.xlu2 %v2007_v20, %s5043_s28  ;;  %1873 = vrot.lane.b32.xlu0 %v1798_v2, %s5044_s29  ;;  %v4956_v40 = vld [vmem:[#allocation2 + $0x70] sm:$0xff]  }
 0x144   : > { %3883 = vrot.lane.b32.xlu1 %v3808_v42, %s5043_s28  ;;  %v2908_v42 = vrot.slane %v6060_v61, 2  ;;  %v4834_v48 = vunpack.c.l.bf16 %v4956_v40  ;;  %v897_v21 = vshrl.u32 %v720_v3, 16  ;;  %v900_v29 = vshll.u32 %v720_v3, 16 }
 0x145   : > { %v6074_v20 = vpop.permute.xlu2 %2974  ;;  %v6076_v2 = vpop.permute.xlu0 %1863  ;;  %v891_v55 = vrot.slane %v889_v1, 7  ;;  %v7572_v3 = vrot.slane %v6066_v12, 1 }
 0x146   : > { %7569 = vst [vmem:[#allocation32_spill] sm:$0xff] %v6074_v20  ;;  %4495 = vmatmul.msk.f32.gmra.mxu2 %vm1394_vm8, %v4834_v48  ;;  %4448 = vmatmul.msk.f32.gmra.mxu1 %vm1394_vm8, %v4834_v48  ;;  %v6084_v46 = vrot.slane %v897_v21, 7  ;;  %v2909_v49 = vsel %vm1989_vm9, %v7571_v31, %v2908_v42  ;;  %v6097_v20 = vld [vmem:[%s5151_s18 + $0x50] sm:$0xff]   ;;  %v4835_v31 = vunpack.c.h.bf16 %v4956_v40  ;;  %v1799_v42 = vrot.slane %v1589_v11, 1  ;;  %s403_s18 = scalar_lea.vmem %s7465_s2, %s4526_s15 }
 0x147   : > { %7570 = vst [vmem:[#allocation33_spill] sm:$0xff] %v6076_v2  ;;  %4401 = vmatmul.msk.f32.gmra.mxu0 %vm1394_vm8, %v4834_v48  ;;  %v1858_v57 = vsel %vm1780_vm10, %v1856_v26, %v7572_v3  ;;  %v894_v21 = vor.u32 %v892_v24, %v891_v55  ;;  %v895_v48 = vrot.slane %v891_v55, 4  ;;  %v4570_v58 = vunpack.c.l.bf16 %v6097_v20  ;;  %v6106_v26 = vpop.f32.mrf.mxu2 }
 0x148   : > { %v902_v1 = vor.u32 %v900_v29, %v6084_v46  ;;  %v7575_v40 = vrot.slane %v6013_v38, 1  ;;  %v3809_v28 = vrot.slane %v6106_v26, 2 }
 0x149   : > { %v1121_v29 = vsel %vm5167_vm5, %v894_v21, %v1120_v9  ;;  %v457_v9 = vld [vmem:[#allocation2 + $0x84] sm:$0x1]  ;;  %v511_v21 = vld [vmem:[#allocation2 + $0x80] sm:$0xf] }
 0x14a   : > { %v903_v24 = vsel %vm5205_vm7, %v895_v48, %v902_v1  ;;  %1122 = vst [vmem:[#allocation2 + $0x78] sm:$0xf] %v1121_v29  ;;  %v3600_v34 = vsel %vm1780_vm10, %v3598_v44, %v7575_v40  ;;  %v7576_v1 = vrot.slane %v6016_v18, 2  ;;  %v458_v44 = vsel %vm5128_vm2, 0, %v457_v9 }
 0x14b   : > { %2130 = vrot.lane.b32.xlu2 %v2067_v22, %s5043_s28  ;;  %1921 = vrot.lane.b32.xlu0 %v1858_v57, %s5044_s29  ;;  %v2008_v57 = vrot.slane %v1589_v11, 2  ;;  %1123 = vst.msk [vmem:[#allocation2 + $0x7c] sm:$0xf] %vm478_vm3, %v903_v24  ;;  %v1697_v11 = vpop.f32.mrf.mxu3  ;;  %v7577_v24 = vrot.slane %v6016_v18, 1  ;;  %v2700_v9 = vrot.slane %v6060_v61, 1  ;;  %v7580_v61 = vrot.slane %v5982_v5, 1 }
 0x14c   : > { %2984 = vrot.lane.b32.xlu1 %v2909_v49, %s5043_s28  ;;  %v622_v49 = vmul.f32 %v5569_v36, %v4570_v58  ;;  %v512_v58 = vsel %vm5167_vm5, 0, %v511_v21  ;;  %459 = vst [vmem:[#allocation2 + $0x84] sm:$0x1] %v458_v44  ;;  %v2068_v21 = vrot.slane %v1697_v11, 2 }
 0x14d   : > { %v6108_v3 = vpop.permute.xlu2 %1913  ;;  %v6110_v22 = vpop.permute.xlu0 %2072  ;;  %v2009_v36 = vsel %vm1989_vm9, %v7576_v1, %v2008_v57  ;;  %v4863_v57 = vunpack.c.h.bf16 %v6064_v50  ;;  %513 = vst [vmem:[#allocation2 + $0x80] sm:$0xf] %v512_v58  ;;  %v904_v50 = vrot.slane %v6084_v46, 4  ;;  %v2701_v58 = vsel %vm1780_vm10, %v7580_v61, %v2700_v9 }
 0x14e   : > { %7573 = vst [vmem:[#allocation34_spill] sm:$0xff] %v6110_v22  ;;  %v6116_v55 = vpop.permute.xlu1 %1865  ;;  %4496 = vmatmul.msk.f32.gmra.mxu2 %vm1394_vm8, %v4835_v31  ;;  %4449 = vmatmul.msk.f32.gmra.mxu1 %vm1394_vm8, %v4835_v31  ;;  %v657_v48 = vadd.f32 %v5581_v41, %v622_v49  ;;  %v1800_v41 = vsel %vm1780_vm10, %v7577_v24, %v1799_v42  ;;  %v7582_v46 = vrot.slane %v6066_v12, 1 }
 0x14f   : > { %7574 = vst [vmem:[#allocation35_spill] sm:$0xff] %v6116_v55  ;;  %4402 = vmatmul.msk.f32.gmra.mxu0 %vm1394_vm8, %v4835_v31  ;;  %v6142_v29 = vpop.f32.mrf.mxu2  ;;  %4510 = vmatmul.msk.f32.gmra.mxu3 %vm1394_vm8, %v4863_v57 }
 0x150   : > { %v689_v31 = vmax.f32 %v657_v48, 0.0  ;;  %v1859_v48 = vrot.slane %v1697_v11, 1  ;;  %v6164_v11 = vpop.f32.mrf.mxu0 }
 0x151   : > { %v7602_v10 = vrot.slane %v6164_v11, 2 }
 0x152   : > { %v4957_v42 = vld [vmem:[#allocation2 + $0x78] sm:$0xff]  }
 0x153   : > { %3675 = vrot.lane.b32.xlu2 %v3600_v34, %s5044_s29  ;;  %2084 = vrot.lane.b32.xlu0 %v2009_v36, %s5043_s28  ;;  %v721_v34 = vpack.c.bf16 %v689_v31, %v689_v31  ;;  %v4838_v36 = vunpack.c.l.bf16 %v4957_v42  ;;  %v7581_v31 = vrot.slane %v6066_v12, 2  ;;  %v1127_v9 = vld [vmem:[#allocation2 + $0x84] sm:$0xf]  ;;  %v6174_v61 = vpop.f32.mrf.mxu3 }
 0x154   : > { %1875 = vrot.lane.b32.xlu1 %v1800_v41, %s5044_s29  ;;  %v6153_v41 = vpop.f32.mrf.mxu1  ;;  %v1124_v35 = vld [vmem:[#allocation2 + $0x80] sm:$0x1] }
 0x155   : > { %v6145_v49 = vpop.permute.xlu2 %2076  ;;  %v6147_v40 = vpop.permute.xlu0 %2120  ;;  %v906_v44 = vshrl.u32 %v721_v34, 16  ;;  %v909_v24 = vshll.u32 %v721_v34, 16  ;;  %v2069_v57 = vsel %vm1989_vm9, %v7581_v31, %v2068_v21  ;;  %v1860_v34 = vsel %vm1780_vm10, %v7582_v46, %v1859_v48 }
 0x156   : > { %7578 = vst [vmem:[#allocation36_spill] sm:$0xff] %v6145_v49  ;;  %v6150_v1 = vpop.permute.xlu1 %2074  ;;  %4497 = vmatmul.msk.f32.gmra.mxu2 %vm1394_vm8, %v4838_v36  ;;  %4450 = vmatmul.msk.f32.gmra.mxu1 %vm1394_vm8, %v4838_v36  ;;  %v4839_v48 = vunpack.c.h.bf16 %v4957_v42  ;;  %v3601_v46 = vrot.slane %v6106_v26, 1  ;;  %v7585_v42 = vrot.slane %v6013_v38, 2 }
 0x157   : > { %7579 = vst [vmem:[#allocation37_spill] sm:$0xff] %v6150_v1  ;;  %v6166_v49 = vrot.slane %v906_v44, 7  ;;  %4403 = vmatmul.msk.f32.gmra.mxu0 %vm1394_vm8, %v4838_v36  ;;  %v1125_v44 = vsel %vm5128_vm2, %v904_v50, %v1124_v35  ;;  %v2010_v36 = vrot.slane %v6123_v16, 2  ;;  %v6192_v35 = vpop.f32.mrf.mxu2 }
 0x158   : > { %1126 = vst [vmem:[#allocation2 + $0x80] sm:$0x1] %v1125_v44  ;;  %v3810_v26 = vsel %vm1989_vm9, %v7585_v42, %v3809_v28  ;;  %v7586_v44 = vrot.slane %v6013_v38, 1  ;;  %v6278_v55 = vpop.f32.mrf.mxu0  ;;  %v7616_v39 = vrot.slane %v6192_v35, 1 }
 0x159   : > { %v911_v21 = vor.u32 %v909_v24, %v6166_v49 }
 0x15b   : > { %2776 = vrot.lane.b32.xlu2 %v2701_v58, %s5044_s29  ;;  %2132 = vrot.lane.b32.xlu0 %v2069_v57, %s5043_s28  ;;  %v7489_v57 = vrot.slane %v6164_v11, 2  ;;  %v1128_v24 = vsel %vm5167_vm5, %v911_v21, %v1127_v9  ;;  %v6210_v21 = vpop.f32.mrf.mxu3 }
 0x15c   : > { %1923 = vrot.lane.b32.xlu1 %v1860_v34, %s5044_s29  ;;  %1129 = vst [vmem:[#allocation2 + $0x84] sm:$0xf] %v1128_v24  ;;  %v6206_v9 = vpop.f32.mrf.mxu1  ;;  %v2702_v24 = vrot.slane %v6153_v41, 1  ;;  %v7598_v0 = vrot.slane %v6210_v21, 2 }
 0x15d   : > { %v6181_v58 = vpop.permute.xlu2 %2124  ;;  %v6183_v31 = vpop.permute.xlu0 %3665  ;;  %v2012_v50 = vsel %vm1989_vm9, %v2010_v36, %v7489_v57  ;;  %v2742_v36 = vrot.slane %v6174_v61, 1 }
 0x15e   : > { %7583 = vst [vmem:[#allocation38_spill] sm:$0xff] %v6181_v58  ;;  %v6188_v34 = vpop.permute.xlu1 %2122  ;;  %4498 = vmatmul.msk.f32.gmra.mxu2 %vm1394_vm8, %v4839_v48  ;;  %4451 = vmatmul.msk.f32.gmra.mxu1 %vm1394_vm8, %v4839_v48 }
 0x15f   : > { %7584 = vst [vmem:[#allocation39_spill] sm:$0xff] %v6183_v31  ;;  %v3602_v31 = vsel %vm1780_vm10, %v7586_v44, %v3601_v46  ;;  %4404 = vmatmul.msk.f32.gmra.mxu0 %vm1394_vm8, %v4839_v48  ;;  %v4964_v48 = vld [vmem:[#allocation2 + $0xb0] sm:$0xff]   ;;  %v2910_v44 = vrot.slane %v6153_v41, 2  ;;  %v6232_v63 = vpop.f32.mrf.mxu2 }
 0x160   : > { %v4866_v54 = vunpack.c.l.bf16 %v4964_v48 }
 0x162   : > { %4511 = vmatmul.msk.f32.gmra.mxu3 %vm1394_vm8, %v4866_v54  ;;  %v4571_v54 = vunpack.c.h.bf16 %v6097_v20 }
 0x163   : > { %3885 = vrot.lane.b32.xlu2 %v3810_v26, %s5043_s28  ;;  %3677 = vrot.lane.b32.xlu0 %v3602_v31, %s5044_s29  ;;  %v7491_v31 = vrot.slane %v6206_v9, 2 }
 0x164   : > { %2086 = vrot.lane.b32.xlu1 %v2012_v50, %s5043_s28  ;;  %v6225_v50 = vld [vmem:[#allocation2 + $0x80] sm:$0xff]  }
 0x165   : > { %v6216_v42 = vpop.permute.xlu2 %3669  ;;  %v6218_v46 = vpop.permute.xlu0 %2766  ;;  %v4842_v28 = vunpack.c.l.bf16 %v6225_v50  ;;  %v2912_v26 = vsel %vm1989_vm9, %v2910_v44, %v7491_v31  ;;  %v3603_v44 = vrot.slane %v6142_v29, 1 }
 0x166   : > { %7587 = vst [vmem:[#allocation40_spill] sm:$0xff] %v6216_v42  ;;  %v6223_v57 = vpop.permute.xlu1 %3667  ;;  %v7590_v42 = vrot.slane %v6210_v21, 1 }
 0x167   : > { %7588 = vst [vmem:[#allocation41_spill] sm:$0xff] %v6218_v46  ;;  %4499 = vmatmul.msk.f32.gmra.mxu2 %vm1394_vm8, %v4842_v28  ;;  %4452 = vmatmul.msk.f32.gmra.mxu1 %vm1394_vm8, %v4842_v28 }
 0x168   : > { %7589 = vst [vmem:[#allocation42_spill] sm:$0xff] %v6223_v57  ;;  %v2744_v46 = vsel %vm1780_vm10, %v2742_v36, %v7590_v42  ;;  %v7591_v57 = vrot.slane %v6206_v9, 1  ;;  %4405 = vmatmul.msk.f32.gmra.mxu0 %vm1394_vm8, %v4842_v28  ;;  %v1801_v36 = vrot.slane %v6123_v16, 1  ;;  %v2950_v28 = vrot.slane %v6174_v61, 2  ;;  %v6268_v42 = vld [vmem:[%s7467_s4] ss:$0 sm:$0xff] }
 0x16a   : > { %v2704_v1 = vsel %vm1780_vm10, %v2702_v24, %v7591_v57 }
 0x16b   : > { %2986 = vrot.lane.b32.xlu2 %v2912_v26, %s5043_s28  ;;  %2778 = vrot.lane.b32.xlu0 %v2704_v1, %s5044_s29  ;;  %v6258_v1 = vld [vmem:[%s7466_s3] ss:$0 sm:$0xff]  ;;  %v4867_v26 = vunpack.c.h.bf16 %v4964_v48  ;;  %v6280_v48 = vpop.f32.mrf.mxu2 }
 0x16c   : > { %2810 = vrot.lane.b32.xlu1 %v2744_v46, %s5044_s29  ;;  %v623_v20 = vmul.f32 %v6258_v1, %v4571_v54  ;;  %v7596_v54 = vrot.slane %v6192_v35, 1  ;;  %7597 = vst [vmem:[#allocation46_spill] sm:$0xff] %v6280_v48 }
 0x16d   : > { %v6250_v31 = vpop.permute.xlu2 %2770  ;;  %v6252_v30 = vpop.permute.xlu0 %3875  ;;  %4512 = vmatmul.msk.f32.gmra.mxu3 %vm1394_vm8, %v4867_v26 }
 0x16e   : > { %7592 = vst [vmem:[#allocation43_spill] sm:$0xff] %v6250_v31  ;;  %v6263_v46 = vpop.permute.xlu1 %2768  ;;  %v658_v57 = vadd.f32 %v6268_v42, %v623_v20  ;;  %v7595_v31 = vrot.slane %v6164_v11, 1  ;;  %v3605_v24 = vsel %vm1780_vm10, %v3603_v44, %v7596_v54  ;;  %v2952_v20 = vsel %vm1989_vm9, %v2950_v28, %v7598_v0  ;;  %v2500_v26 = vpop.f32.mrf.mxu1 }
 0x16f   : > { %7593 = vst [vmem:[#allocation44_spill] sm:$0xff] %v6252_v30  ;;  %v2013_v44 = vrot.slane %v6278_v55, 2  ;;  %v3811_v0 = vrot.slane %v6142_v29, 2 }
 0x170   : > { %7594 = vst [vmem:[#allocation45_spill] sm:$0xff] %v6263_v46  ;;  %v1803_v30 = vsel %vm1780_vm10, %v1801_v36, %v7595_v31  ;;  %v514_v46 = vld [vmem:[#allocation2 + $0x8c] sm:$0xf]  ;;  %v690_v37 = vmax.f32 %v658_v57, 0.0 }
 0x171   : > { %v515_v31 = vsel %vm5167_vm5, 0, %v514_v46 }
 0x172   : > { %v722_v36 = vpack.c.bf16 %v690_v37, %v690_v37  ;;  %516 = vst [vmem:[#allocation2 + $0x8c] sm:$0xf] %v515_v31  ;;  %v912_v31 = vrot.slane %v6166_v49, 4 }
 0x173   : > { %1877 = vrot.lane.b32.xlu2 %v1803_v30, %s5044_s29  ;;  %3018 = vrot.lane.b32.xlu0 %v2952_v20, %s5043_s28  ;;  %v7495_v30 = vrot.slane %v6192_v35, 2  ;;  %v2705_v20 = vrot.slane %v2500_v26, 1 }
 0x174   : > { %3679 = vrot.lane.b32.xlu1 %v3605_v24, %s5044_s29  ;;  %v914_v23 = vshrl.u32 %v722_v36, 16  ;;  %v917_v37 = vshll.u32 %v722_v36, 16  ;;  %v2014_v24 = vsel %vm1989_vm9, %v7602_v10, %v2013_v44  ;;  %v6311_v36 = vpop.f32.mrf.mxu2  ;;  %v2572_v44 = vpop.f32.mrf.mxu3 }
 0x175   : > { %v6291_v54 = vpop.permute.xlu2 %1869  ;;  %v6293_v57 = vpop.permute.xlu0 %2976  ;;  %7604 = vst [vmem:[#allocation50_spill] sm:$0xff] %v6311_v36 }
 0x176   : > { %7599 = vst [vmem:[#allocation47_spill] sm:$0xff] %v6291_v54  ;;  %v6297_v28 = vpop.permute.xlu1 %1867  ;;  %v916_v46 = vrot.slane %v914_v23, 7 }
 0x177   : > { %7600 = vst [vmem:[#allocation48_spill] sm:$0xff] %v6293_v57  ;;  %v3813_v57 = vsel %vm1989_vm9, %v3811_v0, %v7495_v30  ;;  %v4843_v0 = vunpack.c.h.bf16 %v6225_v50  ;;  %v6329_v50 = vpop.f32.mrf.mxu1  ;;  %v7497_v30 = vrot.slane %v6311_v36, 2 }
 0x178   : > { %7601 = vst [vmem:[#allocation49_spill] sm:$0xff] %v6297_v28  ;;  %v919_v22 = vor.u32 %v917_v37, %v916_v46  ;;  %v921_v54 = vrot.slane %v916_v46, 4  ;;  %v7603_v28 = vrot.slane %v6206_v9, 1  ;;  %v2913_v37 = vrot.slane %v2500_v26, 2 }
 0x179   : > { %v1131_v49 = vld [vmem:[#allocation2 + $0x8c] sm:$0x1]  ;;  %4500 = vmatmul.msk.f32.gmra.mxu2 %vm1394_vm8, %v4843_v0  ;;  %4453 = vmatmul.msk.f32.gmra.mxu1 %vm1394_vm8, %v4843_v0  ;;  %v7608_v26 = vrot.slane %v6210_v21, 1  ;;  %v2707_v47 = vrot.slane %v6329_v50, 1 }
 0x17a   : > { %v2706_v23 = vsel %vm1780_vm10, %v7603_v28, %v2705_v20  ;;  %v920_v10 = vsel %vm5205_vm7, %v912_v31, %v919_v22  ;;  %v2745_v20 = vrot.slane %v2572_v44, 1  ;;  %v2953_v22 = vrot.slane %v2572_v44, 2  ;;  %4406 = vmatmul.msk.f32.gmra.mxu0 %vm1394_vm8, %v4843_v0 }
 0x17b   : > { %2088 = vrot.lane.b32.xlu2 %v2014_v24, %s5043_s28  ;;  %3887 = vrot.lane.b32.xlu0 %v3813_v57, %s5043_s28  ;;  %1130 = vst.msk [vmem:[#allocation2 + $0x88] sm:$0xf] %vm478_vm3, %v920_v10  ;;  %v1132_v57 = vsel %vm5128_vm2, %v921_v54, %v1131_v49  ;;  %v6332_v54 = vpop.f32.mrf.mxu0  ;;  %v7610_v49 = vrot.slane %v6210_v21, 2 }
 0x17c   : > { %2780 = vrot.lane.b32.xlu1 %v2706_v23, %s5044_s29  ;;  %1133 = vst [vmem:[#allocation2 + $0x8c] sm:$0x1] %v1132_v57  ;;  %v2746_v31 = vsel %vm1780_vm10, %v7608_v26, %v2745_v20  ;;  %v7609_v23 = vrot.slane %v6206_v9, 2  ;;  %v6348_v0 = vpop.f32.mrf.mxu2  ;;  %v4965_v57 = vld [vmem:[#allocation2 + $0xb8] sm:$0xff]  }
 0x17d   : > { %v6320_v46 = vpop.permute.xlu2 %3879  ;;  %v6322_v28 = vpop.permute.xlu0 %1915  ;;  %v2954_v44 = vsel %vm1989_vm9, %v7610_v49, %v2953_v22  ;;  %v3819_v20 = vrot.slane %v6348_v0, 2  ;;  %v1804_v49 = vrot.slane %v6278_v55, 1  ;;  %v4871_v33 = vunpack.c.h.bf16 %v4965_v57 }
 0x17e   : > { %7605 = vst [vmem:[#allocation51_spill] sm:$0xff] %v6320_v46  ;;  %v6324_v24 = vpop.permute.xlu1 %3877  ;;  %v2914_v10 = vsel %vm1989_vm9, %v7609_v23, %v2913_v37  ;;  %v4870_v46 = vunpack.c.l.bf16 %v4965_v57  ;;  %v6353_v37 = vld [vmem:[%s403_s18] sm:$0xff]  }
 0x17f   : > { %7606 = vst [vmem:[#allocation52_spill] sm:$0xff] %v6322_v28  ;;  %v4598_v22 = vunpack.c.l.bf16 %v6353_v37  ;;  %v6368_v2 = vsel %vm1989_vm9, %v7497_v30, %v3819_v20  ;;  %v6375_v55 = vpop.f32.mrf.mxu1  ;;  %v4961_v28 = vld [vmem:[#allocation2 + $0x98] sm:$0xff]  }
 0x180   : > { %7607 = vst [vmem:[#allocation53_spill] sm:$0xff] %v6324_v24  ;;  %v3606_v24 = vrot.slane %v6232_v63, 1  ;;  %4513 = vmatmul.msk.f32.gmra.mxu3 %vm1394_vm8, %v4870_v46  ;;  %v6378_v46 = vpop.f32.mrf.mxu3 }
 0x181   : > { %7614 = vst [vmem:[#allocation57_spill] sm:$0xff] %v6368_v2 }
 0x182   : > { %7615 = vst [vmem:[#allocation58_spill] sm:$0xff] %v6375_v55  ;;  %v3607_v20 = vsel %vm1780_vm10, %v7616_v39, %v3606_v24  ;;  %v7500_v39 = vrot.slane %v6375_v55, 1 }
 0x183   : > { %2812 = vrot.lane.b32.xlu2 %v2746_v31, %s5044_s29  ;;  %2988 = vrot.lane.b32.xlu0 %v2914_v10, %s5043_s28  ;;  %v4959_v26 = vld [vmem:[#allocation2 + $0x88] sm:$0xff]   ;;  %v6386_v14 = vpop.f32.mrf.mxu0 }
 0x184   : > { %3020 = vrot.lane.b32.xlu1 %v2954_v44, %s5043_s28  ;;  %v4846_v10 = vunpack.c.l.bf16 %v4959_v26  ;;  %7618 = vst [vmem:[#allocation59_spill] sm:$0xff] %v6386_v14  ;;  %v4847_v24 = vunpack.c.h.bf16 %v4959_v26  ;;  %v2709_v26 = vsel %vm1780_vm10, %v2707_v47, %v7500_v39  ;;  %v2747_v39 = vrot.slane %v6378_v46, 1 }
 0x185   : > { %v6355_v31 = vpop.permute.xlu2 %2980  ;;  %v6357_v23 = vpop.permute.xlu0 %2078 }
 0x186   : > { %7611 = vst [vmem:[#allocation54_spill] sm:$0xff] %v6355_v31  ;;  %v6362_v44 = vpop.permute.xlu1 %2978  ;;  %v3814_v31 = vrot.slane %v6232_v63, 2  ;;  %4501 = vmatmul.msk.f32.gmra.mxu2 %vm1394_vm8, %v4846_v10  ;;  %4454 = vmatmul.msk.f32.gmra.mxu1 %vm1394_vm8, %v4846_v10  ;;  %v7617_v63 = vrot.slane %v6164_v11, 1 }
 0x187   : > { %7612 = vst [vmem:[#allocation55_spill] sm:$0xff] %v6357_v23  ;;  %v1236_v23 = vmul.f32 %v6258_v1, %v4598_v22  ;;  %4407 = vmatmul.msk.f32.gmra.mxu0 %vm1394_vm8, %v4846_v10  ;;  %v7619_v10 = vrot.slane %v6192_v35, 2 }
 0x188   : > { %7613 = vst [vmem:[#allocation56_spill] sm:$0xff] %v6362_v44  ;;  %v1805_v30 = vsel %vm1780_vm10, %v7617_v63, %v1804_v49  ;;  %v2915_v49 = vrot.slane %v6329_v50, 2  ;;  %4514 = vmatmul.msk.f32.gmra.mxu3 %vm1394_vm8, %v4871_v33  ;;  %v6417_v8 = vpop.f32.mrf.mxu3 }
 0x189   : > { %v1238_v44 = vadd.f32 %v6268_v42, %v1236_v23  ;;  %v3815_v22 = vsel %vm1989_vm9, %v7619_v10, %v3814_v31  ;;  %7622 = vst [vmem:[#allocation62_spill] sm:$0xff] %v6417_v8 }
 0x18b   : > { %3681 = vrot.lane.b32.xlu2 %v3607_v20, %s5044_s29  ;;  %1879 = vrot.lane.b32.xlu0 %v1805_v30, %s5044_s29  ;;  %v1240_v23 = vmax.f32 %v1238_v44, 0.0  ;;  %v7501_v20 = vrot.slane %v6375_v55, 2  ;;  %v2015_v30 = vrot.slane %v6332_v54, 2  ;;  %v2016_v44 = vrot.slane %v6386_v14, 2  ;;  %v1607_v58 = vpop.f32.mrf.mxu0 }
 0x18c   : > { %3889 = vrot.lane.b32.xlu1 %v3815_v22, %s5043_s28 }
 0x18d   : > { %v6397_v63 = vpop.permute.xlu2 %1871  ;;  %v6400_v52 = vpop.permute.xlu0 %2126  ;;  %v1242_v31 = vpack.c.bf16 %v1240_v23, %v1240_v23  ;;  %v2917_v22 = vsel %vm1989_vm9, %v2915_v49, %v7501_v20  ;;  %v475_v23 = vld [vmem:[#allocation2 + $0xcc] sm:$0x1]  ;;  %v2017_v33 = vsel %vm1989_vm9, %v2015_v30, %v2016_v44  ;;  %v2955_v30 = vrot.slane %v6378_v46, 2 }
 0x18e   : > { %7620 = vst [vmem:[#allocation60_spill] sm:$0xff] %v6397_v63  ;;  %v6404_v10 = vpop.permute.xlu1 %1917  ;;  %4502 = vmatmul.msk.f32.gmra.mxu2 %vm1394_vm8, %v4847_v24  ;;  %4455 = vmatmul.msk.f32.gmra.mxu1 %vm1394_vm8, %v4847_v24  ;;  %v2748_v20 = vrot.slane %v6417_v8, 1 }
 0x18f   : > { %7621 = vst [vmem:[#allocation61_spill] sm:$0xff] %v6400_v52  ;;  %v1261_v57 = vunpack.c.l.bf16 %v1242_v31  ;;  %4408 = vmatmul.msk.f32.gmra.mxu0 %vm1394_vm8, %v4847_v24  ;;  %v476_v31 = vsel %vm5128_vm2, 0, %v475_v23  ;;  %v7503_v23 = vrot.slane %v6417_v8, 2 }
 0x190   : > { %477 = vst [vmem:[#allocation2 + $0xcc] sm:$0x1] %v476_v31  ;;  %v2749_v56 = vsel %vm1780_vm10, %v2747_v39, %v2748_v20 }
 0x191   : > { %v1264_v63 = vmul.f32 %v1261_v57, %v5173_v17 }
 0x193   : > { %2782 = vrot.lane.b32.xlu2 %v2709_v26, %s5044_s29  ;;  %2090 = vrot.lane.b32.xlu0 %v2017_v33, %s5043_s28  ;;  %v1266_v47 = vpack.c.bf16 %v1264_v63, %v1264_v63  ;;  %v7626_v33 = vunpack.c.l.bf16 %v5911_v45  ;;  %v1806_v63 = vrot.slane %v6332_v54, 1 }
 0x194   : > { %2990 = vrot.lane.b32.xlu1 %v2917_v22, %s5043_s28  ;;  %v7504_v22 = vrot.slane %v6386_v14, 1 }
 0x195   : > { %v6425_v24 = vpop.permute.xlu2 %1919  ;;  %v6427_v49 = vpop.permute.xlu0 %3671  ;;  %v1269_v57 = vshrl.u32 %v1266_v47, 16  ;;  %4515 = vmatmul.msk.f32.gmra.mxu3 %vm1394_vm8, %v7626_v33 }
 0x196   : > { %7623 = vst [vmem:[#allocation63_spill] sm:$0xff] %v6425_v24  ;;  %v6433_v26 = vpop.permute.xlu1 %2080  ;;  %v2957_v24 = vsel %vm1989_vm9, %v2955_v30, %v7503_v23  ;;  %v1808_v33 = vsel %vm1780_vm10, %v1806_v63, %v7504_v22  ;;  %v3816_v23 = vrot.slane %v6280_v48, 2  ;;  %v3609_v63 = vrot.slane %v6311_v36, 1 }
 0x197   : > { %7624 = vst [vmem:[#allocation64_spill] sm:$0xff] %v6427_v49  ;;  %v6440_v31 = vrot.slane %v1269_v57, 7  ;;  %v1272_v49 = vshll.u32 %v1266_v47, 16  ;;  %v4960_v57 = vld [vmem:[#allocation2 + $0x90] sm:$0xff]  }
 0x198   : > { %7625 = vst [vmem:[#allocation65_spill] sm:$0xff] %v6433_v26  ;;  %v1289_v26 = vld [vmem:[#allocation2 + $0xcc] sm:$0xf]  ;;  %v4850_v30 = vunpack.c.l.bf16 %v4960_v57 }
 0x199   : > { %v1274_v2 = vor.u32 %v1272_v49, %v6440_v31  ;;  %v6454_v49 = vpop.f32.mrf.mxu3 }
 0x19a   : > { %4503 = vmatmul.msk.f32.gmra.mxu2 %vm1394_vm8, %v4850_v30  ;;  %4456 = vmatmul.msk.f32.gmra.mxu1 %vm1394_vm8, %v4850_v30 }
 0x19b   : > { %3022 = vrot.lane.b32.xlu2 %v2957_v24, %s5043_s28  ;;  %2814 = vrot.lane.b32.xlu0 %v2749_v56, %s5044_s29  ;;  %v1290_v47 = vsel %vm5167_vm5, %v1274_v2, %v1289_v26  ;;  %v3608_v56 = vrot.slane %v6280_v48, 1  ;;  %v7629_v2 = vunpack.c.h.bf16 %v5911_v45  ;;  %v2018_v26 = vrot.slane %v1607_v58, 2 }
 0x19c   : > { %1881 = vrot.lane.b32.xlu1 %v1808_v33, %s5044_s29  ;;  %1291 = vst [vmem:[#allocation2 + $0xcc] sm:$0xf] %v1290_v47  ;;  %v2509_v33 = vpop.f32.mrf.mxu1  ;;  %v7630_v47 = vrot.slane %v6311_v36, 2  ;;  %v4851_v45 = vunpack.c.h.bf16 %v4960_v57 }
 0x19d   : > { %v6457_v39 = vpop.permute.xlu2 %2082  ;;  %v6459_v24 = vpop.permute.xlu0 %2772  ;;  %4516 = vmatmul.msk.f32.gmra.mxu3 %vm1394_vm8, %v7629_v2  ;;  %v3610_v48 = vsel %vm1780_vm10, %v3608_v56, %v3609_v63 }
 0x19e   : > { %7627 = vst [vmem:[#allocation66_spill] sm:$0xff] %v6459_v24  ;;  %v6464_v22 = vpop.permute.xlu1 %2128  ;;  %v3818_v24 = vsel %vm1989_vm9, %v3816_v23, %v7630_v47  ;;  %v4599_v23 = vunpack.c.h.bf16 %v6353_v37  ;;  %v2918_v47 = vrot.slane %v2509_v33, 2  ;;  %v7634_v37 = vrot.slane %v6375_v55, 2 }
 0x19f   : > { %7628 = vst [vmem:[#allocation67_spill] sm:$0xff] %v6464_v22  ;;  %v2019_v22 = vsel %vm1989_vm9, %v2016_v44, %v2018_v26  ;;  %v2750_v44 = vrot.slane %v6454_v49, 1 }
 0x1a0   : > { %v1237_v57 = vmul.f32 %v6258_v1, %v4599_v23  ;;  %v4854_v1 = vunpack.c.l.bf16 %v4961_v28 }
 0x1a1   : > { %v6487_v56 = vpop.f32.mrf.mxu3 }
 0x1a2   : > { %4504 = vmatmul.msk.f32.gmra.mxu2 %vm1394_vm8, %v4851_v45  ;;  %4457 = vmatmul.msk.f32.gmra.mxu1 %vm1394_vm8, %v4851_v45  ;;  %v2751_v45 = vsel %vm1780_vm10, %v2748_v20, %v2750_v44  ;;  %v3611_v20 = vrot.slane %v6348_v0, 1 }
 0x1a3   : > { %3891 = vrot.lane.b32.xlu2 %v3818_v24, %s5043_s28  ;;  %3683 = vrot.lane.b32.xlu0 %v3610_v48, %s5044_s29  ;;  %v6478_v52 = vld [vmem:[#allocation2 + $0xc8] sm:$0xff]   ;;  %v2710_v24 = vrot.slane %v2509_v33, 1  ;;  %v2919_v33 = vsel %vm1989_vm9, %v7634_v37, %v2918_v47  ;;  %v2958_v37 = vrot.slane %v6454_v49, 2 }
 0x1a4   : > { %2092 = vrot.lane.b32.xlu1 %v2019_v22, %s5043_s28  ;;  %v4878_v2 = vunpack.c.l.bf16 %v6478_v52  ;;  %v6494_v22 = vpop.f32.mrf.mxu0  ;;  %v6498_v26 = vpop.f32.mrf.mxu1  ;;  %v3612_v0 = vsel %vm1780_vm10, %v3609_v63, %v3611_v20 }
 0x1a5   : > { %v6482_v30 = vpop.permute.xlu2 %2130  ;;  %v6484_v36 = vpop.permute.xlu0 %3881  ;;  %7633 = vst [vmem:[#allocation70_spill] sm:$0xff] %v6498_v26 }
 0x1a6   : > { %7631 = vst [vmem:[#allocation68_spill] sm:$0xff] %v6484_v36  ;;  %v6489_v48 = vpop.permute.xlu1 %3673  ;;  %4517 = vmatmul.msk.f32.gmra.mxu3 %vm1394_vm8, %v4878_v2  ;;  %v7635_v36 = vrot.slane %v6375_v55, 1  ;;  %v1239_v2 = vadd.f32 %v6268_v42, %v1237_v57  ;;  %v7637_v55 = vrot.slane %v6417_v8, 2 }
 0x1a7   : > { %7632 = vst [vmem:[#allocation69_spill] sm:$0xff] %v6489_v48 }
 0x1a8   : > { %v2711_v48 = vsel %vm1780_vm10, %v7635_v36, %v2710_v24  ;;  %v1241_v23 = vmax.f32 %v1239_v2, 0.0  ;;  %v1809_v36 = vrot.slane %v1607_v58, 1  ;;  %v7636_v2 = vrot.slane %v6386_v14, 1 }
 0x1a9   : > { %v6516_v24 = vpop.f32.mrf.mxu3  ;;  %v2959_v58 = vsel %vm1989_vm9, %v7637_v55, %v2958_v37  ;;  %v4855_v55 = vunpack.c.h.bf16 %v4961_v28  ;;  %v2752_v28 = vrot.slane %v6487_v56, 1 }
 0x1aa   : > { %4505 = vmatmul.msk.f32.gmra.mxu2 %vm1394_vm8, %v4854_v1 }
 0x1ab   : > { %2992 = vrot.lane.b32.xlu2 %v2919_v33, %s5043_s28  ;;  %2784 = vrot.lane.b32.xlu0 %v2711_v48, %s5044_s29  ;;  %v1243_v48 = vpack.c.bf16 %v1241_v23, %v1241_v23  ;;  %v532_v33 = vld [vmem:[#allocation2 + $0xd4] sm:$0xf] }
 0x1ac   : > { %2816 = vrot.lane.b32.xlu1 %v2751_v45, %s5044_s29  ;;  %v6520_v57 = vpop.f32.mrf.mxu0  ;;  %v1810_v45 = vsel %vm1780_vm10, %v7636_v2, %v1809_v36  ;;  %v6528_v49 = vpop.f32.mrf.mxu1  ;;  %v533_v1 = vsel %vm5167_vm5, 0, %v532_v33 }
 0x1ad   : > { %v6511_v15 = vpop.permute.xlu2 %3675  ;;  %v6513_v47 = vpop.permute.xlu0 %2982  ;;  %v1262_v44 = vunpack.c.l.bf16 %v1243_v48  ;;  %v2020_v48 = vrot.slane %v6494_v22, 2  ;;  %v7511_v36 = vrot.slane %v6520_v57, 2  ;;  %534 = vst [vmem:[#allocation2 + $0xd4] sm:$0xf] %v533_v1 }
 0x1ae   : > { %v2775_v42 = vpop.permute.xlu1 %2774  ;;  %v6549_v33 = vpop.f32.mrf.mxu2 }
 0x1af   : > { %v1265_v23 = vmul.f32 %v1262_v44, %v5173_v17  ;;  %v2712_v44 = vrot.slane %v6498_v26, 1  ;;  %v2022_v63 = vsel %vm1989_vm9, %v2020_v48, %v7511_v36  ;;  %v4962_v48 = vld [vmem:[#allocation2 + $0xa0] sm:$0xff]  }
 0x1b1   : > { %v6544_v17 = vpop.f32.mrf.mxu3 }
 0x1b2   : > { %4506 = vmatmul.msk.f32.gmra.mxu2 %vm1394_vm8, %v4855_v55  ;;  %v7638_v55 = vrot.slane %v6528_v49, 2 }
 0x1b3   : > { %1883 = vrot.lane.b32.xlu2 %v1810_v45, %s5044_s29  ;;  %3024 = vrot.lane.b32.xlu0 %v2959_v58, %s5043_s28  ;;  %v1267_v45 = vpack.c.bf16 %v1265_v23, %v1265_v23  ;;  %v2920_v58 = vrot.slane %v6498_v26, 2 }
 0x1b4   : > { %3685 = vrot.lane.b32.xlu1 %v3612_v0, %s5044_s29  ;;  %v1616_v6 = vpop.f32.mrf.mxu0 }
 0x1b5   : > { %v6539_v37 = vpop.permute.xlu2 %2776  ;;  %v1874_v2 = vpop.permute.xlu0 %1873  ;;  %v1277_v0 = vshrl.u32 %v1267_v45, 16  ;;  %v1280_v1 = vshll.u32 %v1267_v45, 16  ;;  %v2922_v26 = vsel %vm1989_vm9, %v2920_v58, %v7638_v55  ;;  %v4858_v58 = vunpack.c.l.bf16 %v4962_v48 }
 0x1b6   : > { %v3884_v13 = vpop.permute.xlu1 %3883  ;;  %v1963_v20 = vadd.f32 %v1874_v2, %v5969_v51  ;;  %v1275_v51 = vrot.slane %v6440_v31, 4  ;;  %v4879_v55 = vunpack.c.h.bf16 %v6478_v52 }
 0x1b7   : > { %v1279_v2 = vrot.slane %v1277_v0, 7  ;;  %v1293_v0 = vld [vmem:[#allocation2 + $0xd4] sm:$0x1] }
 0x1b8   : > { %v2172_v23 = vadd.f32 %v6457_v39, %v1963_v20  ;;  %v7639_v39 = vrot.slane %v6528_v49, 1  ;;  %4518 = vmatmul.msk.f32.gmra.mxu3 %vm1394_vm8, %v4879_v55 }
 0x1b9   : > { %v1282_v20 = vor.u32 %v1280_v1, %v1279_v2  ;;  %v1284_v31 = vrot.slane %v1279_v2, 4  ;;  %v1812_v2 = vrot.slane %v6520_v57, 1 }
 0x1ba   : > { %v2608_v8 = vadd.f32 %v5937_v4, %v2172_v23  ;;  %v2714_v45 = vsel %vm1780_vm10, %v2712_v44, %v7639_v39  ;;  %v2753_v4 = vrot.slane %v6516_v24, 1  ;;  %4507 = vmatmul.msk.f32.gmra.mxu2 %vm1394_vm8, %v4858_v58 }
 0x1bb   : > { %2094 = vrot.lane.b32.xlu2 %v2022_v63, %s5043_s28  ;;  %2994 = vrot.lane.b32.xlu0 %v2922_v26, %s5043_s28  ;;  %v2960_v63 = vrot.slane %v6487_v56, 2  ;;  %v2961_v26 = vrot.slane %v6516_v24, 2  ;;  %v1283_v44 = vsel %vm5205_vm7, %v1275_v51, %v1282_v20  ;;  %v1294_v1 = vsel %vm5128_vm2, %v1284_v31, %v1293_v0  ;;  %v6585_v51 = vpop.f32.mrf.mxu3 }
 0x1bc   : > { %v2864_v23 = vadd.f32 %v2775_v42, %v2608_v8  ;;  %2786 = vrot.lane.b32.xlu1 %v2714_v45, %s5044_s29  ;;  %v1811_v8 = vrot.slane %v6494_v22, 1  ;;  %1292 = vst.msk [vmem:[#allocation2 + $0xd0] sm:$0xf] %vm478_vm3, %v1283_v44  ;;  %v3613_v31 = vrot.slane %v6549_v33, 1  ;;  %v2023_v44 = vrot.slane %v1616_v6, 2 }
 0x1bd   : > { %v6571_v36 = vpop.permute.xlu2 %3885  ;;  %v1922_v14 = vpop.permute.xlu0 %1921  ;;  %1295 = vst [vmem:[#allocation2 + $0xd4] sm:$0x1] %v1294_v1 }
 0x1be   : > { %7640 = vst [vmem:[#allocation71_spill] sm:$0xff] %v6571_v36  ;;  %v3072_v42 = vadd.f32 %v6513_v47, %v2864_v23  ;;  %v2985_v52 = vpop.permute.xlu1 %2984  ;;  %v1987_v39 = vadd.f32 %v1922_v14, %v6005_v7  ;;  %v2754_v47 = vsel %vm1780_vm10, %v2752_v28, %v2753_v4  ;;  %v2962_v14 = vsel %vm1989_vm9, %v2960_v63, %v2961_v26  ;;  %v6594_v7 = vpop.f32.mrf.mxu2 }
 0x1bf   : > { %v1813_v20 = vsel %vm1780_vm10, %v1811_v8, %v1812_v2  ;;  %v3614_v0 = vrot.slane %v6594_v7, 1  ;;  %v4859_v23 = vunpack.c.h.bf16 %v4962_v48 }
 0x1c0   : > { %v2196_v25 = vadd.f32 %v6482_v30, %v1987_v39  ;;  %v3509_v45 = vadd.f32 %v5964_v60, %v3072_v42  ;;  %v2518_v60 = vpop.f32.mrf.mxu1 }
 0x1c1   : > { %v2923_v42 = vrot.slane %v2518_v60, 2 }
 0x1c2   : > { %v6602_v30 = vadd.f32 %v6585_v51, %v2196_v25  ;;  %v3765_v28 = vadd.f32 %v6511_v15, %v3509_v45  ;;  %4508 = vmatmul.msk.f32.gmra.mxu2 %vm1394_vm8, %v4859_v23  ;;  %v3615_v25 = vsel %vm1780_vm10, %v3613_v31, %v3614_v0 }
 0x1c3   : > { %2818 = vrot.lane.b32.xlu2 %v2754_v47, %s5044_s29  ;;  %1885 = vrot.lane.b32.xlu0 %v1813_v20, %s5044_s29  ;;  %v6617_v47 = vpop.f32.mrf.mxu0  ;;  %v6630_v31 = vpop.f32.mrf.mxu3 }
 0x1c4   : > { %3026 = vrot.lane.b32.xlu1 %v2962_v14, %s5043_s28  ;;  %v6610_v63 = vadd.f32 %v3884_v13, %v3765_v28  ;;  %v4968_v8 = vld [vmem:[#allocation2 + $0xd0] sm:$0xff]   ;;  %v7642_v13 = vrot.slane %v6520_v57, 2  ;;  %v5017_v14 = vld [vmem:[#allocation2 + $0x98] sm:$0xff]  }
 0x1c5   : > { %v6608_v58 = vpop.permute.xlu2 %2986  ;;  %v2085_v55 = vpop.permute.xlu0 %2084  ;;  %v4882_v39 = vunpack.c.l.bf16 %v4968_v8  ;;  %v4766_v20 = vunpack.c.l.bf16 %v5017_v14 }
 0x1c6   : > { %7641 = vst [vmem:[#allocation72_spill] sm:$0xff] %v6610_v63  ;;  %v1876_v1 = vpop.permute.xlu1 %1875  ;;  %v2024_v45 = vsel %vm1989_vm9, %v7642_v13, %v2023_v44 }
 0x1c7   : > { %v1964_v15 = vadd.f32 %v1876_v1, %v6016_v18  ;;  %4519 = vmatmul.msk.f32.gmra.mxu3 %vm1394_vm8, %v4882_v39  ;;  %v7643_v18 = vrot.slane %v6528_v49, 2  ;;  %4458 = vmatmul.msk.f32.gmra.mxu1 %vm1394_vm8, %v4766_v20  ;;  %v2755_v39 = vrot.slane %v6544_v17, 1  ;;  %v7644_v20 = vrot.slane %v6528_v49, 1 }
 0x1c9   : > { %v2173_v48 = vadd.f32 %v2085_v55, %v1964_v15  ;;  %v2924_v23 = vsel %vm1989_vm9, %v7643_v18, %v2923_v42  ;;  %v4883_v15 = vunpack.c.h.bf16 %v4968_v8  ;;  %v6638_v18 = vpop.f32.mrf.mxu1 }
 0x1cb   : > { %v2609_v28 = vadd.f32 %v5982_v5, %v2173_v48  ;;  %3687 = vrot.lane.b32.xlu2 %v3615_v25, %s5044_s29  ;;  %2096 = vrot.lane.b32.xlu0 %v2024_v45, %s5043_s28  ;;  %v2715_v5 = vrot.slane %v2518_v60, 1  ;;  %v1814_v48 = vrot.slane %v1616_v6, 1  ;;  %v6636_v45 = vpop.f32.mrf.mxu2  ;;  %v2756_v60 = vsel %vm1780_vm10, %v2753_v4, %v2755_v39  ;;  %v6647_v8 = vpop.f32.mrf.mxu0 }
 0x1cc   : > { %2996 = vrot.lane.b32.xlu1 %v2924_v23, %s5043_s28  ;;  %v1981_v4 = vadd.f32 %v6031_v43, %v5527_v53  ;;  %v2025_v23 = vrot.slane %v6617_v47, 2  ;;  %v3616_v39 = vrot.slane %v6636_v45, 1 }
 0x1cd   : > { %v1878_v55 = vpop.permute.xlu2 %1877  ;;  %v2133_v44 = vpop.permute.xlu0 %2132  ;;  %v2865_v1 = vadd.f32 %v6539_v37, %v2609_v28  ;;  %v2716_v37 = vsel %vm1780_vm10, %v7644_v20, %v2715_v5 }
 0x1ce   : > { %v1924_v25 = vpop.permute.xlu1 %1923  ;;  %v6659_v28 = vpop.f32.mrf.mxu3  ;;  %v1965_v5 = vadd.f32 %v1878_v55, %v6123_v16  ;;  %v2190_v53 = vadd.f32 %v5924_v62, %v1981_v4  ;;  %v3617_v16 = vsel %vm1780_vm10, %v3614_v0, %v3616_v39 }
 0x1cf   : > { %v1988_v42 = vadd.f32 %v1924_v25, %v6066_v12  ;;  %v3073_v13 = vadd.f32 %v2985_v52, %v2865_v1  ;;  %4520 = vmatmul.msk.f32.gmra.mxu3 %vm1394_vm8, %v4883_v15  ;;  %v1815_v12 = vsel %vm1780_vm10, %v1812_v2, %v1814_v48  ;;  %v7515_v15 = vrot.slane %v6647_v8, 2 }
 0x1d0   : > { %v2963_v2 = vrot.slane %v6544_v17, 2  ;;  %v2626_v0 = vadd.f32 %v6174_v61, %v2190_v53 }
 0x1d1   : > { %v2197_v14 = vadd.f32 %v2133_v44, %v1988_v42  ;;  %v3510_v6 = vadd.f32 %v6013_v38, %v3073_v13  ;;  %v2027_v43 = vsel %vm1989_vm9, %v2025_v23, %v7515_v15  ;;  %v6684_v55 = vpop.f32.mrf.mxu1  ;;  %v2757_v13 = vrot.slane %v6585_v51, 1 }
 0x1d2   : > { %v2964_v17 = vsel %vm1989_vm9, %v2961_v26, %v2963_v2  ;;  %v7514_v26 = vrot.slane %v6630_v31, 1 }
 0x1d3   : > { %2788 = vrot.lane.b32.xlu2 %v2716_v37, %s5044_s29  ;;  %2820 = vrot.lane.b32.xlu0 %v2756_v60, %s5044_s29  ;;  %v6655_v52 = vadd.f32 %v6630_v31, %v2197_v14  ;;  %v6672_v42 = vpop.f32.mrf.mxu2  ;;  %v2717_v14 = vrot.slane %v6638_v18, 1  ;;  %v2925_v60 = vrot.slane %v6638_v18, 2 }
 0x1d4   : > { %1887 = vrot.lane.b32.xlu1 %v1815_v12, %s5044_s29  ;;  %v2718_v12 = vrot.slane %v6684_v55, 1 }
 0x1d5   : > { %v6664_v44 = vpop.permute.xlu2 %2088  ;;  %v3678_v1 = vpop.permute.xlu0 %3677 }
 0x1d6   : > { %v6670_v25 = vadd.f32 %v3678_v1, %v3510_v6  ;;  %v2087_v38 = vpop.permute.xlu1 %2086  ;;  %v2926_v6 = vrot.slane %v6684_v55, 2  ;;  %v6699_v1 = vpop.f32.mrf.mxu3  ;;  %v2719_v61 = vsel %vm1780_vm10, %v2717_v14, %v2718_v12  ;;  %v1817_v14 = vrot.slane %v6647_v8, 1 }
 0x1d7   : > { %v2174_v48 = vadd.f32 %v2087_v38, %v1965_v5  ;;  %v2759_v5 = vsel %vm1780_vm10, %v2757_v13, %v7514_v26  ;;  %v2966_v13 = vrot.slane %v6630_v31, 2 }
 0x1d8   : > { %7645 = vst [vmem:[#allocation73_spill] sm:$0xff] %v6670_v25  ;;  %v2927_v39 = vsel %vm1989_vm9, %v2925_v60, %v2926_v6 }
 0x1d9   : > { %v2610_v62 = vadd.f32 %v6153_v41, %v2174_v48  ;;  %v2965_v48 = vrot.slane %v6585_v51, 2 }
 0x1db   : > { %3028 = vrot.lane.b32.xlu2 %v2964_v17, %s5043_s28  ;;  %3689 = vrot.lane.b32.xlu0 %v3617_v16, %s5044_s29  ;;  %v6707_v38 = vpop.f32.mrf.mxu2 }
 0x1dc   : > { %2098 = vrot.lane.b32.xlu1 %v2027_v43, %s5043_s28  ;;  %v7513_v16 = vrot.slane %v6707_v38, 1 }
 0x1dd   : > { %v6693_v20 = vpop.permute.xlu2 %2812  ;;  %v2779_v37 = vpop.permute.xlu0 %2778 }
 0x1de   : > { %v2866_v4 = vadd.f32 %v2779_v37, %v2610_v62  ;;  %v2811_v23 = vpop.permute.xlu1 %2810  ;;  %v1816_v62 = vrot.slane %v6617_v47, 1  ;;  %v6721_v51 = vpop.f32.mrf.mxu3 }
 0x1df   : > { %v2882_v41 = vadd.f32 %v2811_v23, %v2626_v0  ;;  %v2527_v23 = vpop.f32.mrf.mxu1 }
 0x1e0   : > { %v3074_v2 = vadd.f32 %v6608_v58, %v2866_v4  ;;  %v3618_v58 = vrot.slane %v6672_v42, 1  ;;  %v1625_v4 = vpop.f32.mrf.mxu0  ;;  %v2720_v26 = vrot.slane %v2527_v23, 1 }
 0x1e2   : > { %v3511_v17 = vadd.f32 %v6142_v29, %v3074_v2  ;;  %v3851_v29 = vrot.slane %v6699_v1, 2  ;;  %v3620_v2 = vsel %vm1780_vm10, %v3618_v58, %v7513_v16  ;;  %v2028_v16 = vrot.slane %v1625_v4, 2 }
 0x1e3   : > { %2998 = vrot.lane.b32.xlu2 %v2927_v39, %s5043_s28  ;;  %2790 = vrot.lane.b32.xlu0 %v2719_v61, %s5044_s29  ;;  %v3852_v39 = vrot.slane %v6721_v51, 2  ;;  %v1818_v61 = vsel %vm1780_vm10, %v1816_v62, %v1817_v14 }
 0x1e4   : > { %2822 = vrot.lane.b32.xlu1 %v2759_v5, %s5044_s29 }
 0x1e5   : > { %v6714_v53 = vpop.permute.xlu2 %3681  ;;  %v3019_v43 = vpop.permute.xlu0 %3018  ;;  %v6741_v58 = vsel %vm1989_vm9, %v3851_v29, %v3852_v39  ;;  %v7648_v29 = vrot.slane %v6647_v8, 2 }
 0x1e6   : > { %v3090_v37 = vadd.f32 %v3019_v43, %v2882_v41  ;;  %v3680_v0 = vpop.permute.xlu1 %3679  ;;  %v2967_v41 = vsel %vm1989_vm9, %v2965_v48, %v2966_v13  ;;  %v1982_v43 = vadd.f32 %v6069_v27, %v5576_v19  ;;  %7646 = vst [vmem:[#allocation74_spill] sm:$0xff] %v6741_v58 }
 0x1e7   : > { %v3767_v60 = vadd.f32 %v3680_v0, %v3511_v17  ;;  %v2928_v0 = vrot.slane %v2527_v23, 2  ;;  %v6750_v15 = vpop.f32.mrf.mxu1  ;;  %v2029_v36 = vsel %vm1989_vm9, %v7648_v29, %v2028_v16 }
 0x1e8   : > { %v6724_v5 = vadd.f32 %v6699_v1, %v3090_v37  ;;  %v6753_v27 = vpop.f32.mrf.mxu0 }
 0x1eb   : > { %1889 = vrot.lane.b32.xlu2 %v1818_v61, %s5044_s29  ;;  %3030 = vrot.lane.b32.xlu0 %v2967_v41, %s5043_s28  ;;  %v2191_v61 = vadd.f32 %v6147_v40, %v1982_v43  ;;  %v6746_v41 = vpop.f32.mrf.mxu2  ;;  %v2721_v40 = vsel %vm1780_vm10, %v2718_v12, %v2720_v26  ;;  %v7650_v12 = vrot.slane %v6630_v31, 1 }
 0x1ec   : > { %3691 = vrot.lane.b32.xlu1 %v3620_v2, %s5044_s29  ;;  %v6748_v2 = vpop.f32.mrf.mxu3 }
 0x1ed   : > { %v6738_v17 = vpop.permute.xlu2 %2782  ;;  %v3888_v37 = vpop.permute.xlu0 %3887  ;;  %v3854_v19 = vrot.slane %v6748_v2, 2 }
 0x1ee   : > { %v6743_v62 = vadd.f32 %v3888_v37, %v3767_v60  ;;  %v2781_v48 = vpop.permute.xlu1 %2780  ;;  %v2929_v60 = vsel %vm1989_vm9, %v2926_v6, %v2928_v0  ;;  %v2627_v37 = vadd.f32 %v6210_v21, %v2191_v61  ;;  %v2760_v6 = vrot.slane %v6659_v28, 1 }
 0x1ef   : > { %v6765_v23 = vsel %vm1989_vm9, %v3852_v39, %v3854_v19  ;;  %v1819_v0 = vrot.slane %v1625_v4, 1  ;;  %v6781_v19 = vpop.f32.mrf.mxu1  ;;  %v2930_v4 = vrot.slane %v6750_v15, 2 }
 0x1f0   : > { %7647 = vst [vmem:[#allocation75_spill] sm:$0xff] %v6743_v62  ;;  %v2883_v43 = vadd.f32 %v6693_v20, %v2627_v37  ;;  %v2761_v39 = vsel %vm1780_vm10, %v7650_v12, %v2760_v6 }
 0x1f1   : > { %7649 = vst [vmem:[#allocation76_spill] sm:$0xff] %v6765_v23  ;;  %v1820_v20 = vsel %vm1780_vm10, %v1817_v14, %v1819_v0  ;;  %v2030_v14 = vrot.slane %v6753_v27, 2 }
 0x1f3   : > { %2100 = vrot.lane.b32.xlu2 %v2029_v36, %s5043_s28  ;;  %3000 = vrot.lane.b32.xlu0 %v2929_v60, %s5043_s28  ;;  %v2968_v36 = vrot.slane %v6659_v28, 2  ;;  %v6772_v29 = vpop.f32.mrf.mxu2  ;;  %v6783_v60 = vpop.f32.mrf.mxu0 }
 0x1f4   : > { %2792 = vrot.lane.b32.xlu1 %v2721_v40, %s5044_s29  ;;  %v7516_v40 = vrot.slane %v6781_v19, 2  ;;  %v7518_v6 = vrot.slane %v6783_v60, 2 }
 0x1f5   : > { %v6768_v62 = vpop.permute.xlu2 %3022  ;;  %v2989_v16 = vpop.permute.xlu0 %2988  ;;  %v2969_v28 = vsel %vm1989_vm9, %v2966_v13, %v2968_v36 }
 0x1f6   : > { %v3021_v21 = vpop.permute.xlu1 %3020  ;;  %v2932_v36 = vsel %vm1989_vm9, %v2930_v4, %v7516_v40 }
 0x1f7   : > { %v3091_v61 = vadd.f32 %v3021_v21, %v2883_v43  ;;  %v3621_v43 = vrot.slane %v6746_v41, 1 }
 0x1f9   : > { %v6775_v26 = vadd.f32 %v6721_v51, %v3091_v61  ;;  %v6801_v61 = vpop.f32.mrf.mxu3 }
 0x1fb   : > { %2824 = vrot.lane.b32.xlu2 %v2761_v39, %s5044_s29  ;;  %1891 = vrot.lane.b32.xlu0 %v1820_v20, %s5044_s29  ;;  %v7652_v39 = vrot.slane %v6707_v38, 1 }
 0x1fc   : > { %3032 = vrot.lane.b32.xlu1 %v2969_v28, %s5043_s28  ;;  %v2032_v28 = vsel %vm1989_vm9, %v2030_v14, %v7518_v6  ;;  %v3644_v6 = vrot.slane %v6721_v51, 1 }
 0x1fd   : > { %v6790_v37 = vpop.permute.xlu2 %3891  ;;  %v1880_v31 = vpop.permute.xlu0 %1879  ;;  %v3622_v20 = vsel %vm1780_vm10, %v7652_v39, %v3621_v43  ;;  %v3623_v43 = vrot.slane %v6772_v29, 1 }
 0x1fe   : > { %7651 = vst [vmem:[#allocation77_spill] sm:$0xff] %v6790_v37  ;;  %v3890_v0 = vpop.permute.xlu1 %3889  ;;  %v1966_v13 = vadd.f32 %v1880_v31, %v6164_v11  ;;  %v6810_v37 = vpop.f32.mrf.mxu2 }
 0x200   : > { %v2175_v21 = vadd.f32 %v6664_v44, %v1966_v13  ;;  %v2722_v44 = vrot.slane %v6750_v15, 1  ;;  %v2723_v13 = vrot.slane %v6781_v19, 1 }
 0x202   : > { %v2611_v12 = vadd.f32 %v6206_v9, %v2175_v21  ;;  %v1983_v9 = vadd.f32 %v6108_v3, %v5674_v32  ;;  %v7517_v21 = vrot.slane %v6810_v37, 1  ;;  %v3856_v3 = vrot.slane %v6801_v61, 2 }
 0x203   : > { %3693 = vrot.lane.b32.xlu2 %v3622_v20, %s5044_s29  ;;  %2102 = vrot.lane.b32.xlu0 %v2032_v28, %s5043_s28  ;;  %v6828_v28 = vpop.f32.mrf.mxu3 }
 0x204   : > { %v2867_v11 = vadd.f32 %v2781_v48, %v2611_v12  ;;  %3002 = vrot.lane.b32.xlu1 %v2932_v36, %s5043_s28  ;;  %v1821_v48 = vrot.slane %v6753_v27, 1  ;;  %v7519_v36 = vrot.slane %v6783_v60, 1  ;;  %v2536_v12 = vpop.f32.mrf.mxu1  ;;  %v2192_v32 = vadd.f32 %v6188_v34, %v1983_v9  ;;  %v6841_v9 = vpop.f32.mrf.mxu0 }
 0x205   : > { %v6818_v4 = vpop.permute.xlu2 %2992  ;;  %v2091_v31 = vpop.permute.xlu0 %2090  ;;  %v3857_v40 = vrot.slane %v6828_v28, 2 }
 0x206   : > { %v3075_v14 = vadd.f32 %v2989_v16, %v2867_v11  ;;  %v2991_v39 = vpop.permute.xlu1 %2990  ;;  %v2724_v16 = vsel %vm1780_vm10, %v2722_v44, %v2723_v13  ;;  %v3625_v11 = vsel %vm1780_vm10, %v3623_v43, %v7517_v21  ;;  %v1823_v34 = vsel %vm1780_vm10, %v1821_v48, %v7519_v36 }
 0x207   : > { %v2628_v44 = vadd.f32 %v6378_v46, %v2192_v32  ;;  %v6846_v43 = vsel %vm1989_vm9, %v3856_v3, %v3857_v40  ;;  %v2725_v48 = vrot.slane %v2536_v12, 1 }
 0x208   : > { %v3512_v20 = vadd.f32 %v6192_v35, %v3075_v14  ;;  %7653 = vst [vmem:[#allocation78_spill] sm:$0xff] %v6846_v43 }
 0x20a   : > { %v3768_v35 = vadd.f32 %v6714_v53, %v3512_v20  ;;  %v2033_v20 = vrot.slane %v6841_v9, 2 }
 0x20b   : > { %2794 = vrot.lane.b32.xlu2 %v2724_v16, %s5044_s29  ;;  %3695 = vrot.lane.b32.xlu0 %v3625_v11, %s5044_s29  ;;  %v3643_v11 = vrot.slane %v6699_v1, 1  ;;  %v6857_v25 = vpop.f32.mrf.mxu3  ;;  %v2726_v1 = vsel %vm1780_vm10, %v2723_v13, %v2725_v48 }
 0x20c   : > { %1893 = vrot.lane.b32.xlu1 %v1823_v34, %s5044_s29  ;;  %v6848_v16 = vadd.f32 %v3890_v0, %v3768_v35  ;;  %v6855_v3 = vpop.f32.mrf.mxu1  ;;  %v3859_v51 = vrot.slane %v6857_v25, 2  ;;  %v6876_v13 = vpop.f32.mrf.mxu0 }
 0x20d   : > { %v1884_v14 = vpop.permute.xlu2 %1883  ;;  %v2815_v21 = vpop.permute.xlu0 %2814  ;;  %7655 = vst [vmem:[#allocation80_spill] sm:$0xff] %v6855_v3  ;;  %v3645_v0 = vsel %vm1780_vm10, %v3643_v11, %v3644_v6  ;;  %v7660_v11 = vld [vmem:[#allocation52_spill] sm:$0xff] }
 0x20e   : > { %7654 = vst [vmem:[#allocation79_spill] sm:$0xff] %v6848_v16  ;;  %v2884_v36 = vadd.f32 %v2815_v21, %v2628_v44  ;;  %v1882_v53 = vpop.permute.xlu1 %1881  ;;  %v6879_v44 = vsel %vm1989_vm9, %v3857_v40, %v3859_v51  ;;  %v7662_v40 = vld [vmem:[#allocation61_spill] sm:$0xff]  ;;  %v7663_v16 = vld [vmem:[#allocation38_spill] sm:$0xff] }
 0x20f   : > { %v1967_v34 = vadd.f32 %v1882_v53, %v6332_v54  ;;  %v7657_v54 = vrot.slane %v6783_v60, 2  ;;  %7658 = vst [vmem:[#allocation82_spill] sm:$0xff] %v6879_v44  ;;  %v7661_v53 = vld [vmem:[#allocation59_spill] sm:$0xff] }
 0x210   : > { %v3092_v46 = vadd.f32 %v6768_v62, %v2884_v36  ;;  %v6873_v36 = vpop.f32.mrf.mxu2 }
 0x211   : > { %v2176_v32 = vadd.f32 %v2091_v31, %v1967_v34  ;;  %v2034_v62 = vsel %vm1989_vm9, %v7657_v54, %v2033_v20  ;;  %v1985_v31 = vadd.f32 %v6404_v10, %v5803_v59  ;;  %v1968_v34 = vadd.f32 %v1884_v14, %v7661_v53 }
 0x212   : > { %v6863_v21 = vadd.f32 %v6801_v61, %v3092_v46  ;;  %v2933_v59 = vrot.slane %v2536_v12, 2  ;;  %v3646_v10 = vrot.slane %v6748_v2, 1  ;;  %v7665_v14 = vrot.slane %v6781_v19, 2 }
 0x213   : > { %v2612_v35 = vadd.f32 %v6329_v50, %v2176_v32  ;;  %3711 = vrot.lane.b32.xlu2 %v3645_v0, %s5044_s29  ;;  %2796 = vrot.lane.b32.xlu0 %v2726_v1, %s5044_s29  ;;  %v7659_v50 = vld [vmem:[#allocation14_spill] sm:$0xff]  ;;  %v3626_v1 = vrot.slane %v6873_v36, 1  ;;  %v2194_v51 = vadd.f32 %v7662_v40, %v1985_v31 }
 0x214   : > { %7656 = vst [vmem:[#allocation81_spill] sm:$0xff] %v6863_v21  ;;  %2104 = vrot.lane.b32.xlu1 %v2034_v62, %s5043_s28  ;;  %v1984_v48 = vadd.f32 %v7660_v11, %v7659_v50  ;;  %v7664_v50 = vld [vmem:[#allocation46_spill] sm:$0xff]  ;;  %v2934_v53 = vsel %vm1989_vm9, %v7665_v14, %v2933_v59 }
 0x215   : > { %v6884_v46 = vpop.permute.xlu2 %2094  ;;  %v3684_v20 = vpop.permute.xlu0 %3683  ;;  %v2868_v32 = vadd.f32 %v6738_v17, %v2612_v35  ;;  %v3647_v17 = vsel %vm1780_vm10, %v3644_v6, %v3646_v10  ;;  %v2630_v31 = vadd.f32 %v6487_v56, %v2194_v51  ;;  %v7669_v10 = vld [vmem:[#allocation62_spill] sm:$0xff] }
 0x216   : > { %v2093_v0 = vpop.permute.xlu1 %2092  ;;  %v2193_v63 = vadd.f32 %v7663_v16, %v1984_v48  ;;  %v6900_v35 = vpop.f32.mrf.mxu1  ;;  %v7668_v48 = vld [vmem:[#allocation58_spill] sm:$0xff] }
 0x217   : > { %v3076_v54 = vadd.f32 %v2991_v39, %v2868_v32  ;;  %v2177_v62 = vadd.f32 %v2093_v0, %v1968_v34  ;;  %v7667_v39 = vrot.slane %v6810_v37, 1  ;;  %v2936_v40 = vrot.slane %v6900_v35, 2  ;;  %v6918_v51 = vpop.f32.mrf.mxu0 }
 0x218   : > { %v6896_v12 = vpop.f32.mrf.mxu3  ;;  %v6910_v34 = vpop.f32.mrf.mxu2  ;;  %v2629_v0 = vadd.f32 %v7669_v10, %v2193_v63  ;;  %7670 = vst [vmem:[#allocation52_spill] sm:$0xff] %v6918_v51  ;;  %v7672_v10 = vld [vmem:[#allocation50_spill] sm:$0xff] }
 0x219   : > { %v3513_v11 = vadd.f32 %v7664_v50, %v3076_v54  ;;  %v3627_v16 = vsel %vm1780_vm10, %v7667_v39, %v3626_v1  ;;  %v2613_v6 = vadd.f32 %v7668_v48, %v2177_v62  ;;  %v2935_v54 = vrot.slane %v6855_v3, 2 }
 0x21a   : > { %v2727_v62 = vrot.slane %v6855_v3, 1  ;;  %v3861_v39 = vrot.slane %v6896_v12, 2 }
 0x21b   : > { %v6898_v2 = vadd.f32 %v3684_v20, %v3513_v11  ;;  %3004 = vrot.lane.b32.xlu2 %v2934_v53, %s5043_s28  ;;  %3713 = vrot.lane.b32.xlu0 %v3647_v17, %s5044_s29  ;;  %v1824_v20 = vrot.slane %v6841_v9, 1  ;;  %v7520_v11 = vrot.slane %v6900_v35, 1  ;;  %v7671_v53 = vrot.slane %v6783_v60, 1 }
 0x21c   : > { %3697 = vrot.lane.b32.xlu1 %v3627_v16, %s5044_s29  ;;  %v2937_v17 = vsel %vm1989_vm9, %v2935_v54, %v2936_v40  ;;  %v7521_v54 = vrot.slane %v6828_v28, 1 }
 0x21d   : > { %7666 = vst [vmem:[#allocation14_spill] sm:$0xff] %v6898_v2  ;;  %v2819_v32 = vpop.permute.xlu2 %2818  ;;  %v2785_v59 = vpop.permute.xlu0 %2784  ;;  %v1825_v63 = vsel %vm1780_vm10, %v7671_v53, %v1824_v20  ;;  %v2035_v20 = vrot.slane %v6876_v13, 2 }
 0x21e   : > { %v6916_v50 = vadd.f32 %v2819_v32, %v2630_v31  ;;  %v2869_v1 = vadd.f32 %v2785_v59, %v2613_v6  ;;  %v2817_v56 = vpop.permute.xlu1 %2816  ;;  %v2729_v31 = vsel %vm1780_vm10, %v2727_v62, %v7520_v11  ;;  %v1826_v6 = vrot.slane %v6876_v13, 1 }
 0x21f   : > { %v2885_v14 = vadd.f32 %v2817_v56, %v2629_v0  ;;  %v2036_v56 = vrot.slane %v6918_v51, 2 }
 0x220   : > { %v3077_v9 = vadd.f32 %v6818_v4, %v2869_v1  ;;  %v6928_v16 = vpop.f32.mrf.mxu3  ;;  %v3648_v4 = vrot.slane %v6801_v61, 1  ;;  %v1827_v1 = vrot.slane %v6918_v51, 1  ;;  %v6946_v53 = vpop.f32.mrf.mxu2 }
 0x221   : > { %v3862_v48 = vrot.slane %v6928_v16, 2  ;;  %v2037_v2 = vsel %vm1989_vm9, %v2035_v20, %v2036_v56 }
 0x222   : > { %v3514_v0 = vadd.f32 %v7672_v10, %v3077_v9  ;;  %v2545_v9 = vpop.f32.mrf.mxu1  ;;  %v3650_v10 = vsel %vm1780_vm10, %v3648_v4, %v7521_v54  ;;  %v3628_v4 = vrot.slane %v6910_v34, 1 }
 0x223   : > { %1895 = vrot.lane.b32.xlu2 %v1825_v63, %s5044_s29  ;;  %3006 = vrot.lane.b32.xlu0 %v2937_v17, %s5043_s28  ;;  %v6949_v63 = vsel %vm1989_vm9, %v3861_v39, %v3862_v48  ;;  %v2730_v44 = vrot.slane %v2545_v9, 1 }
 0x224   : > { %2798 = vrot.lane.b32.xlu1 %v2729_v31, %s5044_s29  ;;  %7673 = vst [vmem:[#allocation59_spill] sm:$0xff] %v6949_v63  ;;  %v1643_v31 = vpop.f32.mrf.mxu0 }
 0x225   : > { %v6940_v32 = vpop.permute.xlu2 %3687  ;;  %v3025_v59 = vpop.permute.xlu0 %3024  ;;  %v2038_v20 = vrot.slane %v1643_v31, 2  ;;  %v1829_v3 = vrot.slane %v1643_v31, 1 }
 0x226   : > { %v3093_v61 = vadd.f32 %v3025_v59, %v2885_v14  ;;  %v3686_v62 = vpop.permute.xlu1 %3685  ;;  %v1828_v14 = vsel %vm1780_vm10, %v1826_v6, %v1827_v1  ;;  %v3629_v6 = vrot.slane %v6946_v53, 1 }
 0x227   : > { %v6951_v17 = vadd.f32 %v3686_v62, %v3514_v0  ;;  %v2039_v51 = vsel %vm1989_vm9, %v2036_v56, %v2038_v20 }
 0x228   : > { %v6954_v11 = vadd.f32 %v6828_v28, %v3093_v61 }
 0x229   : > { %7674 = vst [vmem:[#allocation61_spill] sm:$0xff] %v6951_v17  ;;  %v6961_v59 = vpop.f32.mrf.mxu3  ;;  %v2938_v17 = vrot.slane %v2545_v9, 2 }
 0x22a   : > { %v3864_v39 = vrot.slane %v6961_v59, 2  ;;  %v6978_v63 = vpop.f32.mrf.mxu1 }
 0x22b   : > { %2106 = vrot.lane.b32.xlu2 %v2037_v2, %s5043_s28  ;;  %1897 = vrot.lane.b32.xlu0 %v1828_v14, %s5044_s29  ;;  %v6974_v2 = vpop.f32.mrf.mxu2 }
 0x22c   : > { %3715 = vrot.lane.b32.xlu1 %v3650_v10, %s5044_s29  ;;  %v6970_v62 = vsel %vm1989_vm9, %v3862_v48, %v3864_v39  ;;  %v6976_v14 = vpop.f32.mrf.mxu0  ;;  %v3630_v10 = vsel %vm1780_vm10, %v3628_v4, %v3629_v6  ;;  %v2939_v48 = vsel %vm1989_vm9, %v2936_v40, %v2938_v17  ;;  %v3631_v43 = vrot.slane %v6974_v2, 1 }
 0x22d   : > { %v6967_v0 = vpop.permute.xlu2 %2788  ;;  %v2995_v61 = vpop.permute.xlu0 %2994  ;;  %7675 = vst [vmem:[#allocation38_spill] sm:$0xff] %v6970_v62 }
 0x22e   : > { %v2787_v54 = vpop.permute.xlu1 %2786 }
 0x233   : > { %3699 = vrot.lane.b32.xlu2 %v3630_v10, %s5044_s29  ;;  %2108 = vrot.lane.b32.xlu0 %v2039_v51, %s5043_s28  ;;  %v6990_v20 = vpop.f32.mrf.mxu2  ;;  %v7676_v51 = vld [vmem:[#allocation70_spill] sm:$0xff]  ;;  %v7677_v10 = vrot.slane %v6900_v35, 1 }
 0x234   : > { %3008 = vrot.lane.b32.xlu1 %v2939_v48, %s5043_s28  ;;  %v3632_v48 = vsel %vm1780_vm10, %v3629_v6, %v3631_v43  ;;  %v7000_v21 = vpop.f32.mrf.mxu0 }
 0x235   : > { %v3029_v39 = vpop.permute.xlu2 %3028  ;;  %v1886_v62 = vpop.permute.xlu0 %1885  ;;  %v2731_v9 = vsel %vm1780_vm10, %v7677_v10, %v2730_v44  ;;  %7678 = vst [vmem:[#allocation46_spill] sm:$0xff] %v7000_v21  ;;  %v2040_v44 = vrot.slane %v6976_v14, 2  ;;  %v7524_v6 = vrot.slane %v7000_v21, 2 }
 0x236   : > { %v3027_v23 = vpop.permute.xlu1 %3026  ;;  %v1969_v58 = vadd.f32 %v1886_v62, %v6494_v22  ;;  %v7002_v22 = vpop.f32.mrf.mxu1 }
 0x237   : > { %v3094_v4 = vadd.f32 %v3027_v23, %v6916_v50  ;;  %7679 = vst [vmem:[#allocation58_spill] sm:$0xff] %v7002_v22  ;;  %v7681_v50 = vld [vmem:[#allocation63_spill] sm:$0xff] }
 0x238   : > { %v2178_v56 = vadd.f32 %v6884_v46, %v1969_v58  ;;  %v1830_v58 = vsel %vm1780_vm10, %v1827_v1, %v1829_v3  ;;  %v7680_v46 = vld [vmem:[#allocation21_spill] sm:$0xff]  ;;  %v7682_v1 = vld [vmem:[#allocation67_spill] sm:$0xff] }
 0x239   : > { %v6993_v40 = vadd.f32 %v6896_v12, %v3094_v4  ;;  %v1986_v31 = vadd.f32 %v7681_v50, %v7680_v46  ;;  %v2732_v4 = vrot.slane %v6978_v63, 1 }
 0x23a   : > { %v2614_v17 = vadd.f32 %v7676_v51, %v2178_v56  ;;  %v3651_v56 = vrot.slane %v6857_v25, 1  ;;  %v7525_v51 = vrot.slane %v7002_v22, 1 }
 0x23b   : > { %2800 = vrot.lane.b32.xlu2 %v2731_v9, %s5044_s29  ;;  %3701 = vrot.lane.b32.xlu0 %v3632_v48, %s5044_s29  ;;  %v2042_v9 = vsel %vm1989_vm9, %v2040_v44, %v7524_v6  ;;  %v7683_v48 = vrot.slane %v6828_v28, 1  ;;  %v7028_v46 = vpop.f32.mrf.mxu2  ;;  %v7030_v50 = vpop.f32.mrf.mxu3 }
 0x23c   : > { %v2870_v23 = vadd.f32 %v2787_v54, %v2614_v17  ;;  %1899 = vrot.lane.b32.xlu1 %v1830_v58, %s5044_s29  ;;  %v2195_v17 = vadd.f32 %v7682_v1, %v1986_v31  ;;  %v2734_v25 = vsel %vm1780_vm10, %v2732_v4, %v7525_v51  ;;  %v3633_v31 = vrot.slane %v6990_v20, 1 }
 0x23d   : > { %v7011_v62 = vpop.permute.xlu2 %2998  ;;  %v2097_v43 = vpop.permute.xlu0 %2096  ;;  %v3652_v58 = vsel %vm1780_vm10, %v7683_v48, %v3651_v56  ;;  %v7526_v56 = vrot.slane %v7028_v46, 1  ;;  %v3653_v1 = vrot.slane %v6896_v12, 1  ;;  %v7527_v48 = vrot.slane %v6928_v16, 1 }
 0x23e   : > { %v2997_v3 = vpop.permute.xlu1 %2996  ;;  %v3078_v54 = vadd.f32 %v2995_v61, %v2870_v23  ;;  %v2631_v28 = vadd.f32 %v6516_v24, %v2195_v17  ;;  %v2940_v23 = vrot.slane %v6978_v63, 2  ;;  %v2554_v24 = vpop.f32.mrf.mxu1 }
 0x23f   : > { %v3635_v6 = vsel %vm1780_vm10, %v3633_v31, %v7526_v56  ;;  %v3655_v12 = vsel %vm1780_vm10, %v3653_v1, %v7527_v48 }
 0x240   : > { %v3515_v10 = vadd.f32 %v6549_v33, %v3078_v54  ;;  %v2941_v54 = vrot.slane %v7002_v22, 2 }
 0x242   : > { %v7035_v61 = vadd.f32 %v6940_v32, %v3515_v10  ;;  %v2942_v51 = vsel %vm1989_vm9, %v2940_v23, %v2941_v54 }
 0x243   : > { %3717 = vrot.lane.b32.xlu2 %v3652_v58, %s5044_s29  ;;  %2802 = vrot.lane.b32.xlu0 %v2734_v25, %s5044_s29  ;;  %v1652_v58 = vpop.f32.mrf.mxu0 }
 0x244   : > { %7684 = vst [vmem:[#allocation62_spill] sm:$0xff] %v7035_v61  ;;  %2110 = vrot.lane.b32.xlu1 %v2042_v9, %s5043_s28 }
 0x245   : > { %v1890_v44 = vpop.permute.xlu2 %1889  ;;  %v2821_v4 = vpop.permute.xlu0 %2820 }
 0x246   : > { %v2887_v32 = vadd.f32 %v2821_v4, %v2631_v28  ;;  %v1888_v10 = vpop.permute.xlu1 %1887 }
 0x247   : > { %v1970_v9 = vadd.f32 %v1888_v10, %v6520_v57  ;;  %v3866_v57 = vrot.slane %v7030_v50, 2 }
 0x248   : > { %v3095_v17 = vadd.f32 %v3029_v39, %v2887_v32  ;;  %v2943_v32 = vrot.slane %v2554_v24, 2 }
 0x249   : > { %v2179_v25 = vadd.f32 %v2097_v43, %v1970_v9  ;;  %v1971_v43 = vadd.f32 %v1890_v44, %v6617_v47  ;;  %v2735_v9 = vrot.slane %v2554_v24, 1  ;;  %v7075_v44 = vpop.f32.mrf.mxu1 }
 0x24a   : > { %v7054_v61 = vadd.f32 %v6928_v16, %v3095_v17  ;;  %v7061_v39 = vpop.f32.mrf.mxu3  ;;  %7686 = vst [vmem:[#allocation70_spill] sm:$0xff] %v7075_v44  ;;  %v2944_v56 = vsel %vm1989_vm9, %v2941_v54, %v2943_v32  ;;  %v2043_v32 = vrot.slane %v1652_v58, 2 }
 0x24b   : > { %v2615_v28 = vadd.f32 %v6528_v49, %v2179_v25  ;;  %3010 = vrot.lane.b32.xlu2 %v2942_v51, %s5043_s28  ;;  %3719 = vrot.lane.b32.xlu0 %v3655_v12, %s5044_s29  ;;  %v3867_v1 = vrot.slane %v7061_v39, 2  ;;  %v1831_v49 = vrot.slane %v6976_v14, 1  ;;  %v1832_v51 = vrot.slane %v7000_v21, 1  ;;  %v7070_v25 = vpop.f32.mrf.mxu2  ;;  %v7078_v12 = vpop.f32.mrf.mxu0 }
 0x24c   : > { %7685 = vst [vmem:[#allocation50_spill] sm:$0xff] %v7054_v61  ;;  %3703 = vrot.lane.b32.xlu1 %v3635_v6, %s5044_s29 }
 0x24d   : > { %v7064_v23 = vpop.permute.xlu2 %2100  ;;  %v3690_v31 = vpop.permute.xlu0 %3689  ;;  %v2871_v4 = vadd.f32 %v6967_v0, %v2615_v28  ;;  %v7073_v47 = vsel %vm1989_vm9, %v3866_v57, %v3867_v1  ;;  %7687 = vst [vmem:[#allocation21_spill] sm:$0xff] %v7078_v12  ;;  %v1833_v28 = vsel %vm1780_vm10, %v1831_v49, %v1832_v51 }
 0x24e   : > { %v2099_v10 = vpop.permute.xlu1 %2098 }
 0x24f   : > { %v3079_v17 = vadd.f32 %v2997_v3, %v2871_v4  ;;  %v2180_v6 = vadd.f32 %v2099_v10, %v1971_v43  ;;  %v7689_v3 = vrot.slane %v7002_v22, 1 }
 0x251   : > { %v3516_v0 = vadd.f32 %v6594_v7, %v3079_v17  ;;  %v2736_v24 = vsel %vm1780_vm10, %v7689_v3, %v2735_v9  ;;  %v2616_v57 = vadd.f32 %v6638_v18, %v2180_v6  ;;  %v7690_v3 = vrot.slane %v7000_v21, 2 }
 0x252   : > { %v7091_v43 = vpop.f32.mrf.mxu3 }
 0x253   : > { %v7082_v48 = vadd.f32 %v3690_v31, %v3516_v0  ;;  %1901 = vrot.lane.b32.xlu2 %v1833_v28, %s5044_s29  ;;  %3012 = vrot.lane.b32.xlu0 %v2944_v56, %s5043_s28  ;;  %v3869_v54 = vrot.slane %v7091_v43, 2  ;;  %v1834_v31 = vrot.slane %v1652_v58, 1  ;;  %v3656_v0 = vrot.slane %v6961_v59, 1  ;;  %v7101_v6 = vpop.f32.mrf.mxu2 }
 0x254   : > { %2804 = vrot.lane.b32.xlu1 %v2736_v24, %s5044_s29  ;;  %v2044_v24 = vsel %vm1989_vm9, %v7690_v3, %v2043_v32 }
 0x255   : > { %7688 = vst [vmem:[#allocation63_spill] sm:$0xff] %v7082_v48  ;;  %v2825_v4 = vpop.permute.xlu2 %2824  ;;  %v2791_v49 = vpop.permute.xlu0 %2790  ;;  %v7098_v28 = vsel %vm1989_vm9, %v3867_v1, %v3869_v54  ;;  %v1835_v58 = vsel %vm1780_vm10, %v1832_v51, %v1834_v31  ;;  %v2045_v54 = vrot.slane %v7078_v12, 2  ;;  %v3636_v31 = vrot.slane %v7070_v25, 1 }
 0x256   : > { %v2889_v10 = vadd.f32 %v2825_v4, %v6655_v52  ;;  %v2872_v17 = vadd.f32 %v2791_v49, %v2616_v57  ;;  %v2823_v56 = vpop.permute.xlu1 %2822  ;;  %v7107_v52 = vpop.f32.mrf.mxu1 }
 0x257   : > { %v2888_v9 = vadd.f32 %v2823_v56, %v6602_v30  ;;  %7691 = vst [vmem:[#allocation67_spill] sm:$0xff] %v7107_v52  ;;  %v7109_v57 = vpop.f32.mrf.mxu0  ;;  %v7693_v30 = vrot.slane %v6928_v16, 1  ;;  %v2946_v49 = vrot.slane %v7107_v52, 2 }
 0x258   : > { %v3080_v18 = vadd.f32 %v7011_v62, %v2872_v17  ;;  %7692 = vst [vmem:[#allocation83_spill] sm:$0xff] %v7109_v57  ;;  %v2945_v62 = vrot.slane %v7075_v44, 2  ;;  %v2046_v16 = vrot.slane %v7109_v57, 2 }
 0x259   : > { %v3657_v59 = vsel %vm1780_vm10, %v7693_v30, %v3656_v0 }
 0x25a   : > { %v3517_v51 = vadd.f32 %v6672_v42, %v3080_v18  ;;  %v2947_v3 = vsel %vm1989_vm9, %v2945_v62, %v2946_v49  ;;  %v3638_v62 = vrot.slane %v7101_v6, 1 }
 0x25b   : > { %2112 = vrot.lane.b32.xlu2 %v2044_v24, %s5043_s28  ;;  %1903 = vrot.lane.b32.xlu0 %v1835_v58, %s5044_s29  ;;  %v7695_v24 = vrot.slane %v7028_v46, 1  ;;  %v2047_v58 = vsel %vm1989_vm9, %v2045_v54, %v2046_v16  ;;  %v7135_v30 = vpop.f32.mrf.mxu2 }
 0x25c   : > { %3721 = vrot.lane.b32.xlu1 %v3657_v59, %s5044_s29 }
 0x25d   : > { %v7118_v1 = vpop.permute.xlu2 %3693  ;;  %v3031_v4 = vpop.permute.xlu0 %3030  ;;  %v3637_v18 = vsel %vm1780_vm10, %v7695_v24, %v3636_v31  ;;  %v3639_v31 = vrot.slane %v7135_v30, 1 }
 0x25e   : > { %v3096_v32 = vadd.f32 %v3031_v4, %v2888_v9  ;;  %v3692_v17 = vpop.permute.xlu1 %3691  ;;  %v2737_v4 = vrot.slane %v7075_v44, 1 }
 0x25f   : > { %v7125_v56 = vadd.f32 %v3692_v17, %v3517_v51  ;;  %v2738_v51 = vrot.slane %v7107_v52, 1  ;;  %v1837_v17 = vrot.slane %v7109_v57, 1  ;;  %v3658_v52 = vrot.slane %v7030_v50, 1 }
 0x260   : > { %v7128_v0 = vadd.f32 %v7030_v50, %v3096_v32  ;;  %v1836_v32 = vrot.slane %v7078_v12, 1  ;;  %v3659_v57 = vrot.slane %v7061_v39, 1 }
 0x261   : > { %7694 = vst [vmem:[#allocation84_spill] sm:$0xff] %v7125_v56  ;;  %v2739_v24 = vsel %vm1780_vm10, %v2737_v4, %v2738_v51  ;;  %v1661_v56 = vpop.f32.mrf.mxu0 }
 0x262   : > { %v2048_v22 = vrot.slane %v1661_v56, 2 }
 0x263   : > { %3705 = vrot.lane.b32.xlu2 %v3637_v18, %s5044_s29  ;;  %2114 = vrot.lane.b32.xlu0 %v2047_v58, %s5043_s28  ;;  %v2563_v18 = vpop.f32.mrf.mxu1  ;;  %v1838_v58 = vsel %vm1780_vm10, %v1836_v32, %v1837_v17 }
 0x264   : > { %3014 = vrot.lane.b32.xlu1 %v2947_v3, %s5043_s28  ;;  %v3640_v3 = vsel %vm1780_vm10, %v3638_v62, %v3639_v31  ;;  %v2740_v12 = vrot.slane %v2563_v18, 1 }
 0x265   : > { %v7140_v9 = vpop.permute.xlu2 %2794  ;;  %v3001_v59 = vpop.permute.xlu0 %3000 }
 0x266   : > { %v2793_v54 = vpop.permute.xlu1 %2792  ;;  %v2741_v21 = vsel %vm1780_vm10, %v2738_v51, %v2740_v12 }
 0x26b   : > { %2806 = vrot.lane.b32.xlu2 %v2739_v24, %s5044_s29  ;;  %3707 = vrot.lane.b32.xlu0 %v3640_v3, %s5044_s29 }
 0x26c   : > { %1905 = vrot.lane.b32.xlu1 %v1838_v58, %s5044_s29  ;;  %v3660_v58 = vsel %vm1780_vm10, %v3658_v52, %v3659_v57 }
 0x26d   : > { %v3712_v48 = vpop.permute.xlu2 %3711  ;;  %v1892_v44 = vpop.permute.xlu0 %1891 }
 0x26e   : > { %v7157_v4 = vadd.f32 %v3712_v48, %v6724_v5  ;;  %v3033_v62 = vpop.permute.xlu1 %3032  ;;  %v1972_v24 = vadd.f32 %v1892_v44, %v6647_v8  ;;  %v2049_v5 = vsel %vm1989_vm9, %v2046_v16, %v2048_v22  ;;  %v7170_v8 = vpop.f32.mrf.mxu2  ;;  %v2948_v44 = vrot.slane %v2563_v18, 2 }
 0x26f   : > { %v3097_v3 = vadd.f32 %v3033_v62, %v2889_v10  ;;  %v3641_v12 = vrot.slane %v7170_v8, 1  ;;  %v1839_v18 = vrot.slane %v1661_v56, 1 }
 0x270   : > { %v2181_v32 = vadd.f32 %v7064_v23, %v1972_v24  ;;  %v3821_v24 = vrot.slane %v6549_v33, 2 }
 0x271   : > { %v7162_v61 = vadd.f32 %v7061_v39, %v3097_v3  ;;  %v1840_v3 = vsel %vm1780_vm10, %v1837_v17, %v1839_v18  ;;  %v3826_v17 = vrot.slane %v6672_v42, 2 }
 0x272   : > { %v2617_v50 = vadd.f32 %v6684_v55, %v2181_v32  ;;  %v3661_v55 = vrot.slane %v7091_v43, 1 }
 0x273   : > { %3723 = vrot.lane.b32.xlu2 %v3660_v58, %s5044_s29  ;;  %2808 = vrot.lane.b32.xlu0 %v2741_v21, %s5044_s29  ;;  %v2949_v21 = vsel %vm1989_vm9, %v2946_v49, %v2948_v44  ;;  %v3822_v49 = vrot.slane %v6594_v7, 2  ;;  %v3824_v58 = vrot.slane %v6636_v45, 2 }
 0x274   : > { %v2873_v48 = vadd.f32 %v2793_v54, %v2617_v50  ;;  %2116 = vrot.lane.b32.xlu1 %v2049_v5, %s5043_s28  ;;  %v3662_v22 = vsel %vm1780_vm10, %v3659_v57, %v3661_v55  ;;  %v3642_v54 = vsel %vm1780_vm10, %v3639_v31, %v3641_v12  ;;  %v7696_v31 = vld [vmem:[#allocation57_spill] sm:$0xff] }
 0x275   : > { %v3005_v23 = vpop.permute.xlu2 %3004  ;;  %v2103_v39 = vpop.permute.xlu0 %2102  ;;  %v3823_v50 = vsel %vm1989_vm9, %v3821_v24, %v3822_v49 }
 0x276   : > { %v3003_v10 = vpop.permute.xlu1 %3002  ;;  %v3081_v52 = vadd.f32 %v3001_v59, %v2873_v48  ;;  %v3829_v48 = vrot.slane %v6746_v41, 2 }
 0x278   : > { %v3518_v51 = vadd.f32 %v6707_v38, %v3081_v52 }
 0x27a   : > { %v7179_v16 = vadd.f32 %v7118_v1, %v3518_v51  ;;  %v3832_v51 = vrot.slane %v6810_v37, 2 }
 0x27b   : > { %3016 = vrot.lane.b32.xlu2 %v2949_v21, %s5043_s28  ;;  %3725 = vrot.lane.b32.xlu0 %v3662_v22, %s5044_s29  ;;  %v3834_v21 = vrot.slane %v6873_v36, 2 }
 0x27c   : > { %3709 = vrot.lane.b32.xlu1 %v3642_v54, %s5044_s29 }
 0x27d   : > { %v1896_v43 = vpop.permute.xlu2 %1895  ;;  %v3696_v59 = vpop.permute.xlu0 %3695 }
 0x27e   : > { %v1894_v62 = vpop.permute.xlu1 %1893  ;;  %v1974_v33 = vadd.f32 %v1896_v43, %v6783_v60  ;;  %v3825_v60 = vsel %vm1989_vm9, %v3822_v49, %v3824_v58  ;;  %v3836_v43 = vrot.slane %v6910_v34, 2  ;;  %v3839_v49 = vrot.slane %v6974_v2, 2 }
 0x27f   : > { %v1973_v57 = vadd.f32 %v1894_v62, %v6753_v27  ;;  %v3846_v2 = vrot.slane %v7101_v6, 2 }
 0x281   : > { %v2182_v1 = vadd.f32 %v2103_v39, %v1973_v57  ;;  %v3842_v57 = vrot.slane %v7028_v46, 2 }
 0x283   : > { %v2618_v32 = vadd.f32 %v6750_v15, %v2182_v1  ;;  %1907 = vrot.lane.b32.xlu2 %v1840_v3, %s5044_s29  ;;  %3893 = vrot.lane.b32.xlu0 %v7696_v31, %s5043_s28  ;;  %v3827_v15 = vrot.slane %v6707_v38, 2  ;;  %v3844_v3 = vrot.slane %v7070_v25, 2  ;;  %v3849_v25 = vrot.slane %v7170_v8, 2  ;;  %s4527_s29 = sshll.u32 %s7783_s21, 6 }
 0x284   : > { %3895 = vrot.lane.b32.xlu1 %v3823_v50, %s5043_s28  ;;  %s7414_s8 = scalar_lea.vmem %s7469_s6, %s4527_s29 }
 0x285   : > { %v2874_v7 = vadd.f32 %v7140_v9, %v2618_v32  ;;  %v2107_v56 = vpop.permute.xlu2 %2106  ;;  %v2797_v27 = vpop.permute.xlu0 %2796  ;;  %v3828_v9 = vsel %vm1989_vm9, %v3826_v17, %v3827_v15  ;;  %v3830_v45 = vsel %vm1989_vm9, %v3827_v15, %v3829_v48  ;;  %v3845_v50 = vsel %vm1989_vm9, %v3842_v57, %v3844_v3  ;;  %v7707_v3 = vld [vmem:[#allocation29_spill] sm:$0xff] }
 0x286   : > { %v2105_v5 = vpop.permute.xlu1 %2104 }
 0x287   : > { %v2183_v39 = vadd.f32 %v2105_v5, %v1974_v33  ;;  %v3082_v44 = vadd.f32 %v3003_v10, %v2874_v7  ;;  %v3831_v10 = vrot.slane %v6772_v29, 2  ;;  %v7697_v5 = vld [vmem:[#allocation81_spill] sm:$0xff] }
 0x289   : > { %v2619_v55 = vadd.f32 %v6781_v19, %v2183_v39  ;;  %v3519_v52 = vadd.f32 %v6772_v29, %v3082_v44  ;;  %v3835_v29 = vsel %vm1989_vm9, %v3832_v51, %v3834_v21  ;;  %v7698_v44 = vld [vmem:[#allocation80_spill] sm:$0xff] }
 0x28b   : > { %v2875_v12 = vadd.f32 %v2797_v27, %v2619_v55  ;;  %3897 = vrot.lane.b32.xlu2 %v3825_v60, %s5043_s28  ;;  %3899 = vrot.lane.b32.xlu0 %v3828_v9, %s5043_s28  ;;  %v7208_v42 = vadd.f32 %v3696_v59, %v3519_v52  ;;  %v3837_v59 = vrot.slane %v6946_v53, 2  ;;  %v3847_v27 = vrot.slane %v7135_v30, 2 }
 0x28c   : > { %3901 = vrot.lane.b32.xlu1 %v3830_v45, %s5043_s28 }
 0x28d   : > { %v3700_v38 = vpop.permute.xlu2 %3699  ;;  %v3714_v41 = vpop.permute.xlu0 %3713  ;;  %v3083_v19 = vadd.f32 %v3005_v23, %v2875_v12  ;;  %v3833_v23 = vsel %vm1989_vm9, %v3831_v10, %v3832_v51  ;;  %v3840_v32 = vsel %vm1989_vm9, %v3837_v59, %v3839_v49  ;;  %v3848_v52 = vsel %vm1989_vm9, %v3846_v2, %v3847_v27  ;;  %v7701_v10 = vld [vmem:[#allocation78_spill] sm:$0xff] }
 0x28e   : > { %v7215_v22 = vadd.f32 %v3714_v41, %v6775_v26  ;;  %v3698_v54 = vpop.permute.xlu1 %3697  ;;  %v3838_v26 = vsel %vm1989_vm9, %v3836_v43, %v3837_v59  ;;  %v3850_v60 = vsel %vm1989_vm9, %v3847_v27, %v3849_v25  ;;  %v7702_v51 = vld [vmem:[#allocation82_spill] sm:$0xff]  ;;  %v7703_v59 = vld [vmem:[#allocation52_spill] sm:$0xff] }
 0x28f   : > { %v3520_v18 = vadd.f32 %v6810_v37, %v3083_v19  ;;  %v3841_v37 = vrot.slane %v6990_v20, 2  ;;  %v7700_v19 = vld [vmem:[#allocation76_spill] sm:$0xff] }
 0x291   : > { %v7220_v62 = vadd.f32 %v3698_v54, %v3520_v18  ;;  %v3843_v31 = vsel %vm1989_vm9, %v3841_v37, %v3842_v57 }
 0x293   : > { %3903 = vrot.lane.b32.xlu2 %v3833_v23, %s5043_s28  ;;  %3905 = vrot.lane.b32.xlu0 %v3835_v29, %s5043_s28 }
 0x294   : > { %3907 = vrot.lane.b32.xlu1 %v3838_v26, %s5043_s28 }
 0x295   : > { %v2801_v36 = vpop.permute.xlu2 %2800  ;;  %v3007_v24 = vpop.permute.xlu0 %3006 }
 0x296   : > { %v2799_v1 = vpop.permute.xlu1 %2798 }
 0x29b   : > { %3909 = vrot.lane.b32.xlu2 %v3840_v32, %s5043_s28  ;;  %3911 = vrot.lane.b32.xlu0 %v3843_v31, %s5043_s28 }
 0x29c   : > { %3913 = vrot.lane.b32.xlu1 %v3845_v50, %s5043_s28 }
 0x29d   : > { %v3718_v33 = vpop.permute.xlu2 %3717  ;;  %v1898_v7 = vpop.permute.xlu0 %1897 }
 0x29e   : > { %v7242_v58 = vadd.f32 %v3718_v33, %v6954_v11  ;;  %v3716_v17 = vpop.permute.xlu1 %3715  ;;  %v1975_v15 = vadd.f32 %v1898_v7, %v6876_v13  ;;  %v7699_v11 = vld [vmem:[#allocation74_spill] sm:$0xff]  ;;  %v7708_v33 = vld [vmem:[#allocation23_spill] sm:$0xff] }
 0x29f   : > { %v7246_v48 = vadd.f32 %v3716_v17, %v7697_v5  ;;  %v7709_v5 = vld [vmem:[#allocation3_spill] sm:$0xff] }
 0x2a0   : > { %v2184_v39 = vadd.f32 %v2107_v56, %v1975_v15 }
 0x2a2   : > { %v2620_v55 = vadd.f32 %v7698_v44, %v2184_v39  ;;  %v7710_v44 = vld [vmem:[#allocation25_spill] sm:$0xff] }
 0x2a3   : > { %3915 = vrot.lane.b32.xlu2 %v3848_v52, %s5043_s28  ;;  %3917 = vrot.lane.b32.xlu0 %v3850_v60, %s5043_s28  ;;  %v7711_v52 = vld [vmem:[#allocation8_spill] sm:$0xff]  ;;  %v7712_v60 = vld [vmem:[#allocation33_spill] sm:$0xff] }
 0x2a4   : > { %v2876_v8 = vadd.f32 %v2799_v1, %v2620_v55  ;;  %3919 = vrot.lane.b32.xlu1 %v7699_v11, %s5043_s28  ;;  %v7706_v1 = vld [vmem:[#allocation6_spill] sm:$0xff] }
 0x2a5   : > { %v3011_v9 = vpop.permute.xlu2 %3010  ;;  %v2109_v13 = vpop.permute.xlu0 %2108  ;;  %v1957_v32 = vadd.f32 %v7707_v3, %v7706_v1  ;;  %v7723_v3 = vld [vmem:[#allocation10_spill] sm:$0xff] }
 0x2a6   : > { %v3009_v12 = vpop.permute.xlu1 %3008  ;;  %v3084_v45 = vadd.f32 %v3007_v24, %v2876_v8  ;;  %v7713_v8 = vld [vmem:[#allocation34_spill] sm:$0xff] }
 0x2a7   : > { %v2166_v7 = vadd.f32 %v7708_v33, %v1957_v32  ;;  %v7724_v32 = vld [vmem:[#allocation49_spill] sm:$0xff]  ;;  %v7726_v33 = vld [vmem:[#allocation30_spill] sm:$0xff] }
 0x2a8   : > { %v3521_v56 = vadd.f32 %v6910_v34, %v3084_v45  ;;  %v7704_v34 = vld [vmem:[#allocation59_spill] sm:$0xff]  ;;  %v7714_v45 = vld [vmem:[#allocation24_spill] sm:$0xff] }
 0x2a9   : > { %v2602_v39 = vadd.f32 %v7709_v5, %v2166_v7 }
 0x2aa   : > { %v7256_v41 = vadd.f32 %v3700_v38, %v3521_v56  ;;  %v7705_v38 = vld [vmem:[#allocation38_spill] sm:$0xff]  ;;  %v7715_v56 = vld [vmem:[#allocation4_spill] sm:$0xff] }
 0x2ab   : > { %3921 = vrot.lane.b32.xlu2 %v7700_v19, %s5043_s28  ;;  %3923 = vrot.lane.b32.xlu0 %v7701_v10, %s5043_s28  ;;  %v2858_v55 = vadd.f32 %v7710_v44, %v2602_v39  ;;  %v7716_v10 = vld [vmem:[#allocation5_spill] sm:$0xff]  ;;  %v7731_v44 = vld [vmem:[#allocation36_spill] sm:$0xff] }
 0x2ac   : > { %3925 = vrot.lane.b32.xlu1 %v7702_v51, %s5043_s28  ;;  %v7730_v39 = vld [vmem:[#allocation41_spill] sm:$0xff] }
 0x2ad   : > { %v1902_v21 = vpop.permute.xlu2 %1901  ;;  %v3702_v54 = vpop.permute.xlu0 %3701 }
 0x2ae   : > { %v1900_v43 = vpop.permute.xlu1 %1899  ;;  %v1977_v26 = vadd.f32 %v1902_v21, %v6976_v14  ;;  %v7717_v21 = vld [vmem:[#allocation9_spill] sm:$0xff] }
 0x2af   : > { %v1976_v18 = vadd.f32 %v1900_v43, %v7703_v59  ;;  %v7719_v43 = vld [vmem:[#allocation28_spill] sm:$0xff] }
 0x2b1   : > { %v2185_v23 = vadd.f32 %v2109_v13, %v1976_v18  ;;  %v7720_v18 = vld [vmem:[#allocation37_spill] sm:$0xff] }
 0x2b3   : > { %v2621_v29 = vadd.f32 %v6900_v35, %v2185_v23  ;;  %3927 = vrot.lane.b32.xlu2 %v7704_v34, %s5043_s28  ;;  %3929 = vrot.lane.b32.xlu0 %v7705_v38, %s5043_s28 }
 0x2b4   : > { %3931 = vrot.lane.b32.xlu1 %v7073_v47, %s5043_s28 }
 0x2b5   : > { %v2877_v24 = vadd.f32 %v2801_v36, %v2621_v29  ;;  %v2113_v49 = vpop.permute.xlu2 %2112  ;;  %v2803_v37 = vpop.permute.xlu0 %2802 }
 0x2b6   : > { %v2111_v57 = vpop.permute.xlu1 %2110 }
 0x2b7   : > { %v2186_v31 = vadd.f32 %v2111_v57, %v1977_v26  ;;  %v3085_v35 = vadd.f32 %v3009_v12, %v2877_v24  ;;  %v7721_v24 = vld [vmem:[#allocation46_spill] sm:$0xff] }
 0x2b8   : > { %v7722_v57 = vld [vmem:[#allocation26_spill] sm:$0xff] }
 0x2b9   : > { %v2622_v50 = vadd.f32 %v6978_v63, %v2186_v31  ;;  %v3522_v2 = vadd.f32 %v6946_v53, %v3085_v35  ;;  %v1960_v31 = vadd.f32 %v7724_v32, %v7723_v3  ;;  %v7725_v35 = vld [vmem:[#allocation50_spill] sm:$0xff] }
 0x2ba   : > { %v7742_v32 = vld [vmem:[#allocation42_spill] sm:$0xff] }
 0x2bb   : > { %v2878_v27 = vadd.f32 %v2803_v37, %v2622_v50  ;;  %3933 = vrot.lane.b32.xlu2 %v7098_v28, %s5043_s28  ;;  %v7280_v14 = vadd.f32 %v3702_v54, %v3522_v2  ;;  %v1958_v28 = vadd.f32 %v7712_v60, %v7711_v52  ;;  %v7732_v60 = vld [vmem:[#allocation7_spill] sm:$0xff]  ;;  %s5051_s28 = smov 48  }
 0x2bd   : > { %v3706_v47 = vpop.permute.xlu2 %3705  ;;  %v3720_v36 = vpop.permute.xlu0 %3719  ;;  %v3086_v25 = vadd.f32 %v3011_v9, %v2878_v27  ;;  %v2167_v11 = vadd.f32 %v7713_v8, %v1958_v28  ;;  %v7727_v27 = vld [vmem:[#allocation11_spill] sm:$0xff] }
 0x2be   : > { %v7283_v17 = vadd.f32 %v3720_v36, %v6993_v40  ;;  %v3704_v15 = vpop.permute.xlu1 %3703  ;;  %v3066_v40 = vadd.f32 %v7714_v45, %v2858_v55  ;;  %v2169_v55 = vadd.f32 %v7731_v44, %v1960_v31 }
 0x2bf   : > { %v3523_v63 = vadd.f32 %v6990_v20, %v3086_v25  ;;  %v2603_v19 = vadd.f32 %v7715_v56, %v2167_v11  ;;  %v7718_v20 = vld [vmem:[#allocation35_spill] sm:$0xff]  ;;  %v7728_v25 = vld [vmem:[#allocation58_spill] sm:$0xff] }
 0x2c0   : > { %v3503_v51 = vadd.f32 %v7716_v10, %v3066_v40  ;;  %v1959_v54 = vadd.f32 %v7718_v20, %v7717_v21  ;;  %v7733_v40 = vld [vmem:[#allocation39_spill] sm:$0xff] }
 0x2c1   : > { %v7287_v53 = vadd.f32 %v3704_v15, %v3523_v63  ;;  %v2859_v59 = vadd.f32 %v7719_v43, %v2603_v19  ;;  %v7734_v19 = vld [vmem:[#allocation32_spill] sm:$0xff]  ;;  %v7736_v43 = vld [vmem:[#allocation31_spill] sm:$0xff] }
 0x2c2   : > { %v2168_v23 = vadd.f32 %v7720_v18, %v1959_v54  ;;  %v3759_v1 = vadd.f32 %v7722_v57, %v3503_v51  ;;  %v7735_v51 = vld [vmem:[#allocation13_spill] sm:$0xff] }
 0x2c3   : > { %v3067_v7 = vadd.f32 %v7726_v33, %v2859_v59  ;;  %v2605_v21 = vadd.f32 %v7735_v51, %v2169_v55  ;;  %v7745_v33 = vld [vmem:[#allocation16_spill] sm:$0xff]  ;;  %v7750_v55 = vld [vmem:[#allocation19_spill] sm:$0xff] }
 0x2c4   : > { %v2604_v36 = vadd.f32 %v7727_v27, %v2168_v23  ;;  %v7738_v23 = vld [vmem:[#allocation17_spill] sm:$0xff] }
 0x2c5   : > { %v2807_v13 = vpop.permute.xlu2 %2806  ;;  %v3013_v12 = vpop.permute.xlu0 %3012  ;;  %v3504_v28 = vadd.f32 %v7732_v60, %v3067_v7 }
 0x2c6   : > { %v2805_v9 = vpop.permute.xlu1 %2804  ;;  %v2860_v63 = vadd.f32 %v7730_v39, %v2604_v36  ;;  %v7746_v36 = vld [vmem:[#allocation44_spill] sm:$0xff] }
 0x2c7   : > { %v3760_v56 = vadd.f32 %v7733_v40, %v3504_v28  ;;  %v7752_v28 = vld [vmem:[#allocation83_spill] sm:$0xff] }
 0x2c8   : > { %v3068_v10 = vadd.f32 %v7734_v19, %v2860_v63  ;;  %v7749_v63 = vld [vmem:[#allocation43_spill] sm:$0xff] }
 0x2c9   : > { %v3968_v59 = vadd.f32 %v7736_v43, %v3760_v56  ;;  %v7755_v43 = vld [vmem:[#allocation65_spill] sm:$0xff] }
 0x2cd   : > { %v3724_v29 = vpop.permute.xlu2 %3723  ;;  %v1904_v34 = vpop.permute.xlu0 %1903 }
 0x2ce   : > { %v7301_v38 = vadd.f32 %v3724_v29, %v7128_v0  ;;  %v3722_v26 = vpop.permute.xlu1 %3721  ;;  %v1978_v37 = vadd.f32 %v1904_v34, %v7721_v24  ;;  %v7729_v0 = vld [vmem:[#allocation27_spill] sm:$0xff] }
 0x2cf   : > { %v7308_v50 = vadd.f32 %v3722_v26, %v7725_v35  ;;  %v3967_v5 = vadd.f32 %v7729_v0, %v3759_v1  ;;  %v7739_v29 = vld [vmem:[#allocation47_spill] sm:$0xff]  ;;  %v7740_v26 = vld [vmem:[#allocation45_spill] sm:$0xff] }
 0x2d0   : > { %v2187_v2 = vadd.f32 %v2113_v49, %v1978_v37  ;;  %v1961_v34 = vadd.f32 %v7739_v29, %v7738_v23  ;;  %v2861_v24 = vadd.f32 %v7740_v26, %v2605_v21  ;;  %v7744_v35 = vld [vmem:[#allocation21_spill] sm:$0xff]  ;;  %v7754_v21 = vld [vmem:[#allocation40_spill] sm:$0xff] }
 0x2d1   : > { %v7756_v23 = vld [vmem:[#allocation56_spill] sm:$0xff] }
 0x2d2   : > { %v2623_v15 = vadd.f32 %v7728_v25, %v2187_v2 }
 0x2d4   : > { %v2879_v52 = vadd.f32 %v2805_v9, %v2623_v15  ;;  %v7737_v9 = vld [vmem:[#allocation12_spill] sm:$0xff]  ;;  %v7747_v15 = vld [vmem:[#allocation15_spill] sm:$0xff] }
 0x2d5   : > { %v3017_v8 = vpop.permute.xlu2 %3016  ;;  %3999 = vxpose.xlu0.b32.start [1/16] (narrow) %v3967_v5, 8  ;;  %v2115_v11 = vpop.permute.xlu0 %2114  ;;  %v3505_v18 = vadd.f32 %v7737_v9, %v3068_v10  ;;  %v7748_v5 = vld [vmem:[#allocation70_spill] sm:$0xff]  ;;  %v7753_v10 = vld [vmem:[#allocation63_spill] sm:$0xff] }
 0x2d6   : > { %v3015_v45 = vpop.permute.xlu1 %3014  ;;  %v3087_v49 = vadd.f32 %v3013_v12, %v2879_v52  ;;  %v7741_v12 = vld [vmem:[#allocation55_spill] sm:$0xff]  ;;  %v7751_v52 = vld [vmem:[#allocation60_spill] sm:$0xff] }
 0x2d7   : > { %v2170_v37 = vadd.f32 %v7741_v12, %v1961_v34  ;;  %v3761_v31 = vadd.f32 %v7742_v32, %v3505_v18  ;;  %v1962_v60 = vadd.f32 %v7751_v52, %v7750_v55  ;;  %v7757_v34 = vld [vmem:[#allocation67_spill] sm:$0xff]  ;;  %v7766_v52 = vld [vmem:[#allocation69_spill] sm:$0xff] }
 0x2d8   : > { %v3524_v20 = vadd.f32 %v7028_v46, %v3087_v49  ;;  %v7743_v46 = vld [vmem:[#allocation48_spill] sm:$0xff] }
 0x2d9   : > { %v2606_v7 = vadd.f32 %v7745_v33, %v2170_v37  ;;  %v3969_v25 = vadd.f32 %v7746_v36, %v3761_v31  ;;  %v7759_v37 = vld [vmem:[#allocation18_spill] sm:$0xff]  ;;  %v7760_v31 = vld [vmem:[#allocation20_spill] sm:$0xff] }
 0x2da   : > { %v7321_v54 = vadd.f32 %v3706_v47, %v3524_v20  ;;  %v3069_v47 = vadd.f32 %v7743_v46, %v2861_v24  ;;  %v7762_v36 = vld [vmem:[#allocation64_spill] sm:$0xff] }
 0x2db   : > { %v2862_v44 = vadd.f32 %v7749_v63, %v2606_v7 }
 0x2dc   : > { %v3506_v0 = vadd.f32 %v7747_v15, %v3069_v47  ;;  %v7761_v47 = vld [vmem:[#allocation66_spill] sm:$0xff] }
 0x2dd   : > { %v1908_v57 = vpop.permute.xlu2 %1907  ;;  %4000 = vxpose.xlu0.b32.cont [2/16] (narrow) %v3968_v59, 8  ;;  %v3708_v1 = vpop.permute.xlu0 %3707  ;;  %v2171_v59 = vadd.f32 %v7755_v43, %v1962_v60  ;;  %v3070_v29 = vadd.f32 %v7756_v23, %v2862_v44  ;;  %v7763_v15 = vld [vmem:[#allocation54_spill] sm:$0xff]  ;;  %v7767_v60 = vld [vmem:[#allocation68_spill] sm:$0xff]  ;;  %v7772_v23 = vld [vmem:[#allocation75_spill] sm:$0xff] }
 0x2de   : > { %v1906_v3 = vpop.permute.xlu1 %1905  ;;  %v1980_v49 = vadd.f32 %v1908_v57, %v7752_v28  ;;  %v3762_v20 = vadd.f32 %v7754_v21, %v3506_v0  ;;  %v7768_v28 = vld [vmem:[#allocation84_spill] sm:$0xff]  ;;  %v7770_v21 = vld [vmem:[#allocation73_spill] sm:$0xff] }
 0x2df   : > { %v1979_v2 = vadd.f32 %v1906_v3, %v7744_v35  ;;  %v2607_v57 = vadd.f32 %v7759_v37, %v2171_v59  ;;  %v3507_v46 = vadd.f32 %v7760_v31, %v3070_v29  ;;  %v7776_v37 = vld [vmem:[#allocation61_spill] sm:$0xff] }
 0x2e1   : > { %v2188_v27 = vadd.f32 %v2115_v11, %v1979_v2  ;;  %v2863_v35 = vadd.f32 %v7761_v47, %v2607_v57 }
 0x2e3   : > { %v2624_v39 = vadd.f32 %v7748_v5, %v2188_v27  ;;  %v3071_v0 = vadd.f32 %v7763_v15, %v2863_v35 }
 0x2e5   : > { %v2880_v40 = vadd.f32 %v2807_v13, %v2624_v39  ;;  %v3898_v56 = vpop.permute.xlu2 %3897  ;;  %4001 = vxpose.xlu0.b32.cont [3/16] (narrow) %v3969_v25, 8  ;;  %v2809_v19 = vpop.permute.xlu0 %2808  ;;  %v7758_v13 = vld [vmem:[#allocation53_spill] sm:$0xff]  ;;  %v3763_v25 = vadd.f32 %v7762_v36, %v3507_v46  ;;  %v7765_v39 = vld [vmem:[#allocation22_spill] sm:$0xff] }
 0x2e6   : > { %v7341_v51 = vadd.f32 %v3898_v56, %v7753_v10  ;;  %v2117_v11 = vpop.permute.xlu1 %2116  ;;  %v3970_v12 = vadd.f32 %v7758_v13, %v3762_v20  ;;  %v3508_v63 = vadd.f32 %v7765_v39, %v3071_v0  ;;  %v7771_v20 = vld [vmem:[#allocation71_spill] sm:$0xff]  ;;  %v7777_v46 = vld [vmem:[#allocation62_spill] sm:$0xff]  ;;  %v5052_v39 = vmov 1983009808  }
 0x2e7   : > { %v2189_v9 = vadd.f32 %v2117_v11, %v1980_v49  ;;  %v3088_v18 = vadd.f32 %v3015_v45, %v2880_v40  ;;  %v3974_v43 = vadd.f32 %v7771_v20, %v7770_v21 }
 0x2e9   : > { %v2625_v26 = vadd.f32 %v7757_v34, %v2189_v9  ;;  %v3525_v24 = vadd.f32 %v7101_v6, %v3088_v18  ;;  %v7773_v34 = vld [vmem:[#allocation79_spill] sm:$0xff] }
 0x2eb   : > { %v2881_v3 = vadd.f32 %v2809_v19, %v2625_v26  ;;  %v3781_v32 = vadd.f32 %v3708_v1, %v3525_v24  ;;  %v7764_v1 = vld [vmem:[#allocation51_spill] sm:$0xff]  ;;  %v7769_v19 = vld [vmem:[#allocation72_spill] sm:$0xff]  ;;  %v7774_v26 = vld [vmem:[#allocation14_spill] sm:$0xff] }
 0x2ec   : > { %v3971_v5 = vadd.f32 %v7764_v1, %v3763_v25  ;;  %v7775_v24 = vld [vmem:[#allocation77_spill] sm:$0xff] }
 0x2ed   : > { %v3904_v2 = vpop.permute.xlu2 %3903  ;;  %4002 = vxpose.xlu0.b32.cont [4/16] (narrow) %v3970_v12, 8  ;;  %v3726_v33 = vpop.permute.xlu0 %3725  ;;  %v3089_v45 = vadd.f32 %v3017_v8, %v2881_v3  ;;  %v3764_v8 = vadd.f32 %v7766_v52, %v3508_v63  ;;  %v3977_v13 = vadd.f32 %v7775_v24, %v7774_v26  ;;  %v4111_v63 = vunpack.c.l.s4 %v5052_v39 }
 0x2ee   : > { %v3983_v7 = vadd.f32 %v3904_v2, %v7208_v42  ;;  %v7354_v27 = vadd.f32 %v3726_v33, %v7162_v61  ;;  %v3710_v6 = vpop.permute.xlu1 %3709 }
 0x2ef   : > { %v3972_v42 = vadd.f32 %v7767_v60, %v3764_v8  ;;  %v3526_v31 = vadd.f32 %v7135_v30, %v3089_v45  ;;  %v7397_v8 = vunpack.c.0.s8 %v4111_v63 }
 0x2f0   : > { %4031 = vxpose.xlu1.b32.start [1/16] (narrow) %v3983_v7, 8 }
 0x2f1   : > { %v3782_v35 = vadd.f32 %v3710_v6, %v3526_v31 }
 0x2f5   : > { %4003 = vxpose.xlu0.b32.cont [5/16] (narrow) %v3971_v5, 8  ;;  %v3894_v44 = vpop.permute.xlu0 %3893  ;;  %v3910_v18 = vpop.permute.xlu2 %3909 }
 0x2f6   : > { %v3896_v55 = vpop.permute.xlu1 %3895  ;;  %v3986_v29 = vadd.f32 %v3910_v18, %v7280_v14  ;;  %v3978_v57 = vadd.f32 %v3894_v44, %v7776_v37 }
 0x2f7   : > { %v3979_v47 = vadd.f32 %v3896_v55, %v7777_v46 }
 0x2fd   : > { %4004 = vxpose.xlu0.b32.cont [6/16] (narrow) %v3972_v42, 8  ;;  %v3900_v61 = vpop.permute.xlu0 %3899  ;;  %v3916_v3 = vpop.permute.xlu2 %3915 }
 0x2fe   : > { %v3981_v49 = vadd.f32 %v3900_v61, %v7768_v28  ;;  %v3902_v40 = vpop.permute.xlu1 %3901  ;;  %v3989_v14 = vadd.f32 %v3916_v3, %v3781_v32 }
 0x2ff   : > { %v3982_v56 = vadd.f32 %v3902_v40, %v7179_v16  ;;  %v5053_v40 = vmov 1934713408  }
 0x305   : > { %4005 = vxpose.xlu0.b32.cont [7/16] (narrow) %v7769_v19, 8  ;;  %v3906_v10 = vpop.permute.xlu0 %3905  ;;  %v3922_v7 = vpop.permute.xlu2 %3921 }
 0x306   : > { %v3984_v11 = vadd.f32 %v3906_v10, %v7220_v62  ;;  %v3908_v59 = vpop.permute.xlu1 %3907  ;;  %v3992_v32 = vadd.f32 %v3922_v7, %v7215_v22 }
 0x307   : > { %v3985_v9 = vadd.f32 %v3908_v59, %v7256_v41 }
 0x308   : > { %4032 = vxpose.xlu1.b32.cont [2/16] (narrow) %v3984_v11, 8 }
 0x30d   : > { %4006 = vxpose.xlu0.b32.cont [8/16] (narrow) %v3974_v43, 8  ;;  %v3912_v16 = vpop.permute.xlu0 %3911  ;;  %v3928_v25 = vpop.permute.xlu2 %3927 }
 0x30e   : > { %v3987_v62 = vadd.f32 %v3912_v16, %v7287_v53  ;;  %v3914_v12 = vpop.permute.xlu1 %3913 }
 0x30f   : > { %v3988_v41 = vadd.f32 %v3914_v12, %v7321_v54 }
 0x310   : > { %4033 = vxpose.xlu1.b32.cont [3/16] (narrow) %v3985_v9, 8 }
 0x315   : > { %4007 = vxpose.xlu0.b32.cont [9/16] (narrow) %v7772_v23, 8  ;;  %v3918_v53 = vpop.permute.xlu0 %3917  ;;  %v3934_v1 = vpop.permute.xlu2 %3933 }
 0x316   : > { %v3990_v2 = vadd.f32 %v3918_v53, %v3782_v35  ;;  %v3920_v33 = vpop.permute.xlu1 %3919 }
 0x317   : > { %v3991_v54 = vadd.f32 %v3920_v33, %v7157_v4 }
 0x318   : > { %4034 = vxpose.xlu1.b32.cont [4/16] (narrow) %v3986_v29, 8 }
 0x31d   : > { %4008 = vxpose.xlu0.b32.cont [10/16] (narrow) %v7773_v34, 8  ;;  %v3924_v30 = vpop.permute.xlu0 %3923 }
 0x31e   : > { %v3993_v45 = vadd.f32 %v3924_v30, %v7246_v48  ;;  %v3926_v6 = vpop.permute.xlu1 %3925  ;;  %v3998_v48 = vadd.f32 %v3934_v1, %v7354_v27 }
 0x31f   : > { %v3994_v36 = vadd.f32 %v3926_v6, %v7242_v58 }
 0x320   : > { %4035 = vxpose.xlu1.b32.cont [5/16] (narrow) %v3987_v62, 8 }
 0x325   : > { %4009 = vxpose.xlu0.b32.cont [11/16] (narrow) %v3977_v13, 8  ;;  %v3930_v4 = vpop.permute.xlu0 %3929 }
 0x326   : > { %v3996_v15 = vadd.f32 %v3930_v4, %v7308_v50  ;;  %v3932_v0 = vpop.permute.xlu1 %3931 }
 0x327   : > { %v3997_v22 = vadd.f32 %v3932_v0, %v7301_v38 }
 0x328   : > { %4036 = vxpose.xlu1.b32.cont [6/16] (narrow) %v3988_v41, 8 }
 0x32d   : > { %4010 = vxpose.xlu0.b32.cont [12/16] (narrow) %v3978_v57, 8 }
 0x330   : > { %4037 = vxpose.xlu1.b32.cont [7/16] (narrow) %v3989_v14, 8 }
 0x335   : > { %4011 = vxpose.xlu0.b32.cont [13/16] (narrow) %v3979_v47, 8 }
 0x338   : > { %4038 = vxpose.xlu1.b32.cont [8/16] (narrow) %v3990_v2, 8 }
 0x33d   : > { %4012 = vxpose.xlu0.b32.cont [14/16] (narrow) %v7341_v51, 8  ;;  %v3995_v51 = vadd.f32 %v3928_v25, %v7283_v17 }
 0x340   : > { %4039 = vxpose.xlu1.b32.cont [9/16] (narrow) %v3991_v54, 8 }
 0x345   : > { %4013 = vxpose.xlu0.b32.cont [15/16] (narrow) %v3981_v49, 8 }
 0x348   : > { %4040 = vxpose.xlu1.b32.cont [10/16] (narrow) %v3992_v32, 8 }
 0x34d   : > { %4014 = vxpose.xlu0.b32.end [16/16] (narrow) %v3982_v56, 8  ;;  %v4137_v56 = vunpack.c.l.s4 %v5053_v40 }
 0x34f   : > { %v4138_v20 = vunpack.c.0.s8 %v4137_v56 }
 0x350   : > { %4041 = vxpose.xlu1.b32.cont [11/16] (narrow) %v3993_v45, 8 }
 0x358   : > { %4042 = vxpose.xlu1.b32.cont [12/16] (narrow) %v3994_v36, 8 }
 0x360   : > { %4043 = vxpose.xlu1.b32.cont [13/16] (narrow) %v3995_v51, 8 }
 0x368   : > { %4044 = vxpose.xlu1.b32.cont [14/16] (narrow) %v3996_v15, 8 }
 0x370   : > { %4045 = vxpose.xlu1.b32.cont [15/16] (narrow) %v3997_v22, 8 }
 0x378   : > { %4046 = vxpose.xlu1.b32.end [16/16] (narrow) %v3998_v48, 8 }
 0x379   : > { %v4015_v5 = vpop.trf.xlu0 }
 0x37a   : > { %4064 = vrot.lane.b32.xlu2 %v4015_v5, %s5045_s13 }
 0x382   : > { %4067 = vrot.lane.b32.xlu2 %v4015_v5, %s5046_s19 }
 0x38a   : > { %4070 = vrot.lane.b32.xlu2 %v4015_v5, %s5047_s20 }
 0x392   : > { %4079 = vrot.lane.b32.xlu2 %v4015_v5, %s5048_s25 }
 0x39a   : > { %4082 = vrot.lane.b32.xlu2 %v4015_v5, %s5049_s26 }
 0x3a2   : > { %4073 = vrot.lane.b32.xlu2 %v4015_v5, %s5050_s27 }
 0x3a4   : > { %v7388_v58 = vpop.trf.xlu1 }
 0x3aa   : > { %4076 = vrot.lane.b32.xlu2 %v4015_v5, %s5051_s28 }
 0x3b2   : > { %4089 = vrot.lane.b32.xlu2 %v7388_v58, %s5046_s19 }
 0x3ba   : > { %4092 = vrot.lane.b32.xlu2 %v7388_v58, %s5047_s20 }
 0x3c2   : > { %4101 = vrot.lane.b32.xlu2 %v7388_v58, %s5048_s25 }
 0x3ca   : > { %4104 = vrot.lane.b32.xlu2 %v7388_v58, %s5049_s26 }
 0x3d2   : > { %4086 = vrot.lane.b32.xlu2 %v7388_v58, %s5045_s13 }
 0x3d4   : > { %v4065_v17 = vpop.permute.xlu2 %4064 }
 0x3da   : > { %4095 = vrot.lane.b32.xlu2 %v7388_v58, %s5050_s27 }
 0x3dc   : > { %v4068_v38 = vpop.permute.xlu2 %4067 }
 0x3dd   : > { %v4107_v55 = vrot.slane %v4068_v38, 4 }
 0x3df   : > { %v4109_v60 = vsel %vm4108_vm11, %v4107_v55, %v4015_v5 }
 0x3e0   : > { %v4113_v61 = vperm.slane %v4109_v60, %v7397_v8 }
 0x3e2   : > { %4098 = vrot.lane.b32.xlu2 %v7388_v58, %s5051_s28  ;;  %v4134_v11 = vrot.slane %v4113_v61, 4 }
 0x3e4   : > { %v4071_v50 = vpop.permute.xlu2 %4070 }
 0x3e5   : > { %v4114_v52 = vrot.slane %v4071_v50, 4 }
 0x3e7   : > { %v4115_v42 = vsel %vm4108_vm11, %v4114_v52, %v4065_v17 }
 0x3e8   : > { %v4119_v28 = vperm.slane %v4115_v42, %v7397_v8 }
 0x3ea   : > { %v4132_v21 = vrot.slane %v4119_v28, 4  ;;  %v4135_v43 = vsel %vm4108_vm11, %v4119_v28, %v4134_v11 }
 0x3eb   : > { %v4143_v29 = vperm.slane %v4135_v43, %v4138_v20 }
 0x3ec   : > { %v4080_v27 = vpop.permute.xlu2 %4079  ;;  %v4133_v18 = vsel %vm4108_vm11, %v4132_v21, %v4113_v61 }
 0x3ed   : > { %v4120_v19 = vrot.slane %v4080_v27, 4  ;;  %v4139_v26 = vperm.slane %v4133_v18, %v4138_v20  ;;  %v4162_v12 = vrot.slane %v4143_v29, 4 }
 0x3ef   : > { %v4158_v57 = vrot.slane %v4139_v26, 4 }
 0x3f4   : > { %v4083_v44 = vpop.permute.xlu2 %4082 }
 0x3f5   : > { %v4126_v9 = vrot.slane %v4083_v44, 4 }
 0x3fc   : > { %v4074_v49 = vpop.permute.xlu2 %4073 }
 0x3fd   : > { %v4121_v10 = vsel %vm4108_vm11, %v4120_v19, %v4074_v49 }
 0x3fe   : > { %v4125_v59 = vperm.slane %v4121_v10, %v7397_v8 }
 0x400   : > { %v4146_v34 = vrot.slane %v4125_v59, 4 }
 0x404   : > { %v4077_v23 = vpop.permute.xlu2 %4076 }
 0x405   : > { %v4127_v16 = vsel %vm4108_vm11, %v4126_v9, %v4077_v23 }
 0x406   : > { %v4131_v62 = vperm.slane %v4127_v16, %v7397_v8 }
 0x408   : > { %v4144_v24 = vrot.slane %v4131_v62, 4  ;;  %v4147_v13 = vsel %vm4108_vm11, %v4131_v62, %v4146_v34 }
 0x409   : > { %v4155_v41 = vperm.slane %v4147_v13, %v4138_v20 }
 0x40a   : > { %v4145_v37 = vsel %vm4108_vm11, %v4144_v24, %v4125_v59 }
 0x40b   : > { %v4151_v3 = vperm.slane %v4145_v37, %v4138_v20  ;;  %v4160_v14 = vrot.slane %v4155_v41, 4  ;;  %v4163_v31 = vsel %vm4108_vm11, %v4155_v41, %v4162_v12 }
 0x40c   : > { %4226 = vst.msk [vmem:[%s7414_s8 + $0x30] sm:$0xff] %vm1394_vm8, %v4163_v31  ;;  %v4090_v46 = vpop.permute.xlu2 %4089 }
 0x40d   : > { %v4156_v47 = vrot.slane %v4151_v3, 4  ;;  %v4159_v53 = vsel %vm4108_vm11, %v4151_v3, %v4158_v57  ;;  %v4161_v35 = vsel %vm4108_vm11, %v4160_v14, %v4143_v29  ;;  %v4164_v30 = vrot.slane %v4090_v46, 4 }
 0x40e   : > { %4222 = vst.msk [vmem:[%s7414_s8 + $0x10] sm:$0xff] %vm1394_vm8, %v4159_v53 }
 0x40f   : > { %v4157_v2 = vsel %vm4108_vm11, %v4156_v47, %v4139_v26  ;;  %4224 = vst.msk [vmem:[%s7414_s8 + $0x20] sm:$0xff] %vm1394_vm8, %v4161_v35  ;;  %v4165_v6 = vsel %vm4108_vm11, %v4164_v30, %v7388_v58 }
 0x410   : > { %4220 = vst.msk [vmem:[%s7414_s8] sm:$0xff] %vm1394_vm8, %v4157_v2  ;;  %v4169_v25 = vperm.slane %v4165_v6, %v7397_v8 }
 0x412   : > { %v4190_v22 = vrot.slane %v4169_v25, 4 }
 0x414   : > { %v4093_v33 = vpop.permute.xlu2 %4092 }
 0x415   : > { %v4170_v45 = vrot.slane %v4093_v33, 4 }
 0x41c   : > { %v4102_v54 = vpop.permute.xlu2 %4101 }
 0x41d   : > { %v4176_v15 = vrot.slane %v4102_v54, 4 }
 0x424   : > { %v4105_v7 = vpop.permute.xlu2 %4104 }
 0x425   : > { %v4182_v17 = vrot.slane %v4105_v7, 4 }
 0x42c   : > { %v4087_v32 = vpop.permute.xlu2 %4086 }
 0x42d   : > { %v4171_v36 = vsel %vm4108_vm11, %v4170_v45, %v4087_v32 }
 0x42e   : > { %v4175_v51 = vperm.slane %v4171_v36, %v7397_v8 }
 0x430   : > { %v4188_v1 = vrot.slane %v4175_v51, 4  ;;  %v4191_v48 = vsel %vm4108_vm11, %v4175_v51, %v4190_v22 }
 0x431   : > { %v4199_v50 = vperm.slane %v4191_v48, %v4138_v20 }
 0x432   : > { %v4189_v38 = vsel %vm4108_vm11, %v4188_v1, %v4169_v25 }
 0x433   : > { %v4195_v44 = vperm.slane %v4189_v38, %v4138_v20  ;;  %v4218_v60 = vrot.slane %v4199_v50, 4 }
 0x434   : > { %v4096_v4 = vpop.permute.xlu2 %4095 }
 0x435   : > { %v4177_v0 = vsel %vm4108_vm11, %v4176_v15, %v4096_v4  ;;  %v4214_v28 = vrot.slane %v4195_v44, 4 }
 0x436   : > { %v4181_v5 = vperm.slane %v4177_v0, %v7397_v8 }
 0x438   : > { %v4202_v39 = vrot.slane %v4181_v5, 4 }
 0x43c   : > { %v4099_v58 = vpop.permute.xlu2 %4098 }
 0x43d   : > { %v4183_v27 = vsel %vm4108_vm11, %v4182_v17, %v4099_v58 }
 0x43e   : > { %v4187_v63 = vperm.slane %v4183_v27, %v7397_v8 }
 0x440   : > { %v4200_v55 = vrot.slane %v4187_v63, 4  ;;  %v4203_v52 = vsel %vm4108_vm11, %v4187_v63, %v4202_v39 }
 0x441   : > { %v4211_v42 = vperm.slane %v4203_v52, %v4138_v20 }
 0x442   : > { %v4201_v61 = vsel %vm4108_vm11, %v4200_v55, %v4181_v5 }
 0x443   : > { %v4207_v49 = vperm.slane %v4201_v61, %v4138_v20  ;;  %v4216_v40 = vrot.slane %v4211_v42, 4  ;;  %v4219_v56 = vsel %vm4108_vm11, %v4211_v42, %v4218_v60 }
 0x444   : > { %4227 = vst.msk [vmem:[%s7414_s8 + $0x38] sm:$0xff] %vm1394_vm8, %v4219_v56 }
 0x445   : > { %v4212_v19 = vrot.slane %v4207_v49, 4  ;;  %v4215_v8 = vsel %vm4108_vm11, %v4207_v49, %v4214_v28  ;;  %v4217_v10 = vsel %vm4108_vm11, %v4216_v40, %v4199_v50 }
 0x446   : > { %4223 = vst.msk [vmem:[%s7414_s8 + $0x18] sm:$0xff] %vm1394_vm8, %v4215_v8 }
 0x447   : > { %v4213_v11 = vsel %vm4108_vm11, %v4212_v19, %v4195_v44  ;;  %4225 = vst.msk [vmem:[%s7414_s8 + $0x28] sm:$0xff] %vm1394_vm8, %v4217_v10 }
 0x448   : > { %4221 = vst.msk [vmem:[%s7414_s8 + $0x8] sm:$0xff] %vm1394_vm8, %v4213_v11 }
 0x449 PF: > { %s16_s23 = sadd.s32 1, %s5040_s23   ;;  %s7778_s21 = smov %s5036_s22 }
 0x44a   : > { %p13_p5 = scmp.ge.s32.totalorder %s16_s23, 4   ;;  %s7779_s22 = smov %s7781_s24 }
 0x44c   :  { %15 = sbr.rel (!%p13_p5) target bundleno = 2 (0x2), region = 85 }

</bundles_post_ra>
